<compile_context>
chip_gen: v5e
topology: v5e:2x2
jax: 0.10.0
libtpu: 0.0.40
codegen_flags: <defaults>
</compile_context>

<pallas_src>
import math
import jax
import jax.numpy as jnp
from jax.experimental import pallas as pl
from jax.experimental.pallas import tpu as pltpu

# Layer widths: dim_input -> 512 -> 256 -> 128 -> 64 -> 32 -> 16 -> 8 -> 4 -> 3
HIDDEN_DIMS = [512, 256, 128, 64, 32, 16, 8, 4, 3]
NEG_SLOPE = 0.4
LANE = 128


def _leaky_relu(y):
    return jnp.where(y >= 0, y, NEG_SLOPE * y)


def _round_up(n, m):
    return ((n + m - 1) // m) * m


def encoder_kernel(*refs):
    # refs = (x_ref, w1, b1, w2, b2, ..., w9, b9, o_ref)
    x_ref = refs[0]
    o_ref = refs[-1]
    param_refs = refs[1:-1]
    n_layers = len(param_refs) // 2

    # Activations carried in bf16 for the MXU; epilogue (bias + LeakyReLU)
    # done in f32 on the VPU.
    h_bf16 = x_ref[...]                      # (bm, in_pad) bf16
    act_f32 = None
    for li in range(n_layers):
        w_ref = param_refs[2 * li]           # (in_pad, out_pad) bf16
        b_ref = param_refs[2 * li + 1]       # (1, out_pad) f32
        y = jnp.dot(h_bf16, w_ref[...], preferred_element_type=jnp.float32)
        y = y + b_ref[...]                   # broadcasts over batch rows
        act_f32 = _leaky_relu(y)
        h_bf16 = act_f32.astype(jnp.bfloat16)
    o_ref[...] = act_f32.astype(o_ref.dtype)  # lane-dense (bm, 128) store


def init_params(dim_input, key):
    """Deterministic parameter init mirroring the module's __init__.

    Weights: xavier_uniform (gain=1)  -> U(-a, a), a = sqrt(6/(fan_in+fan_out))
    Biases : PyTorch Linear default   -> U(-1/sqrt(fan_in), 1/sqrt(fan_in))
    Weights are stored as (in, out) = PyTorch weight.T
    """
    dims = [dim_input] + HIDDEN_DIMS
    params = []
    for i in range(len(HIDDEN_DIMS)):
        fan_in, fan_out = dims[i], dims[i + 1]
        key, kw, kb = jax.random.split(key, 3)
        a = math.sqrt(6.0 / (fan_in + fan_out))
        w = jax.random.uniform(kw, (fan_in, fan_out), jnp.float32, -a, a)
        bb = 1.0 / math.sqrt(fan_in)
        b = jax.random.uniform(kb, (1, fan_out), jnp.float32, -bb, bb)
        params.append((w, b))
    return params


def _pad_params(params, dim_input):
    """Zero-pad every layer's width up to a multiple of 128 lanes.

    Padded output columns have zero weights & zero bias -> LeakyReLU(0)=0,
    and padded input rows are multiplied by zero-padded activations, so the
    real (unpadded) outputs are bit-for-bit unaffected by the padding.
    Weights are cast to bf16 for native-rate MXU; biases stay f32.
    """
    dims = [dim_input] + HIDDEN_DIMS
    padded = []
    for i, (w, b) in enumerate(params):
        in_d, out_d = dims[i], dims[i + 1]
        in_p, out_p = _round_up(in_d, LANE), _round_up(out_d, LANE)
        wp = jnp.zeros((in_p, out_p), jnp.bfloat16)
        wp = wp.at[:in_d, :out_d].set(w.astype(jnp.bfloat16))
        bp = jnp.zeros((1, out_p), jnp.float32)
        bp = bp.at[:, :out_d].set(b)
        padded.append((wp, bp))
    return padded


def encoder_forward(x, params, *, bm=128):
    B, dim_input = x.shape
    out_dim = HIDDEN_DIMS[-1]
    din_p = _round_up(dim_input, LANE)
    out_p = _round_up(out_dim, LANE)
    B_p = _round_up(B, bm)                   # no divisibility assert: pad batch

    padded_params = _pad_params(params, dim_input)

    # Zero-padded, bf16 input slab (halves activation DMA).
    x_p = jnp.zeros((B_p, din_p), jnp.bfloat16)
    x_p = x_p.at[:B, :dim_input].set(x.astype(jnp.bfloat16))

    # BlockSpecs:
    #  - x / out: tiled along batch only (bm=128 rows), full lane-padded width
    #  - weights / biases: full arrays resident in VMEM for every grid step
    flat_params = []
    in_specs = [pl.BlockSpec((bm, din_p), lambda i: (i, 0))]
    for wp, bp in padded_params:
        flat_params += [wp, bp]
        in_specs.append(pl.BlockSpec(wp.shape, lambda i: (0, 0)))
        in_specs.append(pl.BlockSpec(bp.shape, lambda i: (0, 0)))
    out_spec = pl.BlockSpec((bm, out_p), lambda i: (i, 0))

    out_padded = pl.pallas_call(
        encoder_kernel,
        out_shape=jax.ShapeDtypeStruct((B_p, out_p), jnp.float32),
        grid_spec=pltpu.PrefetchScalarGridSpec(
            num_scalar_prefetch=0,
            grid=(pl.cdiv(B_p, bm),),
            in_specs=in_specs,
            out_specs=out_spec,
        ),
        compiler_params=pltpu.CompilerParams(
            dimension_semantics=("parallel",),   # batch steps split across TCs
            vmem_limit_bytes=64 * 1024 * 1024,
        ),
    )(x_p, *flat_params)

    # Slice away batch + lane padding in the wrapper.
    return out_padded[:B, :out_dim]


def encoder_reference(x, params):
    """Reference mirroring the kernel's dtype policy (bf16 matmul, f32 acc)."""
    h = x.astype(jnp.float32)
    for w, b in params:
        y = jnp.dot(h.astype(jnp.bfloat16), w.astype(jnp.bfloat16),
                    preferred_element_type=jnp.float32) + b
        h = _leaky_relu(y)
    return h


if __name__ == "__main__":
    key = jax.random.PRNGKey(0)
    k_x, k_p = jax.random.split(key)

    B = 200                 # deliberately NOT a multiple of bm=128
    dim_input = 64          # small synthetic input dim for the first Linear
    x = jax.random.normal(k_x, (B, dim_input), dtype=jnp.float32)
    params = init_params(dim_input, k_p)

    out = encoder_forward(x, params, bm=128)
    out = jax.block_until_ready(out)

    ref = encoder_reference(x, params)
    assert out.shape == (B, 3)
    assert jnp.allclose(out, ref, atol=1e-3, rtol=1e-3), "mismatch vs reference"

    print("KERNEL_OK")
</pallas_src>

<mosaic_0001>
module attributes {stable_mosaic.version = 11 : i64} {
  func.func @encoder_kernel(%arg0: i32, %arg1: memref<128x128xbf16, #tpu.memory_space<vmem>>, %arg2: memref<128x512xbf16, #tpu.memory_space<vmem>>, %arg3: memref<1x512xf32, #tpu.memory_space<vmem>>, %arg4: memref<512x256xbf16, #tpu.memory_space<vmem>>, %arg5: memref<1x256xf32, #tpu.memory_space<vmem>>, %arg6: memref<256x128xbf16, #tpu.memory_space<vmem>>, %arg7: memref<1x128xf32, #tpu.memory_space<vmem>>, %arg8: memref<128x128xbf16, #tpu.memory_space<vmem>>, %arg9: memref<1x128xf32, #tpu.memory_space<vmem>>, %arg10: memref<128x128xbf16, #tpu.memory_space<vmem>>, %arg11: memref<1x128xf32, #tpu.memory_space<vmem>>, %arg12: memref<128x128xbf16, #tpu.memory_space<vmem>>, %arg13: memref<1x128xf32, #tpu.memory_space<vmem>>, %arg14: memref<128x128xbf16, #tpu.memory_space<vmem>>, %arg15: memref<1x128xf32, #tpu.memory_space<vmem>>, %arg16: memref<128x128xbf16, #tpu.memory_space<vmem>>, %arg17: memref<1x128xf32, #tpu.memory_space<vmem>>, %arg18: memref<128x128xbf16, #tpu.memory_space<vmem>>, %arg19: memref<1x128xf32, #tpu.memory_space<vmem>>, %arg20: memref<128x128xf32, #tpu.memory_space<vmem>>) attributes {dimension_semantics = [#tpu.dimension_semantics<parallel>], iteration_bounds = array<i64: 2>, scalar_prefetch = 0 : i64, scratch_operands = 0 : i64, tpu.core_type = #tpu.core_type<tc>, window_params = [{transform_indices = @transform_0, window_bounds = array<i64: 128, 128>}, {pipeline_mode = #tpu.pipeline_mode<synchronous>, transform_indices = @transform_1, window_bounds = array<i64: 128, 512>}, {pipeline_mode = #tpu.pipeline_mode<synchronous>, transform_indices = @transform_2, window_bounds = array<i64: 1, 512>}, {pipeline_mode = #tpu.pipeline_mode<synchronous>, transform_indices = @transform_3, window_bounds = array<i64: 512, 256>}, {pipeline_mode = #tpu.pipeline_mode<synchronous>, transform_indices = @transform_4, window_bounds = array<i64: 1, 256>}, {pipeline_mode = #tpu.pipeline_mode<synchronous>, transform_indices = @transform_5, window_bounds = array<i64: 256, 128>}, {pipeline_mode = #tpu.pipeline_mode<synchronous>, transform_indices = @transform_6, window_bounds = array<i64: 1, 128>}, {pipeline_mode = #tpu.pipeline_mode<synchronous>, transform_indices = @transform_7, window_bounds = array<i64: 128, 128>}, {pipeline_mode = #tpu.pipeline_mode<synchronous>, transform_indices = @transform_8, window_bounds = array<i64: 1, 128>}, {pipeline_mode = #tpu.pipeline_mode<synchronous>, transform_indices = @transform_9, window_bounds = array<i64: 128, 128>}, {pipeline_mode = #tpu.pipeline_mode<synchronous>, transform_indices = @transform_10, window_bounds = array<i64: 1, 128>}, {pipeline_mode = #tpu.pipeline_mode<synchronous>, transform_indices = @transform_11, window_bounds = array<i64: 128, 128>}, {pipeline_mode = #tpu.pipeline_mode<synchronous>, transform_indices = @transform_12, window_bounds = array<i64: 1, 128>}, {pipeline_mode = #tpu.pipeline_mode<synchronous>, transform_indices = @transform_13, window_bounds = array<i64: 128, 128>}, {pipeline_mode = #tpu.pipeline_mode<synchronous>, transform_indices = @transform_14, window_bounds = array<i64: 1, 128>}, {pipeline_mode = #tpu.pipeline_mode<synchronous>, transform_indices = @transform_15, window_bounds = array<i64: 128, 128>}, {pipeline_mode = #tpu.pipeline_mode<synchronous>, transform_indices = @transform_16, window_bounds = array<i64: 1, 128>}, {pipeline_mode = #tpu.pipeline_mode<synchronous>, transform_indices = @transform_17, window_bounds = array<i64: 128, 128>}, {pipeline_mode = #tpu.pipeline_mode<synchronous>, transform_indices = @transform_18, window_bounds = array<i64: 1, 128>}, {transform_indices = @transform_19, window_bounds = array<i64: 128, 128>}]} {
    %c0 = arith.constant 0 : index
    %c0_0 = arith.constant 0 : index
    %0 = vector.load %arg1[%c0, %c0_0] : memref<128x128xbf16, #tpu.memory_space<vmem>>, vector<128x128xbf16>
    %c0_1 = arith.constant 0 : index
    %c0_2 = arith.constant 0 : index
    %1 = vector.load %arg2[%c0_1, %c0_2] : memref<128x512xbf16, #tpu.memory_space<vmem>>, vector<128x512xbf16>
    %cst = arith.constant dense<0.000000e+00> : vector<128x512xf32>
    %2 = tpu.matmul %0, %1, %cst {dimension_numbers = #tpu.dot_dimension_numbers<[1], [0], [0], [1], [0, 0, 1, 1], [], []>} : vector<128x128xbf16>, vector<128x512xbf16>, vector<128x512xf32> -> vector<128x512xf32>
    %c0_3 = arith.constant 0 : index
    %c0_4 = arith.constant 0 : index
    %3 = vector.load %arg3[%c0_3, %c0_4] : memref<1x512xf32, #tpu.memory_space<vmem>>, vector<1x512xf32>
    %4 = vector.broadcast %3 : vector<1x512xf32> to vector<128x512xf32>
    %5 = arith.addf %2, %4 : vector<128x512xf32>
    %cst_5 = arith.constant 0.000000e+00 : f32
    %6 = vector.broadcast %cst_5 : f32 to vector<128x512xf32>
    %7 = arith.cmpf oge, %5, %6 : vector<128x512xf32>
    %cst_6 = arith.constant 4.000000e-01 : f32
    %8 = vector.broadcast %cst_6 : f32 to vector<128x512xf32>
    %9 = arith.mulf %8, %5 : vector<128x512xf32>
    %10 = arith.select %7, %5, %9 : vector<128x512xi1>, vector<128x512xf32>
    %11 = arith.truncf %10 : vector<128x512xf32> to vector<128x512xbf16>
    %c0_7 = arith.constant 0 : index
    %c0_8 = arith.constant 0 : index
    %12 = vector.load %arg4[%c0_7, %c0_8] : memref<512x256xbf16, #tpu.memory_space<vmem>>, vector<512x256xbf16>
    %cst_9 = arith.constant dense<0.000000e+00> : vector<128x256xf32>
    %13 = tpu.matmul %11, %12, %cst_9 {dimension_numbers = #tpu.dot_dimension_numbers<[1], [0], [0], [1], [0, 0, 1, 1], [], []>} : vector<128x512xbf16>, vector<512x256xbf16>, vector<128x256xf32> -> vector<128x256xf32>
    %c0_10 = arith.constant 0 : index
    %c0_11 = arith.constant 0 : index
    %14 = vector.load %arg5[%c0_10, %c0_11] : memref<1x256xf32, #tpu.memory_space<vmem>>, vector<1x256xf32>
    %15 = vector.broadcast %14 : vector<1x256xf32> to vector<128x256xf32>
    %16 = arith.addf %13, %15 : vector<128x256xf32>
    %cst_12 = arith.constant 0.000000e+00 : f32
    %17 = vector.broadcast %cst_12 : f32 to vector<128x256xf32>
    %18 = arith.cmpf oge, %16, %17 : vector<128x256xf32>
    %cst_13 = arith.constant 4.000000e-01 : f32
    %19 = vector.broadcast %cst_13 : f32 to vector<128x256xf32>
    %20 = arith.mulf %19, %16 : vector<128x256xf32>
    %21 = arith.select %18, %16, %20 : vector<128x256xi1>, vector<128x256xf32>
    %22 = arith.truncf %21 : vector<128x256xf32> to vector<128x256xbf16>
    %c0_14 = arith.constant 0 : index
    %c0_15 = arith.constant 0 : index
    %23 = vector.load %arg6[%c0_14, %c0_15] : memref<256x128xbf16, #tpu.memory_space<vmem>>, vector<256x128xbf16>
    %cst_16 = arith.constant dense<0.000000e+00> : vector<128x128xf32>
    %24 = tpu.matmul %22, %23, %cst_16 {dimension_numbers = #tpu.dot_dimension_numbers<[1], [0], [0], [1], [0, 0, 1, 1], [], []>} : vector<128x256xbf16>, vector<256x128xbf16>, vector<128x128xf32> -> vector<128x128xf32>
    %c0_17 = arith.constant 0 : index
    %c0_18 = arith.constant 0 : index
    %25 = vector.load %arg7[%c0_17, %c0_18] : memref<1x128xf32, #tpu.memory_space<vmem>>, vector<1x128xf32>
    %26 = vector.broadcast %25 : vector<1x128xf32> to vector<128x128xf32>
    %27 = arith.addf %24, %26 : vector<128x128xf32>
    %cst_19 = arith.constant 0.000000e+00 : f32
    %28 = vector.broadcast %cst_19 : f32 to vector<128x128xf32>
    %29 = arith.cmpf oge, %27, %28 : vector<128x128xf32>
    %cst_20 = arith.constant 4.000000e-01 : f32
    %30 = vector.broadcast %cst_20 : f32 to vector<128x128xf32>
    %31 = arith.mulf %30, %27 : vector<128x128xf32>
    %32 = arith.select %29, %27, %31 : vector<128x128xi1>, vector<128x128xf32>
    %33 = arith.truncf %32 : vector<128x128xf32> to vector<128x128xbf16>
    %c0_21 = arith.constant 0 : index
    %c0_22 = arith.constant 0 : index
    %34 = vector.load %arg8[%c0_21, %c0_22] : memref<128x128xbf16, #tpu.memory_space<vmem>>, vector<128x128xbf16>
    %cst_23 = arith.constant dense<0.000000e+00> : vector<128x128xf32>
    %35 = tpu.matmul %33, %34, %cst_23 {dimension_numbers = #tpu.dot_dimension_numbers<[1], [0], [0], [1], [0, 0, 1, 1], [], []>} : vector<128x128xbf16>, vector<128x128xbf16>, vector<128x128xf32> -> vector<128x128xf32>
    %c0_24 = arith.constant 0 : index
    %c0_25 = arith.constant 0 : index
    %36 = vector.load %arg9[%c0_24, %c0_25] : memref<1x128xf32, #tpu.memory_space<vmem>>, vector<1x128xf32>
    %37 = vector.broadcast %36 : vector<1x128xf32> to vector<128x128xf32>
    %38 = arith.addf %35, %37 : vector<128x128xf32>
    %cst_26 = arith.constant 0.000000e+00 : f32
    %39 = vector.broadcast %cst_26 : f32 to vector<128x128xf32>
    %40 = arith.cmpf oge, %38, %39 : vector<128x128xf32>
    %cst_27 = arith.constant 4.000000e-01 : f32
    %41 = vector.broadcast %cst_27 : f32 to vector<128x128xf32>
    %42 = arith.mulf %41, %38 : vector<128x128xf32>
    %43 = arith.select %40, %38, %42 : vector<128x128xi1>, vector<128x128xf32>
    %44 = arith.truncf %43 : vector<128x128xf32> to vector<128x128xbf16>
    %c0_28 = arith.constant 0 : index
    %c0_29 = arith.constant 0 : index
    %45 = vector.load %arg10[%c0_28, %c0_29] : memref<128x128xbf16, #tpu.memory_space<vmem>>, vector<128x128xbf16>
    %cst_30 = arith.constant dense<0.000000e+00> : vector<128x128xf32>
    %46 = tpu.matmul %44, %45, %cst_30 {dimension_numbers = #tpu.dot_dimension_numbers<[1], [0], [0], [1], [0, 0, 1, 1], [], []>} : vector<128x128xbf16>, vector<128x128xbf16>, vector<128x128xf32> -> vector<128x128xf32>
    %c0_31 = arith.constant 0 : index
    %c0_32 = arith.constant 0 : index
    %47 = vector.load %arg11[%c0_31, %c0_32] : memref<1x128xf32, #tpu.memory_space<vmem>>, vector<1x128xf32>
    %48 = vector.broadcast %47 : vector<1x128xf32> to vector<128x128xf32>
    %49 = arith.addf %46, %48 : vector<128x128xf32>
    %cst_33 = arith.constant 0.000000e+00 : f32
    %50 = vector.broadcast %cst_33 : f32 to vector<128x128xf32>
    %51 = arith.cmpf oge, %49, %50 : vector<128x128xf32>
    %cst_34 = arith.constant 4.000000e-01 : f32
    %52 = vector.broadcast %cst_34 : f32 to vector<128x128xf32>
    %53 = arith.mulf %52, %49 : vector<128x128xf32>
    %54 = arith.select %51, %49, %53 : vector<128x128xi1>, vector<128x128xf32>
    %55 = arith.truncf %54 : vector<128x128xf32> to vector<128x128xbf16>
    %c0_35 = arith.constant 0 : index
    %c0_36 = arith.constant 0 : index
    %56 = vector.load %arg12[%c0_35, %c0_36] : memref<128x128xbf16, #tpu.memory_space<vmem>>, vector<128x128xbf16>
    %cst_37 = arith.constant dense<0.000000e+00> : vector<128x128xf32>
    %57 = tpu.matmul %55, %56, %cst_37 {dimension_numbers = #tpu.dot_dimension_numbers<[1], [0], [0], [1], [0, 0, 1, 1], [], []>} : vector<128x128xbf16>, vector<128x128xbf16>, vector<128x128xf32> -> vector<128x128xf32>
    %c0_38 = arith.constant 0 : index
    %c0_39 = arith.constant 0 : index
    %58 = vector.load %arg13[%c0_38, %c0_39] : memref<1x128xf32, #tpu.memory_space<vmem>>, vector<1x128xf32>
    %59 = vector.broadcast %58 : vector<1x128xf32> to vector<128x128xf32>
    %60 = arith.addf %57, %59 : vector<128x128xf32>
    %cst_40 = arith.constant 0.000000e+00 : f32
    %61 = vector.broadcast %cst_40 : f32 to vector<128x128xf32>
    %62 = arith.cmpf oge, %60, %61 : vector<128x128xf32>
    %cst_41 = arith.constant 4.000000e-01 : f32
    %63 = vector.broadcast %cst_41 : f32 to vector<128x128xf32>
    %64 = arith.mulf %63, %60 : vector<128x128xf32>
    %65 = arith.select %62, %60, %64 : vector<128x128xi1>, vector<128x128xf32>
    %66 = arith.truncf %65 : vector<128x128xf32> to vector<128x128xbf16>
    %c0_42 = arith.constant 0 : index
    %c0_43 = arith.constant 0 : index
    %67 = vector.load %arg14[%c0_42, %c0_43] : memref<128x128xbf16, #tpu.memory_space<vmem>>, vector<128x128xbf16>
    %cst_44 = arith.constant dense<0.000000e+00> : vector<128x128xf32>
    %68 = tpu.matmul %66, %67, %cst_44 {dimension_numbers = #tpu.dot_dimension_numbers<[1], [0], [0], [1], [0, 0, 1, 1], [], []>} : vector<128x128xbf16>, vector<128x128xbf16>, vector<128x128xf32> -> vector<128x128xf32>
    %c0_45 = arith.constant 0 : index
    %c0_46 = arith.constant 0 : index
    %69 = vector.load %arg15[%c0_45, %c0_46] : memref<1x128xf32, #tpu.memory_space<vmem>>, vector<1x128xf32>
    %70 = vector.broadcast %69 : vector<1x128xf32> to vector<128x128xf32>
    %71 = arith.addf %68, %70 : vector<128x128xf32>
    %cst_47 = arith.constant 0.000000e+00 : f32
    %72 = vector.broadcast %cst_47 : f32 to vector<128x128xf32>
    %73 = arith.cmpf oge, %71, %72 : vector<128x128xf32>
    %cst_48 = arith.constant 4.000000e-01 : f32
    %74 = vector.broadcast %cst_48 : f32 to vector<128x128xf32>
    %75 = arith.mulf %74, %71 : vector<128x128xf32>
    %76 = arith.select %73, %71, %75 : vector<128x128xi1>, vector<128x128xf32>
    %77 = arith.truncf %76 : vector<128x128xf32> to vector<128x128xbf16>
    %c0_49 = arith.constant 0 : index
    %c0_50 = arith.constant 0 : index
    %78 = vector.load %arg16[%c0_49, %c0_50] : memref<128x128xbf16, #tpu.memory_space<vmem>>, vector<128x128xbf16>
    %cst_51 = arith.constant dense<0.000000e+00> : vector<128x128xf32>
    %79 = tpu.matmul %77, %78, %cst_51 {dimension_numbers = #tpu.dot_dimension_numbers<[1], [0], [0], [1], [0, 0, 1, 1], [], []>} : vector<128x128xbf16>, vector<128x128xbf16>, vector<128x128xf32> -> vector<128x128xf32>
    %c0_52 = arith.constant 0 : index
    %c0_53 = arith.constant 0 : index
    %80 = vector.load %arg17[%c0_52, %c0_53] : memref<1x128xf32, #tpu.memory_space<vmem>>, vector<1x128xf32>
    %81 = vector.broadcast %80 : vector<1x128xf32> to vector<128x128xf32>
    %82 = arith.addf %79, %81 : vector<128x128xf32>
    %cst_54 = arith.constant 0.000000e+00 : f32
    %83 = vector.broadcast %cst_54 : f32 to vector<128x128xf32>
    %84 = arith.cmpf oge, %82, %83 : vector<128x128xf32>
    %cst_55 = arith.constant 4.000000e-01 : f32
    %85 = vector.broadcast %cst_55 : f32 to vector<128x128xf32>
    %86 = arith.mulf %85, %82 : vector<128x128xf32>
    %87 = arith.select %84, %82, %86 : vector<128x128xi1>, vector<128x128xf32>
    %88 = arith.truncf %87 : vector<128x128xf32> to vector<128x128xbf16>
    %c0_56 = arith.constant 0 : index
    %c0_57 = arith.constant 0 : index
    %89 = vector.load %arg18[%c0_56, %c0_57] : memref<128x128xbf16, #tpu.memory_space<vmem>>, vector<128x128xbf16>
    %cst_58 = arith.constant dense<0.000000e+00> : vector<128x128xf32>
    %90 = tpu.matmul %88, %89, %cst_58 {dimension_numbers = #tpu.dot_dimension_numbers<[1], [0], [0], [1], [0, 0, 1, 1], [], []>} : vector<128x128xbf16>, vector<128x128xbf16>, vector<128x128xf32> -> vector<128x128xf32>
    %c0_59 = arith.constant 0 : index
    %c0_60 = arith.constant 0 : index
    %91 = vector.load %arg19[%c0_59, %c0_60] : memref<1x128xf32, #tpu.memory_space<vmem>>, vector<1x128xf32>
    %92 = vector.broadcast %91 : vector<1x128xf32> to vector<128x128xf32>
    %93 = arith.addf %90, %92 : vector<128x128xf32>
    %cst_61 = arith.constant 0.000000e+00 : f32
    %94 = vector.broadcast %cst_61 : f32 to vector<128x128xf32>
    %95 = arith.cmpf oge, %93, %94 : vector<128x128xf32>
    %cst_62 = arith.constant 4.000000e-01 : f32
    %96 = vector.broadcast %cst_62 : f32 to vector<128x128xf32>
    %97 = arith.mulf %96, %93 : vector<128x128xf32>
    %98 = arith.select %95, %93, %97 : vector<128x128xi1>, vector<128x128xf32>
    %c0_63 = arith.constant 0 : index
    %c0_64 = arith.constant 0 : index
    %99 = vector.load %arg20[%c0_63, %c0_64] : memref<128x128xf32, #tpu.memory_space<vmem>>, vector<128x128xf32>
    tpu.vector_store %arg20[%c0_63, %c0_64], %98 {strides = array<i32>} : memref<128x128xf32, #tpu.memory_space<vmem>>, vector<128x128xf32>,
    return
  }
  func.func @transform_0(%arg0: i32) -> (i32, i32) {
    %c0_i32 = arith.constant 0 : i32
    %c0_i32_0 = arith.constant 0 : i32
    return %arg0, %c0_i32 : i32, i32
  }
  func.func @transform_1(%arg0: i32) -> (i32, i32) {
    %c0_i32 = arith.constant 0 : i32
    %c0_i32_0 = arith.constant 0 : i32
    %c0_i32_1 = arith.constant 0 : i32
    return %c0_i32, %c0_i32_0 : i32, i32
  }
  func.func @transform_2(%arg0: i32) -> (i32, i32) {
    %c0_i32 = arith.constant 0 : i32
    %c0_i32_0 = arith.constant 0 : i32
    %c0_i32_1 = arith.constant 0 : i32
    return %c0_i32, %c0_i32_0 : i32, i32
  }
  func.func @transform_3(%arg0: i32) -> (i32, i32) {
    %c0_i32 = arith.constant 0 : i32
    %c0_i32_0 = arith.constant 0 : i32
    %c0_i32_1 = arith.constant 0 : i32
    return %c0_i32, %c0_i32_0 : i32, i32
  }
  func.func @transform_4(%arg0: i32) -> (i32, i32) {
    %c0_i32 = arith.constant 0 : i32
    %c0_i32_0 = arith.constant 0 : i32
    %c0_i32_1 = arith.constant 0 : i32
    return %c0_i32, %c0_i32_0 : i32, i32
  }
  func.func @transform_5(%arg0: i32) -> (i32, i32) {
    %c0_i32 = arith.constant 0 : i32
    %c0_i32_0 = arith.constant 0 : i32
    %c0_i32_1 = arith.constant 0 : i32
    return %c0_i32, %c0_i32_0 : i32, i32
  }
  func.func @transform_6(%arg0: i32) -> (i32, i32) {
    %c0_i32 = arith.constant 0 : i32
    %c0_i32_0 = arith.constant 0 : i32
    %c0_i32_1 = arith.constant 0 : i32
    return %c0_i32, %c0_i32_0 : i32, i32
  }
  func.func @transform_7(%arg0: i32) -> (i32, i32) {
    %c0_i32 = arith.constant 0 : i32
    %c0_i32_0 = arith.constant 0 : i32
    %c0_i32_1 = arith.constant 0 : i32
    return %c0_i32, %c0_i32_0 : i32, i32
  }
  func.func @transform_8(%arg0: i32) -> (i32, i32) {
    %c0_i32 = arith.constant 0 : i32
    %c0_i32_0 = arith.constant 0 : i32
    %c0_i32_1 = arith.constant 0 : i32
    return %c0_i32, %c0_i32_0 : i32, i32
  }
  func.func @transform_9(%arg0: i32) -> (i32, i32) {
    %c0_i32 = arith.constant 0 : i32
    %c0_i32_0 = arith.constant 0 : i32
    %c0_i32_1 = arith.constant 0 : i32
    return %c0_i32, %c0_i32_0 : i32, i32
  }
  func.func @transform_10(%arg0: i32) -> (i32, i32) {
    %c0_i32 = arith.constant 0 : i32
    %c0_i32_0 = arith.constant 0 : i32
    %c0_i32_1 = arith.constant 0 : i32
    return %c0_i32, %c0_i32_0 : i32, i32
  }
  func.func @transform_11(%arg0: i32) -> (i32, i32) {
    %c0_i32 = arith.constant 0 : i32
    %c0_i32_0 = arith.constant 0 : i32
    %c0_i32_1 = arith.constant 0 : i32
    return %c0_i32, %c0_i32_0 : i32, i32
  }
  func.func @transform_12(%arg0: i32) -> (i32, i32) {
    %c0_i32 = arith.constant 0 : i32
    %c0_i32_0 = arith.constant 0 : i32
    %c0_i32_1 = arith.constant 0 : i32
    return %c0_i32, %c0_i32_0 : i32, i32
  }
  func.func @transform_13(%arg0: i32) -> (i32, i32) {
    %c0_i32 = arith.constant 0 : i32
    %c0_i32_0 = arith.constant 0 : i32
    %c0_i32_1 = arith.constant 0 : i32
    return %c0_i32, %c0_i32_0 : i32, i32
  }
  func.func @transform_14(%arg0: i32) -> (i32, i32) {
    %c0_i32 = arith.constant 0 : i32
    %c0_i32_0 = arith.constant 0 : i32
    %c0_i32_1 = arith.constant 0 : i32
    return %c0_i32, %c0_i32_0 : i32, i32
  }
  func.func @transform_15(%arg0: i32) -> (i32, i32) {
    %c0_i32 = arith.constant 0 : i32
    %c0_i32_0 = arith.constant 0 : i32
    %c0_i32_1 = arith.constant 0 : i32
    return %c0_i32, %c0_i32_0 : i32, i32
  }
  func.func @transform_16(%arg0: i32) -> (i32, i32) {
    %c0_i32 = arith.constant 0 : i32
    %c0_i32_0 = arith.constant 0 : i32
    %c0_i32_1 = arith.constant 0 : i32
    return %c0_i32, %c0_i32_0 : i32, i32
  }
  func.func @transform_17(%arg0: i32) -> (i32, i32) {
    %c0_i32 = arith.constant 0 : i32
    %c0_i32_0 = arith.constant 0 : i32
    %c0_i32_1 = arith.constant 0 : i32
    return %c0_i32, %c0_i32_0 : i32, i32
  }
  func.func @transform_18(%arg0: i32) -> (i32, i32) {
    %c0_i32 = arith.constant 0 : i32
    %c0_i32_0 = arith.constant 0 : i32
    %c0_i32_1 = arith.constant 0 : i32
    return %c0_i32, %c0_i32_0 : i32, i32
  }
  func.func @transform_19(%arg0: i32) -> (i32, i32) {
    %c0_i32 = arith.constant 0 : i32
    %c0_i32_0 = arith.constant 0 : i32
    return %arg0, %c0_i32 : i32, i32
  }
}

</mosaic_0001>

<bundles_post_ra>
// kernel: tpu_custom_call.1
= control target key start
LH: loop header
LB: loop body
LE: loop exit
PB: predicated region body
PF: predicated region fallthrough
CT: control target
= control target key end

     0   :  { %s6184_s0 = inlined_call_operand.hbm [shape: bf16[256,128], index: 0, kind: input, shape index: {}]   ;;  %s6185_s1 = inlined_call_operand.hbm [shape: bf16[128,512], index: 1, kind: input, shape index: {}]   ;;  %s6186_s2 = inlined_call_operand.hbm [shape: f32[1,512], index: 2, kind: input, shape index: {}]   ;;  %s6187_s3 = inlined_call_operand.hbm [shape: bf16[512,256], index: 3, kind: input, shape index: {}]   ;;  %s6188_s4 = inlined_call_operand.vmem [shape: f32[1,256], index: 4, kind: input, shape index: {}]   ;;  %s6189_s5 = inlined_call_operand.hbm [shape: bf16[256,128], index: 5, kind: input, shape index: {}]   ;;  %s6190_s6 = inlined_call_operand.vmem [shape: f32[1,128], index: 6, kind: input, shape index: {}]   ;;  %s6191_s7 = inlined_call_operand.hbm [shape: bf16[128,128], index: 7, kind: input, shape index: {}]   ;;  %s6192_s8 = inlined_call_operand.vmem [shape: f32[1,128], index: 8, kind: input, shape index: {}]   ;;  %s6193_s9 = inlined_call_operand.hbm [shape: bf16[128,128], index: 9, kind: input, shape index: {}]   ;;  %s6194_s10 = inlined_call_operand.vmem [shape: f32[1,128], index: 10, kind: input, shape index: {}]   ;;  %s6195_s11 = inlined_call_operand.hbm [shape: bf16[128,128], index: 11, kind: input, shape index: {}]   ;;  %s6196_s12 = inlined_call_operand.vmem [shape: f32[1,128], index: 12, kind: input, shape index: {}]   ;;  %s6197_s13 = inlined_call_operand.hbm [shape: bf16[128,128], index: 13, kind: input, shape index: {}]   ;;  %s6198_s14 = inlined_call_operand.vmem [shape: f32[1,128], index: 14, kind: input, shape index: {}]   ;;  %s6199_s15 = inlined_call_operand.hbm [shape: bf16[128,128], index: 15, kind: input, shape index: {}]   ;;  %s6200_s16 = inlined_call_operand.vmem [shape: f32[1,128], index: 16, kind: input, shape index: {}]   ;;  %s6201_s17 = inlined_call_operand.hbm [shape: bf16[128,128], index: 17, kind: input, shape index: {}]   ;;  %s6202_s18 = inlined_call_operand.vmem [shape: f32[1,128], index: 18, kind: input, shape index: {}]   ;;  %s6203_s19 = inlined_call_operand.hbm [shape: f32[256,128], index: 19, kind: output, shape index: {}]  }
   0x1   :  { %6208 = sst [smem:[#allocation28_spill]] %s6184_s0 }
   0x2   :  { %6209 = sst [smem:[#allocation29_spill]] %s6185_s1 }
   0x3   :  { %6210 = sst [smem:[#allocation30_spill]] %s6186_s2 }
   0x4   :  { %6211 = sst [smem:[#allocation31_spill]] %s6187_s3 }
   0x5   :  { %6212 = sst [smem:[#allocation32_spill]] %s6189_s5 }
   0x6   :  { %6213 = sst [smem:[#allocation33_spill]] %s6190_s6 }
   0x7   :  { %6214 = sst [smem:[#allocation34_spill]] %s6191_s7 }
   0x8   :  { %6215 = sst [smem:[#allocation35_spill]] %s6192_s8 }
   0x9   :  { %6216 = sst [smem:[#allocation36_spill]] %s6193_s9 }
   0xa   :  { %6217 = sst [smem:[#allocation37_spill]] %s6194_s10 }
   0xb   :  { %6218 = sst [smem:[#allocation38_spill]] %s6196_s12 }
   0xc   :  { %6219 = sst [smem:[#allocation39_spill]] %s6198_s14 }
   0xd   :  { %6220 = sst [smem:[#allocation40_spill]] %s6200_s16 }
   0xe   :  { %6221 = sst [smem:[#allocation41_spill]] %s6202_s18 }
   0xf   :  { %6222 = sst [smem:[#allocation42_spill]] %s6203_s19 }
  0x10   :  { %24 = vsyncpa [#allocation3], 0 }
  0x11   :  { %26 = vsyncpa [#allocation3 + $0x1], 0 }
  0x12   :  { %27 = vsyncpa [#allocation6], 0 }
  0x13   :  { %28 = vsyncpa [#allocation9], 0 }
  0x14   :  { %29 = vsyncpa [#allocation12], 0 }
  0x15   :  { %30 = vsyncpa [#allocation15], 0 }
  0x16   :  { %31 = vsyncpa [#allocation18], 0 }
  0x17   :  { %32 = vsyncpa [#allocation4], 0 }
  0x18   :  { %34 = vsyncpa [#allocation4 + $0x1], 0  ;;  %s5458_s0 = smov 0   ;;  %s5460_s30 = smov 0  }
  0x19   :  { %s5462_s20 = smov 0   ;;  %s5464_s21 = smov 0  }
  0x1a LB: > { %s6223_s2 = sld [smem:[#allocation29_spill]]  ;;  %s5482_s24 = sadd.s32 4294967295, %s5338_s21   ;;  %s5338_s21 = sphi %s5464_s21, %s6251_s21   ;;  %s5334_s20 = sphi %s5462_s20, %s6250_s20   ;;  %s5330_s30 = sphi %s5460_s30, %s6249_s30   ;;  %s5326_s0 = sphi %s5458_s0, %s6248_s0  }
  0x1b   : > { %p3885_p0 = scmp.ge.s32.totalorder %s5338_s21, 1  ;;  %p61_p1 = scmp.eq.s32.totalorder %s5482_s24, 0 }
  0x1c   : > { %p475_p2 = scmp.lt.s32.totalorder %s5338_s21, 3  ;;  %s5340_s3 = smov [#allocation5]  }
  0x1d   : > { %s488_s26 = sshll.u32 %s5340_s3, 4  ;;  %s6225_s29 = sld [smem:[#allocation31_spill]]  ;;  %s489_s26 = int_to_ptr.vmem [resolvable:$true] %s488_s26 }
  0x1e   : > { %p5487_p3 = pnand %p3885_p0, %p475_p2  ;;  %s5342_s3 = smov 256  }
  0x1f   : > { %s5343_s18 = smov 16   ;;  %s5344_s16 = smov 128  }
  0x20   : > { %s486_s23 = sshll.u32 %s6223_s2, 4  ;;  %p4804_p4 = pneg %p5487_p3  ;;  %s487_s23 = int_to_ptr.hbm [resolvable:$true] %s486_s23 }
  0x21   : > { %s5341_s2 = smov [#allocation8]   ;;  %s5345_s14 = smov 8  }
  0x22   : > { %p5499_p6 = pnand %p4804_p4, %p61_p1  ;;  %s514_s19 = sshll.u32 %s5341_s2, 4  ;;  %s515_s19 = int_to_ptr.vmem [resolvable:$true] %s514_s19 }
  0x23   : > { %s512_s1 = sshll.u32 %s6225_s29, 4  ;;  %s6227_s7 = sld [smem:[#allocation34_spill]]  ;;  %s513_s1 = int_to_ptr.hbm [resolvable:$true] %s512_s1 }
  0x24   : > { %4807 = dma.hbm_to_vmem [thread:$0]  (!%p5499_p6), %s487_s23, 4096, %s489_s26, [#allocation6], %s5342_s3, %s5342_s3, %s5343_s18  }
  0x25   : > { %4813 = dma.hbm_to_vmem [thread:$0]  (!%p5499_p6), %s513_s1, 8192, %s515_s19, [#allocation9], %s5344_s16, %s5344_s16, %s5345_s14  }
  0x26   : > { %s5346_s12 = smov [#allocation11]   ;;  %s580_s6 = sshll.u32 %s6195_s11, 4  ;;  %s581_s6 = int_to_ptr.hbm [resolvable:$true] %s580_s6 }
  0x27   : > { %s548_s10 = sshll.u32 %s5346_s12, 4  ;;  %s6206_s18 = smov 64   ;;  %s549_s10 = int_to_ptr.vmem [resolvable:$true] %s548_s10 }
  0x28   : > { %s6207_s23 = smov 4   ;;  %s5349_s14 = smov [#allocation14]  }
  0x29   : > { %s546_s29 = sshll.u32 %s6227_s7, 4  ;;  %s582_s16 = sshll.u32 %s5349_s14, 4  ;;  %s547_s29 = int_to_ptr.hbm [resolvable:$true] %s546_s29  ;;  %s583_s16 = int_to_ptr.vmem [resolvable:$true] %s582_s16 }
  0x2a   : > { %4819 = dma.hbm_to_vmem [thread:$0]  (!%p5499_p6), %s547_s29, 1024, %s549_s10, [#allocation12], %s6206_s18, %s6206_s18, %s6207_s23  }
  0x2b   : > { %s614_s12 = sshll.u32 %s6199_s15, 4  ;;  %s6228_s3 = sld [smem:[#allocation30_spill]]  ;;  %s615_s12 = int_to_ptr.hbm [resolvable:$true] %s614_s12 }
  0x2c   : > { %4825 = dma.hbm_to_vmem [thread:$0]  (!%p5499_p6), %s581_s6, 1024, %s583_s16, [#allocation15], %s6206_s18, %s6206_s18, %s6207_s23  }
  0x2d   : > { %s5350_s10 = smov [#allocation17]   ;;  %s5351_s29 = smov [#allocation7]  }
  0x2e   : > { %s616_s28 = sshll.u32 %s5350_s10, 4  ;;  %s503_s2 = sshll.u32 %s5351_s29, 4  ;;  %s617_s28 = int_to_ptr.vmem [resolvable:$true] %s616_s28  ;;  %s504_s2 = int_to_ptr.vmem [resolvable:$true] %s503_s2 }
  0x2f   : > { %4831 = dma.hbm_to_vmem [thread:$0]  (!%p5499_p6), %s615_s12, 1024, %s617_s28, [#allocation18], %s6206_s18, %s6206_s18, %s6207_s23  }
  0x30   : > { %s6229_s5 = sld [smem:[#allocation32_spill]]  ;;  %s5352_s1 = smov [#allocation10]  }
  0x31   : > { %s501_s27 = sshll.u32 %s6228_s3, 4  ;;  %s6230_s9 = sld [smem:[#allocation36_spill]]  ;;  %s502_s27 = int_to_ptr.hbm [resolvable:$true] %s501_s27 }
  0x32   : > { %4810 = dma.hbm_to_vmem [thread:$0]  (!%p5499_p6), %s502_s27, 64, %s504_s2, [#allocation6]  }
  0x33   : > { %s531_s3 = sshll.u32 %s5352_s1, 4  ;;  %s5353_s12 = smov [#allocation13]   ;;  %s532_s3 = int_to_ptr.vmem [resolvable:$true] %s531_s3 }
  0x34   : > { %s565_s10 = sshll.u32 %s5353_s12, 4  ;;  %s597_s29 = sshll.u32 %s6197_s13, 4  ;;  %s566_s10 = int_to_ptr.vmem [resolvable:$true] %s565_s10  ;;  %s598_s29 = int_to_ptr.hbm [resolvable:$true] %s597_s29 }
  0x35   : > { %s631_s19 = sshll.u32 %s6201_s17, 4  ;;  %s5355_s26 = smov [#allocation19]   ;;  %s632_s19 = int_to_ptr.hbm [resolvable:$true] %s631_s19 }
  0x36   : > { %s529_s6 = sshll.u32 %s6229_s5, 4  ;;  %s3884_s1 = sadd.s32 4294967294, %s5338_s21   ;;  %s530_s6 = int_to_ptr.hbm [resolvable:$true] %s529_s6 }
  0x37   : > { %s563_s8 = sshll.u32 %s6230_s9, 4  ;;  %p54_p8 = scmp.ne.s32.totalorder %s5334_s20, %s5330_s30  ;;  %s564_s8 = int_to_ptr.hbm [resolvable:$true] %s563_s8 }
  0x38   : > { %4816 = dma.hbm_to_vmem [thread:$0]  (!%p5499_p6), %s530_s6, 2048, %s532_s3, [#allocation9], %s6206_s18, %s6206_s18, %s6207_s23  }
  0x39   : > { %4822 = dma.hbm_to_vmem [thread:$0]  (!%p5499_p6), %s564_s8, 1024, %s566_s10, [#allocation12], %s6206_s18, %s6206_s18, %s6207_s23  }
  0x3a   : > { %s5354_s6 = smov [#allocation16]   ;;  %s633_s8 = sshll.u32 %s5355_s26, 4  ;;  %s634_s8 = int_to_ptr.vmem [resolvable:$true] %s633_s8 }
  0x3b   : > { %s599_s16 = sshll.u32 %s5354_s6, 4  ;;  %s5570_s3 = sadd.s32 1, %s5338_s21   ;;  %s600_s16 = int_to_ptr.vmem [resolvable:$true] %s599_s16 }
  0x3c   : > { %4828 = dma.hbm_to_vmem [thread:$0]  (!%p5499_p6), %s598_s29, 1024, %s600_s16, [#allocation15], %s6206_s18, %s6206_s18, %s6207_s23  }
  0x3d   : > { %4834 = dma.hbm_to_vmem [thread:$0]  (!%p5499_p6), %s632_s19, 1024, %s634_s8, [#allocation18], %s6206_s18, %s6206_s18, %s6207_s23  }
  0x3e   : > { %s44_s12 = ssub.s32 %s5338_s21, %s5570_s3  ;;  %s47_s10 = sadd.s32 1, %s5334_s20 }
  0x3f   : > { %p45_p7 = scmp.eq.s32.totalorder %s44_s12, 0  ;;  %p55_p9 = scmp.eq.s32.totalorder %s5338_s21, 0 }
  0x40   : > { %p60_p10 = scmp.ne.s32.totalorder %s5330_s30, %s5326_s0  ;;  %p462_p13 = scmp.eq.s32.totalorder %s5482_s24, 1 }
  0x41   : > { %s5581_s28 = scalar_select %p45_p7, %s5334_s20, %s47_s10  }
  0x42   : > { %p5583_p11 = por %p55_p9, %p54_p8  ;;  %p5589_p12 = por %p61_p1, %p60_p10 }
  0x43   : > { %p468_p0 = scmp.eq.s32.totalorder %s3884_s1, 1  ;;  %p4853_p2 = scmp.lt.s32.totalorder %s5338_s21, 2 }
  0x44   : > { %s650_s29 = sand.u32 1, %s5334_s20   ;;  %p5596_p4 = por %p462_p13, %p54_p8 }
  0x45   : > { %p5600_p6 = por %p468_p0, %p60_p10  ;;  %s3897_s19 = sshll.u32 %s650_s29, 6 }
  0x46   : > { %s4590_s6 = sshll.u32 %s5338_s21, 6  ;;  %s6235_s8 = sld [smem:[#allocation28_spill]] }
  0x47   : > { %s654_s10 = scalar_lea.vmem [#allocation2], %s3897_s19  ;;  %p5610_p7 = pnand %p4853_p2, %p5583_p11 }
  0x48   : > { %s662_s18 = sshll.u32 %s654_s10, 4  ;;  %s651_s5 = scalar_lea.sflag [#allocation3], %s650_s29  ;;  %s663_s18 = int_to_ptr.vmem [resolvable:$true] %s662_s18 }
  0x49   : > { %p5226_p9 = pneg %p5610_p7 }
  0x4c   : > { %s659_s12 = scalar_lea.hbm %s6235_s8, %s4590_s6  ;;  %s5229_s16 = scalar_lea.hbm %s6235_s8, 128 }
  0x4d   : > { %s660_s23 = sshll.u32 %s659_s12, 4  ;;  %s661_s23 = int_to_ptr.hbm [resolvable:$true] %s660_s23 }
  0x4e   : > { %s5222_s7 = sshra.s32 %s661_s23, 4  ;;  %s5223_s7 = int_to_ptr.hbm [resolvable:$true] %s5222_s7 }
  0x4f   : > { %s5224_s9 = scalar_lea.hbm %s5223_s7, 64  ;;  %p5230_p11 = scmp.lt.s32.totalorder %s5223_s7, %s6235_s8 }
  0x50   : > { %p5225_p8 = scmp.ne.s32.totalorder %s5223_s7, %s5224_s9  ;;  %p5231_p0 = scmp.lt.s32.totalorder %s5229_s16, %s5224_s9 }
  0x52   : > { %p5227_p10 = pnand %p5226_p9, %p5225_p8  ;;  %p5232_p2 = por %p5231_p0, %p5230_p11 }
  0x54   : > { %p5228_p13 = pneg %p5227_p10 }
  0x56   : > { %p5233_p5 = pnand %p5232_p2, %p5228_p13 }
  0x58   : > { %5236 = shalt.err (!%p5233_p5)
}
  0x59   : > { %s6237_s29 = smov 4   ;;  %s6238_s12 = smov 64  }
  0x5a   : > { %4838 = dma.hbm_to_vmem [thread:$0]  (!%p5610_p7), %s661_s23, 1024, %s663_s18, %s651_s5, %s6238_s12, %s6238_s12, %s6237_s29  }
  0x5b   : > { %674 = sbr.rel (%p5487_p3) target bundleno = 1692 (0x69c), region = 96  ;;  %s5630_s10 = sand.u32 (!%p5487_p3), 1, %s5330_s30  }
  0x5c   : > { %s3901_s7 = sshll.u32 (!%p5487_p3), %s5630_s10, 6  ;;  %s677_s9 = scalar_lea.sflag (!%p5487_p3), [#allocation3], %s5630_s10 }
  0x5d   : > { %s5634_s19 = scalar_lea.vmem (!%p5487_p3), [#allocation2], %s3901_s7 }
  0x60   : > { %5297 = dma.done.wait (%p5589_p12), %s677_s9, 1024  }
  0x61   : > { %5299 = vsyncadd (%p5589_p12), %s677_s9, 4294966272 }
  0x62   : > { %5301 = dma.done.wait (%p61_p1), [#allocation6], 4160  }
  0x63   : > { %5303 = vsyncadd (%p61_p1), [#allocation6], 4294963136 }
  0x64   : > { %5305 = dma.done.wait (%p61_p1), [#allocation9], 10240  }
  0x65   : > { %5307 = vsyncadd (%p61_p1), [#allocation9], 4294957056 }
  0x66   : > { %5309 = dma.done.wait (%p61_p1), [#allocation12], 2048  }
  0x67   : > { %5311 = vsyncadd (%p61_p1), [#allocation12], 4294965248 }
  0x68   : > { %5313 = dma.done.wait (%p61_p1), [#allocation15], 2048  }
  0x69   : > { %5315 = vsyncadd (%p61_p1), [#allocation15], 4294965248 }
  0x6a   : > { %5317 = dma.done.wait (%p61_p1), [#allocation18], 2048  }
  0x6b   : > { %5319 = vsyncadd (%p61_p1), [#allocation18], 4294965248  ;;  %v4059_v0 = vld [vmem:[#allocation5 + $0xe0] sm:$0xf]  ;;  %v4629_v1 = vld [vmem:[#allocation5 + $0xec] sm:$0xf0] }
  0x6c   : > { %v4627_v2 = vld [vmem:[#allocation5 + $0xe4] sm:$0xf]  ;;  %v4060_v3 = vor.u32 %v4629_v1, %v4059_v0  ;;  %v4061_v4 = vld [vmem:[#allocation5 + $0xf0] sm:$0xf0]  ;;  %v4067_v5 = vld [vmem:[#allocation5 + $0xe8] sm:$0xf] }
  0x6d   : > { %v4630_v6 = vld [vmem:[#allocation5 + $0xf4] sm:$0xf0]  ;;  %v4064_v7 = vor.u32 %v4627_v2, %v4061_v4  ;;  %v4628_v9 = vld [vmem:[#allocation5 + $0xec] sm:$0xf]  ;;  %v4069_v10 = vld [vmem:[#allocation5 + $0xf8] sm:$0xf0] }
  0x6e   : > { %v4068_v8 = vor.u32 %v4630_v6, %v4067_v5  ;;  %v4043_v11 = vld [vmem:[#allocation5 + $0xc0] sm:$0xf]  ;;  %1054 = vmatpush.bf16.msra.mxu0 %v4060_v3  ;;  %v4072_v12 = vor.u32 %v4628_v9, %v4069_v10  ;;  %v4625_v13 = vld [vmem:[#allocation5 + $0xcc] sm:$0xf0]  ;;  %v4623_v14 = vld [vmem:[#allocation5 + $0xc4] sm:$0xf] }
  0x6f   : > { %v4045_v15 = vld [vmem:[#allocation5 + $0xd0] sm:$0xf0]  ;;  %1103 = vmatpush.bf16.msra.mxu1 %v4064_v7  ;;  %v4044_v16 = vor.u32 %v4625_v13, %v4043_v11  ;;  %v4051_v18 = vld [vmem:[#allocation5 + $0xc8] sm:$0xf]  ;;  %v4626_v19 = vld [vmem:[#allocation5 + $0xd4] sm:$0xf0] }
  0x70   : > { %1152 = vmatpush.bf16.msra.mxu2 %v4068_v8  ;;  %v4048_v17 = vor.u32 %v4623_v14, %v4045_v15  ;;  %v4624_v20 = vld [vmem:[#allocation5 + $0xcc] sm:$0xf]  ;;  %1201 = vmatpush.bf16.msra.mxu3 %v4072_v12  ;;  %v4052_v21 = vor.u32 %v4626_v19, %v4051_v18  ;;  %v4053_v22 = vld [vmem:[#allocation5 + $0xd8] sm:$0xf0]  ;;  %v4027_v23 = vld [vmem:[#allocation5 + $0xa0] sm:$0xf] }
  0x71   : > { %v4621_v24 = vld [vmem:[#allocation5 + $0xac] sm:$0xf0]  ;;  %v4056_v25 = vor.u32 %v4624_v20, %v4053_v22  ;;  %v4619_v26 = vld [vmem:[#allocation5 + $0xa4] sm:$0xf]  ;;  %v4029_v27 = vld [vmem:[#allocation5 + $0xb0] sm:$0xf0] }
  0x72   : > { %v4035_v28 = vld [vmem:[#allocation5 + $0xa8] sm:$0xf]  ;;  %1055 = vmatpush.bf16.msra.mxu0 %v4044_v16  ;;  %v4028_v29 = vor.u32 %v4621_v24, %v4027_v23  ;;  %v4622_v30 = vld [vmem:[#allocation5 + $0xb4] sm:$0xf0]  ;;  %v4620_v31 = vld [vmem:[#allocation5 + $0xac] sm:$0xf]  ;;  %v4032_v33 = vor.u32 %v4619_v26, %v4029_v27 }
  0x73   : > { %v4037_v32 = vld [vmem:[#allocation5 + $0xb8] sm:$0xf0]  ;;  %1104 = vmatpush.bf16.msra.mxu1 %v4048_v17  ;;  %v4036_v34 = vor.u32 %v4622_v30, %v4035_v28  ;;  %v4011_v35 = vld [vmem:[#allocation5 + $0x80] sm:$0xf]  ;;  %v4617_v36 = vld [vmem:[#allocation5 + $0x8c] sm:$0xf0] }
  0x74   : > { %1153 = vmatpush.bf16.msra.mxu2 %v4052_v21  ;;  %v4615_v37 = vld [vmem:[#allocation5 + $0x84] sm:$0xf]  ;;  %1202 = vmatpush.bf16.msra.mxu3 %v4056_v25  ;;  %v4040_v38 = vor.u32 %v4620_v31, %v4037_v32  ;;  %v4013_v39 = vld [vmem:[#allocation5 + $0x90] sm:$0xf0]  ;;  %v4019_v40 = vld [vmem:[#allocation5 + $0x88] sm:$0xf]  ;;  %v4012_v44 = vor.u32 %v4617_v36, %v4011_v35 }
  0x75   : > { %v4618_v41 = vld [vmem:[#allocation5 + $0x94] sm:$0xf0]  ;;  %v4616_v42 = vld [vmem:[#allocation5 + $0x8c] sm:$0xf]  ;;  %v4021_v43 = vld [vmem:[#allocation5 + $0x98] sm:$0xf0]  ;;  %v4016_v45 = vor.u32 %v4615_v37, %v4013_v39 }
  0x76   : > { %1056 = vmatpush.bf16.msra.mxu0 %v4028_v29  ;;  %v4020_v46 = vor.u32 %v4618_v41, %v4019_v40  ;;  %v3995_v47 = vld [vmem:[#allocation5 + $0x60] sm:$0xf]  ;;  %v4613_v48 = vld [vmem:[#allocation5 + $0x6c] sm:$0xf0]  ;;  %v4611_v49 = vld [vmem:[#allocation5 + $0x64] sm:$0xf]  ;;  %v4024_v50 = vor.u32 %v4616_v42, %v4021_v43 }
  0x77   : > { %1105 = vmatpush.bf16.msra.mxu1 %v4032_v33  ;;  %v3997_v51 = vld [vmem:[#allocation5 + $0x70] sm:$0xf0]  ;;  %v4003_v52 = vld [vmem:[#allocation5 + $0x68] sm:$0xf]  ;;  %v4614_v53 = vld [vmem:[#allocation5 + $0x74] sm:$0xf0]  ;;  %v3996_v56 = vor.u32 %v4613_v48, %v3995_v47 }
  0x78   : > { %1154 = vmatpush.bf16.msra.mxu2 %v4036_v34  ;;  %1203 = vmatpush.bf16.msra.mxu3 %v4040_v38  ;;  %v4612_v54 = vld [vmem:[#allocation5 + $0x6c] sm:$0xf]  ;;  %v4005_v55 = vld [vmem:[#allocation5 + $0x78] sm:$0xf0]  ;;  %v4000_v57 = vor.u32 %v4611_v49, %v3997_v51  ;;  %v4004_v58 = vor.u32 %v4614_v53, %v4003_v52  ;;  %v3979_v59 = vld [vmem:[#allocation5 + $0x40] sm:$0xf] }
  0x79   : > { %v4609_v60 = vld [vmem:[#allocation5 + $0x4c] sm:$0xf0]  ;;  %v4607_v61 = vld [vmem:[#allocation5 + $0x44] sm:$0xf]  ;;  %v4008_v62 = vor.u32 %v4612_v54, %v4005_v55  ;;  %v3981_v63 = vld [vmem:[#allocation5 + $0x50] sm:$0xf0] }
  0x7a   : > { %1057 = vmatpush.bf16.msra.mxu0 %v4012_v44  ;;  %v3987_v0 = vld [vmem:[#allocation5 + $0x48] sm:$0xf]  ;;  %v4610_v1 = vld [vmem:[#allocation5 + $0x54] sm:$0xf0]  ;;  %v4608_v2 = vld [vmem:[#allocation5 + $0x4c] sm:$0xf]  ;;  %v3980_v4 = vor.u32 %v4609_v60, %v3979_v59  ;;  %v3984_v6 = vor.u32 %v4607_v61, %v3981_v63 }
  0x7b   : > { %1106 = vmatpush.bf16.msra.mxu1 %v4016_v45  ;;  %v3989_v3 = vld [vmem:[#allocation5 + $0x58] sm:$0xf0]  ;;  %v3963_v5 = vld [vmem:[#allocation5 + $0x20] sm:$0xf]  ;;  %v3988_v7 = vor.u32 %v4610_v1, %v3987_v0  ;;  %v4605_v8 = vld [vmem:[#allocation5 + $0x2c] sm:$0xf0] }
  0x7c   : > { %1155 = vmatpush.bf16.msra.mxu2 %v4020_v46  ;;  %1204 = vmatpush.bf16.msra.mxu3 %v4024_v50  ;;  %v4603_v9 = vld [vmem:[#allocation5 + $0x24] sm:$0xf]  ;;  %v3965_v10 = vld [vmem:[#allocation5 + $0x30] sm:$0xf0]  ;;  %v3992_v11 = vor.u32 %v4608_v2, %v3989_v3  ;;  %v3971_v12 = vld [vmem:[#allocation5 + $0x28] sm:$0xf]  ;;  %v3964_v18 = vor.u32 %v4605_v8, %v3963_v5 }
  0x7d   : > { %v4606_v13 = vld [vmem:[#allocation5 + $0x34] sm:$0xf0]  ;;  %v4604_v14 = vld [vmem:[#allocation5 + $0x2c] sm:$0xf]  ;;  %v3973_v15 = vld [vmem:[#allocation5 + $0x38] sm:$0xf0]  ;;  %v3968_v23 = vor.u32 %v4603_v9, %v3965_v10 }
  0x7e   : > { %1058 = vmatpush.bf16.msra.mxu0 %v3996_v56  ;;  %v3947_v16 = vld [vmem:[#allocation5] sm:$0xf]  ;;  %v4601_v17 = vld [vmem:[#allocation5 + $0xc] sm:$0xf0]  ;;  %v4599_v19 = vld [vmem:[#allocation5 + $0x4] sm:$0xf]  ;;  %v3972_v24 = vor.u32 %v4606_v13, %v3971_v12  ;;  %v3976_v29 = vor.u32 %v4604_v14, %v3973_v15 }
  0x7f   : > { %1107 = vmatpush.bf16.msra.mxu1 %v4000_v57  ;;  %v3949_v20 = vld [vmem:[#allocation5 + $0x10] sm:$0xf0]  ;;  %v3955_v21 = vld [vmem:[#allocation5 + $0x8] sm:$0xf]  ;;  %v4602_v22 = vld [vmem:[#allocation5 + $0x14] sm:$0xf0]  ;;  %v3948_v30 = vor.u32 %v4601_v17, %v3947_v16 }
  0x80   : > { %1156 = vmatpush.bf16.msra.mxu2 %v4004_v58  ;;  %1205 = vmatpush.bf16.msra.mxu3 %v4008_v62  ;;  %v4600_v25 = vld [vmem:[#allocation5 + $0xc] sm:$0xf]  ;;  %v3957_v26 = vld [vmem:[#allocation5 + $0x18] sm:$0xf0]  ;;  %v4259_v27 = vld [vmem:[#allocation8 + $0x170] sm:$0xf]  ;;  %v3952_v33 = vor.u32 %v4599_v19, %v3949_v20  ;;  %v3956_v34 = vor.u32 %v4602_v22, %v3955_v21 }
  0x81   : > { %v4678_v28 = vld [vmem:[#allocation8 + $0x174] sm:$0xf0]  ;;  %v4323_v31 = vld [vmem:[#allocation8 + $0x1f0] sm:$0xf]  ;;  %v3960_v35 = vor.u32 %v4600_v25, %v3957_v26  ;;  %v4591_v39 = vld [vmem:[%s5634_s19] sm:$0xff]  ;;  %s6239_s27 = sld [smem:[#allocation33_spill]] }
  0x82   : > { %1059 = vmatpush.bf16.msra.mxu0 %v3980_v4  ;;  %v4694_v32 = vld [vmem:[#allocation8 + $0x1f4] sm:$0xf0]  ;;  %v4260_v36 = vor.u32 %v4678_v28, %v4259_v27  ;;  %v4131_v37 = vld [vmem:[#allocation8 + $0x70] sm:$0xf]  ;;  %v4251_v45 = vld [vmem:[#allocation8 + $0x160] sm:$0xf] }
  0x83   : > { %1108 = vmatpush.bf16.msra.mxu1 %v3984_v6  ;;  %v4646_v38 = vld [vmem:[#allocation8 + $0x74] sm:$0xf0]  ;;  %v4324_v40 = vor.u32 %v4694_v32, %v4323_v31  ;;  %v4195_v41 = vld [vmem:[#allocation8 + $0xf0] sm:$0xf]  ;;  %v4676_v46 = vld [vmem:[#allocation8 + $0x164] sm:$0xf0] }
  0x84   : > { %1157 = vmatpush.bf16.msra.mxu2 %v3988_v7  ;;  %1206 = vmatpush.bf16.msra.mxu3 %v3992_v11  ;;  %v4662_v42 = vld [vmem:[#allocation8 + $0xf4] sm:$0xf0]  ;;  %v4132_v43 = vor.u32 %v4646_v38, %v4131_v37  ;;  %v4123_v47 = vld [vmem:[#allocation8 + $0x60] sm:$0xf]  ;;  %v4252_v48 = vor.u32 %v4676_v46, %v4251_v45  ;;  %v4644_v49 = vld [vmem:[#allocation8 + $0x64] sm:$0xf0] }
  0x85   : > { %v4196_v44 = vor.u32 %v4662_v42, %v4195_v41  ;;  %v4315_v50 = vld [vmem:[#allocation8 + $0x1e0] sm:$0xf]  ;;  %v4692_v51 = vld [vmem:[#allocation8 + $0x1e4] sm:$0xf0]  ;;  %v4124_v52 = vor.u32 %v4644_v49, %v4123_v47  ;;  %v4243_v58 = vld [vmem:[#allocation8 + $0x150] sm:$0xf] }
  0x86   : > { %1060 = vmatpush.bf16.msra.mxu0 %v3964_v18  ;;  %v4316_v53 = vor.u32 %v4692_v51, %v4315_v50  ;;  %v4187_v54 = vld [vmem:[#allocation8 + $0xe0] sm:$0xf]  ;;  %v4660_v55 = vld [vmem:[#allocation8 + $0xe4] sm:$0xf0]  ;;  %v4674_v59 = vld [vmem:[#allocation8 + $0x154] sm:$0xf0] }
  0x87   : > { %1109 = vmatpush.bf16.msra.mxu1 %v3968_v23  ;;  %v4188_v56 = vor.u32 %v4660_v55, %v4187_v54  ;;  %v4592_v57 = vld [vmem:[%s5634_s19 + $0x8] sm:$0xff]  ;;  %v4115_v60 = vld [vmem:[#allocation8 + $0x50] sm:$0xf]  ;;  %v4244_v61 = vor.u32 %v4674_v59, %v4243_v58  ;;  %v4642_v62 = vld [vmem:[#allocation8 + $0x54] sm:$0xf0]  ;;  %s6240_s16 = sld [smem:[#allocation35_spill]] }
  0x88   : > { %1158 = vmatpush.bf16.msra.mxu2 %v3972_v24  ;;  %1207 = vmatpush.bf16.msra.mxu3 %v3976_v29  ;;  %v4307_v63 = vld [vmem:[#allocation8 + $0x1d0] sm:$0xf]  ;;  %v4690_v0 = vld [vmem:[#allocation8 + $0x1d4] sm:$0xf0]  ;;  %v4116_v1 = vor.u32 %v4642_v62, %v4115_v60  ;;  %v4235_v7 = vld [vmem:[#allocation8 + $0x140] sm:$0xf] }
  0x89   : > { %v4308_v2 = vor.u32 %v4690_v0, %v4307_v63  ;;  %v4179_v3 = vld [vmem:[#allocation8 + $0xd0] sm:$0xf]  ;;  %v4658_v4 = vld [vmem:[#allocation8 + $0xd4] sm:$0xf0]  ;;  %v4672_v8 = vld [vmem:[#allocation8 + $0x144] sm:$0xf0] }
  0x8a   : > { %1061 = vmatpush.bf16.msra.mxu0 %v3948_v30  ;;  %v4180_v5 = vor.u32 %v4658_v4, %v4179_v3  ;;  %v4593_v6 = vld [vmem:[%s5634_s19 + $0x10] sm:$0xff]  ;;  %v4107_v9 = vld [vmem:[#allocation8 + $0x40] sm:$0xf]  ;;  %v4236_v10 = vor.u32 %v4672_v8, %v4235_v7  ;;  %v4640_v11 = vld [vmem:[#allocation8 + $0x44] sm:$0xf0]  ;;  %s6241_s29 = sld [smem:[#allocation37_spill]] }
  0x8b   : > { %1110 = vmatpush.bf16.msra.mxu1 %v3952_v33  ;;  %v4299_v12 = vld [vmem:[#allocation8 + $0x1c0] sm:$0xf]  ;;  %v4688_v13 = vld [vmem:[#allocation8 + $0x1c4] sm:$0xf0]  ;;  %v4108_v14 = vor.u32 %v4640_v11, %v4107_v9  ;;  %v4594_v19 = vld [vmem:[%s5634_s19 + $0x18] sm:$0xff]  ;;  %s6242_s9 = sld [smem:[#allocation38_spill]] }
  0x8c   : > { %1159 = vmatpush.bf16.msra.mxu2 %v3956_v34  ;;  %1208 = vmatpush.bf16.msra.mxu3 %v3960_v35  ;;  %v4300_v15 = vor.u32 %v4688_v13, %v4299_v12  ;;  %v4171_v16 = vld [vmem:[#allocation8 + $0xc0] sm:$0xf]  ;;  %v4656_v17 = vld [vmem:[#allocation8 + $0xc4] sm:$0xf0]  ;;  %v4227_v20 = vld [vmem:[#allocation8 + $0x130] sm:$0xf] }
  0x8d   : > { %1062 = vmatmul.bf16.vlgmr.msra.gmra.mxu0 %v4591_v39  ;;  %v4172_v18 = vor.u32 %v4656_v17, %v4171_v16  ;;  %v4670_v21 = vld [vmem:[#allocation8 + $0x134] sm:$0xf0]  ;;  %v4099_v22 = vld [vmem:[#allocation8 + $0x30] sm:$0xf]  ;;  %v4595_v32 = vld [vmem:[%s5634_s19 + $0x20] sm:$0xff]  ;;  %s6243_s25 = sld [smem:[#allocation39_spill]] }
  0x8e   : > { %1111 = vmatmul.bf16.vlgmr.msra.gmra.mxu1 %v4591_v39  ;;  %1864 = vmatpush.bf16.msrb.mxu0 %v4132_v43  ;;  %v4228_v23 = vor.u32 %v4670_v21, %v4227_v20  ;;  %v4638_v24 = vld [vmem:[#allocation8 + $0x34] sm:$0xf0]  ;;  %v4291_v25 = vld [vmem:[#allocation8 + $0x1b0] sm:$0xf]  ;;  %v4219_v33 = vld [vmem:[#allocation8 + $0x120] sm:$0xf] }
  0x8f   : > { %1160 = vmatmul.bf16.vlgmr.msra.gmra.mxu2 %v4591_v39  ;;  %1209 = vmatmul.bf16.vlgmr.msra.gmra.mxu3 %v4591_v39  ;;  %v4686_v26 = vld [vmem:[#allocation8 + $0x1b4] sm:$0xf0]  ;;  %v4100_v27 = vor.u32 %v4638_v24, %v4099_v22  ;;  %v4163_v29 = vld [vmem:[#allocation8 + $0xb0] sm:$0xf]  ;;  %v4668_v34 = vld [vmem:[#allocation8 + $0x124] sm:$0xf0] }
  0x90   : > { %1962 = vmatpush.bf16.msrb.mxu2 %v4260_v36  ;;  %2011 = vmatpush.bf16.msrb.mxu3 %v4324_v40  ;;  %v4292_v28 = vor.u32 %v4686_v26, %v4291_v25  ;;  %v4654_v30 = vld [vmem:[#allocation8 + $0xb4] sm:$0xf0]  ;;  %v4091_v35 = vld [vmem:[#allocation8 + $0x20] sm:$0xf]  ;;  %v4220_v36 = vor.u32 %v4668_v34, %v4219_v33  ;;  %v4636_v37 = vld [vmem:[#allocation8 + $0x24] sm:$0xf0] }
  0x91   : > { %1913 = vmatpush.bf16.msrb.mxu1 %v4196_v44  ;;  %v4164_v31 = vor.u32 %v4654_v30, %v4163_v29  ;;  %v4283_v38 = vld [vmem:[#allocation8 + $0x1a0] sm:$0xf]  ;;  %v4684_v39 = vld [vmem:[#allocation8 + $0x1a4] sm:$0xf0]  ;;  %v4092_v40 = vor.u32 %v4636_v37, %v4091_v35  ;;  %v4211_v46 = vld [vmem:[#allocation8 + $0x110] sm:$0xf] }
  0x92   : > { %1865 = vmatpush.bf16.msrb.mxu0 %v4124_v52  ;;  %v4284_v41 = vor.u32 %v4684_v39, %v4283_v38  ;;  %v4155_v42 = vld [vmem:[#allocation8 + $0xa0] sm:$0xf]  ;;  %v4652_v43 = vld [vmem:[#allocation8 + $0xa4] sm:$0xf0]  ;;  %v4666_v47 = vld [vmem:[#allocation8 + $0x114] sm:$0xf0] }
  0x93   : > { %v4156_v44 = vor.u32 %v4652_v43, %v4155_v42  ;;  %v4596_v45 = vld [vmem:[%s5634_s19 + $0x28] sm:$0xff]  ;;  %v4212_v49 = vor.u32 %v4666_v47, %v4211_v46  ;;  %v4634_v50 = vld [vmem:[#allocation8 + $0x14] sm:$0xf0]  ;;  %v4275_v51 = vld [vmem:[#allocation8 + $0x190] sm:$0xf]  ;;  %s3912_s26 = sshll.u32 %s5630_s10, 7 }
  0x94   : > { %1963 = vmatpush.bf16.msrb.mxu2 %v4252_v48  ;;  %2012 = vmatpush.bf16.msrb.mxu3 %v4316_v53  ;;  %v4083_v48 = vld [vmem:[#allocation8 + $0x10] sm:$0xf]  ;;  %v4682_v52 = vld [vmem:[#allocation8 + $0x194] sm:$0xf0]  ;;  %v4203_v59 = vld [vmem:[#allocation8 + $0x100] sm:$0xf] }
  0x95   : > { %1914 = vmatpush.bf16.msrb.mxu1 %v4188_v56  ;;  %v4084_v53 = vor.u32 %v4634_v50, %v4083_v48  ;;  %v4276_v54 = vor.u32 %v4682_v52, %v4275_v51  ;;  %v4147_v55 = vld [vmem:[#allocation8 + $0x90] sm:$0xf]  ;;  %v4650_v56 = vld [vmem:[#allocation8 + $0x94] sm:$0xf0]  ;;  %v4664_v60 = vld [vmem:[#allocation8 + $0x104] sm:$0xf0] }
  0x96   : > { %1866 = vmatpush.bf16.msrb.mxu0 %v4116_v1  ;;  %v4597_v58 = vld [vmem:[%s5634_s19 + $0x30] sm:$0xff]  ;;  %v4075_v62 = vld [vmem:[#allocation8] sm:$0xf]  ;;  %v4632_v63 = vld [vmem:[#allocation8 + $0x4] sm:$0xf0]  ;;  %s6117_s22 = scalar_lea.vmem [#allocation20], %s3912_s26 }
  0x97   : > { %v4267_v0 = vld [vmem:[#allocation8 + $0x180] sm:$0xf]  ;;  %v4076_v1 = vor.u32 %v4632_v63, %v4075_v62  ;;  %v4648_v4 = vld [vmem:[#allocation8 + $0x84] sm:$0xf0]  ;;  %v4598_v7 = vld [vmem:[%s5634_s19 + $0x38] sm:$0xff]  ;;  %s3713_s5 = sshll.u32 %s6117_s22, 4  ;;  %s3714_s5 = int_to_ptr.vmem [resolvable:$true] %s3713_s5 }
  0x98   : > { %1964 = vmatpush.bf16.msrb.mxu2 %v4244_v61  ;;  %2013 = vmatpush.bf16.msrb.mxu3 %v4308_v2  ;;  %v4204_v61 = vor.u32 %v4664_v60, %v4203_v59  ;;  %v4680_v2 = vld [vmem:[#allocation8 + $0x184] sm:$0xf0]  ;;  %v4139_v3 = vld [vmem:[#allocation8 + $0x80] sm:$0xf]  ;;  %v4677_v8 = vld [vmem:[#allocation8 + $0x174] sm:$0xf] }
  0x99   : > { %1915 = vmatpush.bf16.msrb.mxu1 %v4180_v5  ;;  %v4268_v5 = vor.u32 %v4680_v2, %v4267_v0  ;;  %v4261_v9 = vld [vmem:[#allocation8 + $0x178] sm:$0xf0]  ;;  %v4645_v11 = vld [vmem:[#allocation8 + $0x74] sm:$0xf]  ;;  %v4643_v46 = vld [vmem:[#allocation8 + $0x64] sm:$0xf] }
  0x9a   : > { %1867 = vmatpush.bf16.msrb.mxu0 %v4108_v14  ;;  %v4133_v12 = vld [vmem:[#allocation8 + $0x78] sm:$0xf0]  ;;  %v4693_v13 = vld [vmem:[#allocation8 + $0x1f4] sm:$0xf]  ;;  %v4125_v47 = vld [vmem:[#allocation8 + $0x68] sm:$0xf0] }
  0x9b   : > { %v4136_v14 = vor.u32 %v4645_v11, %v4133_v12  ;;  %v4661_v16 = vld [vmem:[#allocation8 + $0xf4] sm:$0xf]  ;;  %v4197_v17 = vld [vmem:[#allocation8 + $0xf8] sm:$0xf0]  ;;  %v4128_v51 = vor.u32 %v4643_v46, %v4125_v47  ;;  %v4691_v52 = vld [vmem:[#allocation8 + $0x1e4] sm:$0xf] }
  0x9c   : > { %1965 = vmatpush.bf16.msrb.mxu2 %v4236_v10  ;;  %2014 = vmatpush.bf16.msrb.mxu3 %v4300_v15  ;;  %v4264_v10 = vor.u32 %v4677_v8, %v4261_v9  ;;  %v4325_v15 = vld [vmem:[#allocation8 + $0x1f8] sm:$0xf0]  ;;  %v4200_v20 = vor.u32 %v4661_v16, %v4197_v17 }
  0x9d   : > { %1067 = vmatmul.bf16.gmra.mxu0 %v4592_v57  ;;  %1916 = vmatpush.bf16.msrb.mxu1 %v4172_v18  ;;  %v836_v18 = vld [vmem:[#allocation7] sm:$0xf] }
  0x9e   : > { %1116 = vmatmul.bf16.gmra.mxu1 %v4592_v57  ;;  %1868 = vmatpush.bf16.msrb.mxu0 %v4100_v27  ;;  %v5668_v22 = vperm.slane %v836_v18, 1  ;;  %v5674_v29 = vperm.slane %v836_v18, 2  ;;  %v5676_v33 = vperm.slane %v836_v18, 3  ;;  %v4181_v46 = vld [vmem:[#allocation8 + $0xd8] sm:$0xf0] }
  0x9f   : > { %1165 = vmatmul.bf16.gmra.mxu2 %v4592_v57  ;;  %1214 = vmatmul.bf16.gmra.mxu3 %v4592_v57  ;;  %v4148_v57 = vor.u32 %v4650_v56, %v4147_v55 }
  0xa0   : > { %1966 = vmatpush.bf16.msrb.mxu2 %v4228_v23  ;;  %2015 = vmatpush.bf16.msrb.mxu3 %v4292_v28  ;;  %v5670_v23 = vperm.slane %v836_v18, 0 }
  0xa1   : > { %1917 = vmatpush.bf16.msrb.mxu1 %v4164_v31 }
  0xa2   : > { %1869 = vmatpush.bf16.msrb.mxu0 %v4092_v40 }
  0xa4   : > { %1967 = vmatpush.bf16.msrb.mxu2 %v4220_v36  ;;  %2016 = vmatpush.bf16.msrb.mxu3 %v4284_v41  ;;  %v4675_v41 = vld [vmem:[#allocation8 + $0x164] sm:$0xf] }
  0xa5   : > { %1918 = vmatpush.bf16.msrb.mxu1 %v4156_v44 }
  0xa6   : > { %1870 = vmatpush.bf16.msrb.mxu0 %v4084_v53  ;;  %v4317_v53 = vld [vmem:[#allocation8 + $0x1e8] sm:$0xf0] }
  0xa8   : > { %1968 = vmatpush.bf16.msrb.mxu2 %v4212_v49  ;;  %2017 = vmatpush.bf16.msrb.mxu3 %v4276_v54  ;;  %v4659_v54 = vld [vmem:[#allocation8 + $0xe4] sm:$0xf] }
  0xa9   : > { %1919 = vmatpush.bf16.msrb.mxu1 %v4148_v57  ;;  %v4320_v57 = vor.u32 %v4691_v52, %v4317_v53 }
  0xaa   : > { %1871 = vmatpush.bf16.msrb.mxu0 %v4076_v1 }
  0xac   : > { %1969 = vmatpush.bf16.msrb.mxu2 %v4204_v61  ;;  %2018 = vmatpush.bf16.msrb.mxu3 %v4268_v5 }
  0xad   : > { %1072 = vmatmul.bf16.gmra.mxu0 %v4593_v6 }
  0xae   : > { %1121 = vmatmul.bf16.gmra.mxu1 %v4593_v6  ;;  %2060 = vmatpush.bf16.msra.mxu0 %v4136_v14 }
  0xaf   : > { %1170 = vmatmul.bf16.gmra.mxu2 %v4593_v6  ;;  %1219 = vmatmul.bf16.gmra.mxu3 %v4593_v6  ;;  %v4140_v6 = vor.u32 %v4648_v4, %v4139_v3 }
  0xb0   : > { %2158 = vmatpush.bf16.msra.mxu2 %v4264_v10 }
  0xb1   : > { %1920 = vmatpush.bf16.msrb.mxu1 %v4140_v6 }
  0xb2   : > { %2061 = vmatpush.bf16.msra.mxu0 %v4128_v51 }
  0xb5   : > { %2109 = vmatpush.bf16.msra.mxu1 %v4200_v20 }
  0xbd   : > { %1077 = vmatmul.bf16.gmra.mxu0 %v4594_v19 }
  0xbe   : > { %1126 = vmatmul.bf16.gmra.mxu1 %v4594_v19 }
  0xbf   : > { %1175 = vmatmul.bf16.gmra.mxu2 %v4594_v19  ;;  %1224 = vmatmul.bf16.gmra.mxu3 %v4594_v19  ;;  %v4328_v19 = vor.u32 %v4693_v13, %v4325_v15 }
  0xc1   : > { %2207 = vmatpush.bf16.msra.mxu3 %v4328_v19 }
  0xc5   : > { %2208 = vmatpush.bf16.msra.mxu3 %v4320_v57 }
  0xcd   : > { %1082 = vmatmul.bf16.gmra.mxu0 %v4595_v32 }
  0xce   : > { %1131 = vmatmul.bf16.gmra.mxu1 %v4595_v32 }
  0xcf   : > { %1180 = vmatmul.bf16.gmra.mxu2 %v4595_v32  ;;  %1229 = vmatmul.bf16.gmra.mxu3 %v4595_v32 }
  0xdd   : > { %1087 = vmatmul.bf16.gmra.mxu0 %v4596_v45 }
  0xde   : > { %1136 = vmatmul.bf16.gmra.mxu1 %v4596_v45 }
  0xdf   : > { %1185 = vmatmul.bf16.gmra.mxu2 %v4596_v45  ;;  %1234 = vmatmul.bf16.gmra.mxu3 %v4596_v45  ;;  %v4253_v45 = vld [vmem:[#allocation8 + $0x168] sm:$0xf0] }
  0xe0   : > { %v4256_v50 = vor.u32 %v4675_v41, %v4253_v45  ;;  %v4309_v41 = vld [vmem:[#allocation8 + $0x1d8] sm:$0xf0] }
  0xe2   : > { %2159 = vmatpush.bf16.msra.mxu2 %v4256_v50 }
  0xed   : > { %1092 = vmatmul.bf16.gmra.mxu0 %v4597_v58 }
  0xee   : > { %1141 = vmatmul.bf16.gmra.mxu1 %v4597_v58 }
  0xef   : > { %1190 = vmatmul.bf16.gmra.mxu2 %v4597_v58  ;;  %1239 = vmatmul.bf16.gmra.mxu3 %v4597_v58  ;;  %v4189_v58 = vld [vmem:[#allocation8 + $0xe8] sm:$0xf0] }
  0xf0   : > { %v4192_v63 = vor.u32 %v4659_v54, %v4189_v58 }
  0xf2   : > { %2110 = vmatpush.bf16.msra.mxu1 %v4192_v63 }
  0xfd   : > { %1097 = vmatmul.bf16.gmra.mxu0 %v4598_v7 }
  0xfe   : > { %1146 = vmatmul.bf16.gmra.mxu1 %v4598_v7 }
  0xff   : > { %1195 = vmatmul.bf16.gmra.mxu2 %v4598_v7  ;;  %1244 = vmatmul.bf16.gmra.mxu3 %v4598_v7 }
 0x10a   : > { %v1063_v21 = vpop.f32.mrf.mxu0 }
 0x10b   : > { %v1112_v24 = vpop.f32.mrf.mxu1  ;;  %v1064_v26 = vadd.f32 %v1063_v21, %v5670_v23 }
 0x10c   : > { %v1113_v25 = vadd.f32 %v1112_v24, %v5668_v22 }
 0x10d   : > { %v1314_v32 = vmul.f32 0.4, %v1064_v26  ;;  %vm1250_vm1 = vcmp.ge.f32.partialorder %v1064_v26, 0.0 }
 0x10e   : > { %v1315_v28 = vmul.f32 0.4, %v1113_v25  ;;  %vm1251_vm0 = vcmp.ge.f32.partialorder %v1113_v25, 0.0 }
 0x10f   : > { %v1378_v43 = vsel %vm1250_vm1, %v1064_v26, %v1314_v32  ;;  %v4245_v32 = vld [vmem:[#allocation8 + $0x158] sm:$0xf0] }
 0x110   : > { %v1379_v40 = vsel %vm1251_vm0, %v1113_v25, %v1315_v28 }
 0x112   : > { %v1161_v27 = vpop.f32.mrf.mxu2  ;;  %v1210_v30 = vpop.f32.mrf.mxu3 }
 0x113   : > { %v1065_v31 = vpop.f32.mrf.mxu0  ;;  %v1114_v35 = vpop.f32.mrf.mxu1  ;;  %v1162_v38 = vadd.f32 %v1161_v27, %v5674_v29  ;;  %v1211_v42 = vadd.f32 %v1210_v30, %v5676_v33  ;;  %v4673_v27 = vld [vmem:[#allocation8 + $0x154] sm:$0xf] }
 0x114   : > { %v1066_v34 = vadd.f32 %v1065_v31, %v5670_v23  ;;  %v1115_v36 = vadd.f32 %v1114_v35, %v5668_v22  ;;  %v4117_v35 = vld [vmem:[#allocation8 + $0x58] sm:$0xf0] }
 0x115   : > { %v1316_v59 = vmul.f32 0.4, %v1162_v38  ;;  %vm1252_vm4 = vcmp.ge.f32.partialorder %v1162_v38, 0.0  ;;  %v1317_v0 = vmul.f32 0.4, %v1211_v42  ;;  %vm1253_vm5 = vcmp.ge.f32.partialorder %v1211_v42, 0.0 }
 0x116   : > { %vm1254_vm2 = vcmp.ge.f32.partialorder %v1066_v34, 0.0  ;;  %v1318_v37 = vmul.f32 0.4, %v1066_v34  ;;  %vm1255_vm3 = vcmp.ge.f32.partialorder %v1115_v36, 0.0  ;;  %v1319_v39 = vmul.f32 0.4, %v1115_v36 }
 0x117   : > { %v1380_v6 = vsel %vm1252_vm4, %v1162_v38, %v1316_v59  ;;  %v1381_v10 = vsel %vm1253_vm5, %v1211_v42, %v1317_v0  ;;  %v4248_v38 = vor.u32 %v4673_v27, %v4245_v32  ;;  %v4657_v42 = vld [vmem:[#allocation8 + $0xd4] sm:$0xf]  ;;  %v4301_v32 = vld [vmem:[#allocation8 + $0x1c8] sm:$0xf0] }
 0x118   : > { %v1382_v44 = vsel %vm1254_vm2, %v1066_v34, %v1318_v37  ;;  %v1383_v49 = vsel %vm1255_vm3, %v1115_v36, %v1319_v39  ;;  %v4641_v34 = vld [vmem:[#allocation8 + $0x54] sm:$0xf]  ;;  %v4184_v52 = vor.u32 %v4657_v42, %v4181_v46 }
 0x119   : > { %v5682_v48 = vpack.c.bf16 %v1382_v44, %v1378_v43  ;;  %v5684_v56 = vpack.c.bf16 %v1383_v49, %v1379_v40  ;;  %v4120_v39 = vor.u32 %v4641_v34, %v4117_v35  ;;  %v4689_v40 = vld [vmem:[#allocation8 + $0x1d4] sm:$0xf]  ;;  %2160 = vmatpush.bf16.msra.mxu2 %v4248_v38  ;;  %v4655_v34 = vld [vmem:[#allocation8 + $0xc4] sm:$0xf] }
 0x11a   : > { %v1163_v55 = vpop.f32.mrf.mxu2  ;;  %v1212_v61 = vpop.f32.mrf.mxu3  ;;  %v4312_v45 = vor.u32 %v4689_v40, %v4309_v41  ;;  %2111 = vmatpush.bf16.msra.mxu1 %v4184_v52 }
 0x11b   : > { %v1164_v60 = vadd.f32 %v1163_v55, %v5674_v29  ;;  %v1068_v62 = vpop.f32.mrf.mxu0  ;;  %1872 = vmatmul.bf16.vlgmr.msrb.gmra.mxu0 %v5682_v48  ;;  %v1213_v1 = vadd.f32 %v1212_v61, %v5676_v33  ;;  %v1117_v2 = vpop.f32.mrf.mxu1  ;;  %1921 = vmatmul.bf16.vlgmr.msrb.gmra.mxu1 %v5684_v56 }
 0x11c   : > { %v1118_v5 = vadd.f32 %v1117_v2, %v5668_v22  ;;  %v1069_v8 = vadd.f32 %v1068_v62, %v5670_v23  ;;  %2062 = vmatpush.bf16.msra.mxu0 %v4120_v39  ;;  %2209 = vmatpush.bf16.msra.mxu3 %v4312_v45  ;;  %v4173_v39 = vld [vmem:[#allocation8 + $0xc8] sm:$0xf0] }
 0x11d   : > { %vm1256_vm6 = vcmp.ge.f32.partialorder %v1164_v60, 0.0  ;;  %v1320_v3 = vmul.f32 0.4, %v1164_v60  ;;  %vm1257_vm7 = vcmp.ge.f32.partialorder %v1213_v1, 0.0  ;;  %v1321_v4 = vmul.f32 0.4, %v1213_v1 }
 0x11e   : > { %v1323_v14 = vmul.f32 0.4, %v1118_v5  ;;  %v1322_v17 = vmul.f32 0.4, %v1069_v8  ;;  %vm1259_vm8 = vcmp.ge.f32.partialorder %v1118_v5, 0.0  ;;  %vm1258_vm9 = vcmp.ge.f32.partialorder %v1069_v8, 0.0 }
 0x11f   : > { %v1384_v7 = vsel %vm1256_vm6, %v1164_v60, %v1320_v3  ;;  %v1385_v11 = vsel %vm1257_vm7, %v1213_v1, %v1321_v4  ;;  %v4176_v45 = vor.u32 %v4655_v34, %v4173_v39 }
 0x120   : > { %v5692_v9 = vpack.c.bf16 %v1384_v7, %v1380_v6  ;;  %v5694_v12 = vpack.c.bf16 %v1385_v11, %v1381_v10  ;;  %v1387_v26 = vsel %vm1259_vm8, %v1118_v5, %v1323_v14  ;;  %v1386_v30 = vsel %vm1258_vm9, %v1069_v8, %v1322_v17  ;;  %v4671_v17 = vld [vmem:[#allocation8 + $0x144] sm:$0xf] }
 0x121   : > { %2112 = vmatpush.bf16.msra.mxu1 %v4176_v45 }
 0x122   : > { %v1166_v13 = vpop.f32.mrf.mxu2  ;;  %1970 = vmatmul.bf16.vlgmr.msrb.gmra.mxu2 %v5692_v9  ;;  %v1215_v15 = vpop.f32.mrf.mxu3  ;;  %2019 = vmatmul.bf16.vlgmr.msrb.gmra.mxu3 %v5694_v12 }
 0x123   : > { %v1070_v16 = vpop.f32.mrf.mxu0  ;;  %v1119_v19 = vpop.f32.mrf.mxu1  ;;  %v1167_v24 = vadd.f32 %v1166_v13, %v5674_v29  ;;  %v1216_v28 = vadd.f32 %v1215_v15, %v5676_v33 }
 0x124   : > { %v1071_v18 = vadd.f32 %v1070_v16, %v5670_v23  ;;  %v1120_v20 = vadd.f32 %v1119_v19, %v5668_v22 }
 0x125   : > { %v1324_v47 = vmul.f32 0.4, %v1167_v24  ;;  %v1325_v53 = vmul.f32 0.4, %v1216_v28  ;;  %vm1260_vm12 = vcmp.ge.f32.partialorder %v1167_v24, 0.0  ;;  %vm1261_vm14 = vcmp.ge.f32.partialorder %v1216_v28, 0.0 }
 0x126   : > { %v1326_v21 = vmul.f32 0.4, %v1071_v18  ;;  %vm1262_vm10 = vcmp.ge.f32.partialorder %v1071_v18, 0.0  ;;  %v1327_v25 = vmul.f32 0.4, %v1120_v20  ;;  %vm1263_vm11 = vcmp.ge.f32.partialorder %v1120_v20, 0.0 }
 0x127   : > { %v1388_v60 = vsel %vm1260_vm12, %v1167_v24, %v1324_v47  ;;  %v1389_v0 = vsel %vm1261_vm14, %v1216_v28, %v1325_v53  ;;  %v4639_v24 = vld [vmem:[#allocation8 + $0x44] sm:$0xf] }
 0x128   : > { %v1390_v31 = vsel %vm1262_vm10, %v1071_v18, %v1326_v21  ;;  %v1391_v37 = vsel %vm1263_vm11, %v1120_v20, %v1327_v25  ;;  %v4237_v21 = vld [vmem:[#allocation8 + $0x148] sm:$0xf0] }
 0x129   : > { %v5702_v36 = vpack.c.bf16 %v1390_v31, %v1386_v30  ;;  %v5704_v44 = vpack.c.bf16 %v1391_v37, %v1387_v26  ;;  %v4109_v25 = vld [vmem:[#allocation8 + $0x48] sm:$0xf0]  ;;  %v4240_v28 = vor.u32 %v4671_v17, %v4237_v21  ;;  %v4687_v31 = vld [vmem:[#allocation8 + $0x1c4] sm:$0xf]  ;;  %v4229_v17 = vld [vmem:[#allocation8 + $0x138] sm:$0xf0] }
 0x12a   : > { %v1168_v43 = vpop.f32.mrf.mxu2  ;;  %v1217_v50 = vpop.f32.mrf.mxu3  ;;  %v4112_v30 = vor.u32 %v4639_v24, %v4109_v25  ;;  %v4304_v38 = vor.u32 %v4687_v31, %v4301_v32 }
 0x12b   : > { %v1169_v49 = vadd.f32 %v1168_v43, %v5674_v29  ;;  %v1073_v51 = vpop.f32.mrf.mxu0  ;;  %1877 = vmatmul.bf16.gmra.mxu0 %v5702_v36  ;;  %v1218_v54 = vadd.f32 %v1217_v50, %v5676_v33  ;;  %v1122_v55 = vpop.f32.mrf.mxu1  ;;  %1926 = vmatmul.bf16.gmra.mxu1 %v5704_v44 }
 0x12c   : > { %v1123_v59 = vadd.f32 %v1122_v55, %v5668_v22  ;;  %v1074_v62 = vadd.f32 %v1073_v51, %v5670_v23  ;;  %2161 = vmatpush.bf16.msra.mxu2 %v4240_v28  ;;  %2063 = vmatpush.bf16.msra.mxu0 %v4112_v30  ;;  %v4293_v28 = vld [vmem:[#allocation8 + $0x1b8] sm:$0xf0]  ;;  %v4653_v30 = vld [vmem:[#allocation8 + $0xb4] sm:$0xf] }
 0x12d   : > { %v1328_v57 = vmul.f32 0.4, %v1169_v49  ;;  %vm1264_vm13 = vcmp.ge.f32.partialorder %v1169_v49, 0.0  ;;  %v1329_v58 = vmul.f32 0.4, %v1218_v54  ;;  %vm1265_vm15 = vcmp.ge.f32.partialorder %v1218_v54, 0.0  ;;  %2210 = vmatpush.bf16.msra.mxu3 %v4304_v38 }
 0x12e   : > { %v1331_v4 = vmul.f32 0.4, %v1123_v59  ;;  %v1330_v7 = vmul.f32 0.4, %v1074_v62  ;;  %vm1267_vm0 = vcmp.ge.f32.partialorder %v1123_v59, 0.0  ;;  %vm1266_vm1 = vcmp.ge.f32.partialorder %v1074_v62, 0.0 }
 0x12f   : > { %v1392_v61 = vsel %vm1264_vm13, %v1169_v49, %v1328_v57  ;;  %v1393_v1 = vsel %vm1265_vm15, %v1218_v54, %v1329_v58 }
 0x130   : > { %v5712_v63 = vpack.c.bf16 %v1392_v61, %v1388_v60  ;;  %v5714_v2 = vpack.c.bf16 %v1393_v1, %v1389_v0  ;;  %v1395_v16 = vsel %vm1267_vm0, %v1123_v59, %v1331_v4  ;;  %v1394_v19 = vsel %vm1266_vm1, %v1074_v62, %v1330_v7 }
 0x132   : > { %v1171_v3 = vpop.f32.mrf.mxu2  ;;  %1975 = vmatmul.bf16.gmra.mxu2 %v5712_v63  ;;  %v1220_v5 = vpop.f32.mrf.mxu3  ;;  %2024 = vmatmul.bf16.gmra.mxu3 %v5714_v2 }
 0x133   : > { %v1075_v6 = vpop.f32.mrf.mxu0  ;;  %v1124_v10 = vpop.f32.mrf.mxu1  ;;  %v1172_v14 = vadd.f32 %v1171_v3, %v5674_v29  ;;  %v1221_v18 = vadd.f32 %v1220_v5, %v5676_v33 }
 0x134   : > { %v1076_v8 = vadd.f32 %v1075_v6, %v5670_v23  ;;  %v1125_v11 = vadd.f32 %v1124_v10, %v5668_v22 }
 0x135   : > { %v1332_v40 = vmul.f32 0.4, %v1172_v14  ;;  %v1333_v46 = vmul.f32 0.4, %v1221_v18  ;;  %vm1268_vm4 = vcmp.ge.f32.partialorder %v1172_v14, 0.0  ;;  %vm1269_vm6 = vcmp.ge.f32.partialorder %v1221_v18, 0.0 }
 0x136   : > { %v1334_v13 = vmul.f32 0.4, %v1076_v8  ;;  %vm1270_vm2 = vcmp.ge.f32.partialorder %v1076_v8, 0.0  ;;  %v1335_v15 = vmul.f32 0.4, %v1125_v11  ;;  %vm1271_vm3 = vcmp.ge.f32.partialorder %v1125_v11, 0.0 }
 0x137   : > { %v1396_v53 = vsel %vm1268_vm4, %v1172_v14, %v1332_v40  ;;  %v1397_v58 = vsel %vm1269_vm6, %v1221_v18, %v1333_v46  ;;  %v4637_v18 = vld [vmem:[#allocation8 + $0x34] sm:$0xf] }
 0x138   : > { %v1398_v20 = vsel %vm1270_vm2, %v1076_v8, %v1334_v13  ;;  %v1399_v27 = vsel %vm1271_vm3, %v1125_v11, %v1335_v15  ;;  %v4669_v13 = vld [vmem:[#allocation8 + $0x134] sm:$0xf] }
 0x139   : > { %v5722_v26 = vpack.c.bf16 %v1398_v20, %v1394_v19  ;;  %v5724_v37 = vpack.c.bf16 %v1399_v27, %v1395_v16  ;;  %v4101_v19 = vld [vmem:[#allocation8 + $0x38] sm:$0xf0]  ;;  %v4232_v24 = vor.u32 %v4669_v13, %v4229_v17  ;;  %v4685_v27 = vld [vmem:[#allocation8 + $0x1b4] sm:$0xf]  ;;  %v4667_v13 = vld [vmem:[#allocation8 + $0x124] sm:$0xf] }
 0x13a   : > { %v1173_v35 = vpop.f32.mrf.mxu2  ;;  %v1222_v42 = vpop.f32.mrf.mxu3  ;;  %v4104_v25 = vor.u32 %v4637_v18, %v4101_v19  ;;  %v4296_v34 = vor.u32 %v4685_v27, %v4293_v28  ;;  %v4221_v17 = vld [vmem:[#allocation8 + $0x128] sm:$0xf0]  ;;  %v4635_v18 = vld [vmem:[#allocation8 + $0x24] sm:$0xf] }
 0x13b   : > { %v1174_v41 = vadd.f32 %v1173_v35, %v5674_v29  ;;  %v1078_v43 = vpop.f32.mrf.mxu0  ;;  %1882 = vmatmul.bf16.gmra.mxu0 %v5722_v26  ;;  %v1223_v47 = vadd.f32 %v1222_v42, %v5676_v33  ;;  %v1127_v49 = vpop.f32.mrf.mxu1  ;;  %1931 = vmatmul.bf16.gmra.mxu1 %v5724_v37  ;;  %v4165_v35 = vld [vmem:[#allocation8 + $0xb8] sm:$0xf0]  ;;  %v4093_v19 = vld [vmem:[#allocation8 + $0x28] sm:$0xf0]  ;;  %v4683_v28 = vld [vmem:[#allocation8 + $0x1a4] sm:$0xf] }
 0x13c   : > { %v1128_v52 = vadd.f32 %v1127_v49, %v5668_v22  ;;  %v1079_v55 = vadd.f32 %v1078_v43, %v5670_v23  ;;  %2162 = vmatpush.bf16.msra.mxu2 %v4232_v24  ;;  %v4168_v42 = vor.u32 %v4653_v30, %v4165_v35  ;;  %2064 = vmatpush.bf16.msra.mxu0 %v4104_v25  ;;  %v4285_v30 = vld [vmem:[#allocation8 + $0x1a8] sm:$0xf0] }
 0x13d   : > { %v1336_v50 = vmul.f32 0.4, %v1174_v41  ;;  %vm1272_vm5 = vcmp.ge.f32.partialorder %v1174_v41, 0.0  ;;  %v1337_v51 = vmul.f32 0.4, %v1223_v47  ;;  %vm1273_vm7 = vcmp.ge.f32.partialorder %v1223_v47, 0.0  ;;  %2211 = vmatpush.bf16.msra.mxu3 %v4296_v34 }
 0x13e   : > { %v1339_v62 = vmul.f32 0.4, %v1128_v52  ;;  %v1338_v3 = vmul.f32 0.4, %v1079_v55  ;;  %vm1275_vm8 = vcmp.ge.f32.partialorder %v1128_v52, 0.0  ;;  %vm1274_vm9 = vcmp.ge.f32.partialorder %v1079_v55, 0.0  ;;  %2113 = vmatpush.bf16.msra.mxu1 %v4168_v42 }
 0x13f   : > { %v1400_v54 = vsel %vm1272_vm5, %v1174_v41, %v1336_v50  ;;  %v1401_v59 = vsel %vm1273_vm7, %v1223_v47, %v1337_v51  ;;  %v4224_v25 = vor.u32 %v4667_v13, %v4221_v17  ;;  %v4096_v27 = vor.u32 %v4635_v18, %v4093_v19  ;;  %v4665_v17 = vld [vmem:[#allocation8 + $0x114] sm:$0xf] }
 0x140   : > { %v5732_v57 = vpack.c.bf16 %v1400_v54, %v1396_v53  ;;  %v5734_v60 = vpack.c.bf16 %v1401_v59, %v1397_v58  ;;  %v1403_v11 = vsel %vm1275_vm8, %v1128_v52, %v1339_v62  ;;  %v1402_v15 = vsel %vm1274_vm9, %v1079_v55, %v1338_v3 }
 0x141   : > { %2163 = vmatpush.bf16.msra.mxu2 %v4224_v25  ;;  %2065 = vmatpush.bf16.msra.mxu0 %v4096_v27  ;;  %v4213_v25 = vld [vmem:[#allocation8 + $0x118] sm:$0xf0]  ;;  %v4633_v27 = vld [vmem:[#allocation8 + $0x14] sm:$0xf] }
 0x142   : > { %v1176_v61 = vpop.f32.mrf.mxu2  ;;  %1980 = vmatmul.bf16.gmra.mxu2 %v5732_v57  ;;  %v1225_v0 = vpop.f32.mrf.mxu3  ;;  %2029 = vmatmul.bf16.gmra.mxu3 %v5734_v60 }
 0x143   : > { %v1080_v1 = vpop.f32.mrf.mxu0  ;;  %v1129_v5 = vpop.f32.mrf.mxu1  ;;  %v1177_v8 = vadd.f32 %v1176_v61, %v5674_v29  ;;  %v1226_v14 = vadd.f32 %v1225_v0, %v5676_v33 }
 0x144   : > { %v1081_v4 = vadd.f32 %v1080_v1, %v5670_v23  ;;  %v1130_v6 = vadd.f32 %v1129_v5, %v5668_v22 }
 0x145   : > { %v1340_v38 = vmul.f32 0.4, %v1177_v8  ;;  %v1341_v43 = vmul.f32 0.4, %v1226_v14  ;;  %vm1276_vm12 = vcmp.ge.f32.partialorder %v1177_v8, 0.0  ;;  %vm1277_vm14 = vcmp.ge.f32.partialorder %v1226_v14, 0.0 }
 0x146   : > { %v1342_v7 = vmul.f32 0.4, %v1081_v4  ;;  %vm1278_vm10 = vcmp.ge.f32.partialorder %v1081_v4, 0.0  ;;  %v1343_v10 = vmul.f32 0.4, %v1130_v6  ;;  %vm1279_vm11 = vcmp.ge.f32.partialorder %v1130_v6, 0.0 }
 0x147   : > { %v1404_v51 = vsel %vm1276_vm12, %v1177_v8, %v1340_v38  ;;  %v1405_v55 = vsel %vm1277_vm14, %v1226_v14, %v1341_v43  ;;  %v4288_v38 = vor.u32 %v4683_v28, %v4285_v30  ;;  %v4085_v28 = vld [vmem:[#allocation8 + $0x18] sm:$0xf0] }
 0x148   : > { %v1406_v16 = vsel %vm1278_vm10, %v1081_v4, %v1342_v7  ;;  %v1407_v21 = vsel %vm1279_vm11, %v1130_v6, %v1343_v10 }
 0x149   : > { %v5742_v20 = vpack.c.bf16 %v1406_v16, %v1402_v15  ;;  %v5744_v32 = vpack.c.bf16 %v1407_v21, %v1403_v11  ;;  %2212 = vmatpush.bf16.msra.mxu3 %v4288_v38  ;;  %v4088_v38 = vor.u32 %v4633_v27, %v4085_v28 }
 0x14a   : > { %v1178_v31 = vpop.f32.mrf.mxu2  ;;  %v1227_v40 = vpop.f32.mrf.mxu3 }
 0x14b   : > { %v1179_v39 = vadd.f32 %v1178_v31, %v5674_v29  ;;  %v1083_v41 = vpop.f32.mrf.mxu0  ;;  %1887 = vmatmul.bf16.gmra.mxu0 %v5742_v20  ;;  %v1228_v45 = vadd.f32 %v1227_v40, %v5676_v33  ;;  %v1132_v46 = vpop.f32.mrf.mxu1  ;;  %1936 = vmatmul.bf16.gmra.mxu1 %v5744_v32  ;;  %v4651_v31 = vld [vmem:[#allocation8 + $0xa4] sm:$0xf] }
 0x14c   : > { %v1133_v50 = vadd.f32 %v1132_v46, %v5668_v22  ;;  %v1084_v53 = vadd.f32 %v1083_v41, %v5670_v23  ;;  %2066 = vmatpush.bf16.msra.mxu0 %v4088_v38  ;;  %v4269_v38 = vld [vmem:[#allocation8 + $0x188] sm:$0xf0] }
 0x14d   : > { %v1344_v47 = vmul.f32 0.4, %v1179_v39  ;;  %vm1280_vm13 = vcmp.ge.f32.partialorder %v1179_v39, 0.0  ;;  %v1345_v49 = vmul.f32 0.4, %v1228_v45  ;;  %vm1281_vm15 = vcmp.ge.f32.partialorder %v1228_v45, 0.0 }
 0x14e   : > { %v1347_v62 = vmul.f32 0.4, %v1133_v50  ;;  %v1346_v3 = vmul.f32 0.4, %v1084_v53  ;;  %vm1283_vm0 = vcmp.ge.f32.partialorder %v1133_v50, 0.0  ;;  %vm1282_vm1 = vcmp.ge.f32.partialorder %v1084_v53, 0.0 }
 0x14f   : > { %v1408_v52 = vsel %vm1280_vm13, %v1179_v39, %v1344_v47  ;;  %v1409_v58 = vsel %vm1281_vm15, %v1228_v45, %v1345_v49  ;;  %v4157_v39 = vld [vmem:[#allocation8 + $0xa8] sm:$0xf0] }
 0x150   : > { %v5752_v54 = vpack.c.bf16 %v1408_v52, %v1404_v51  ;;  %v5754_v59 = vpack.c.bf16 %v1409_v58, %v1405_v55  ;;  %v1411_v11 = vsel %vm1283_vm0, %v1133_v50, %v1347_v62  ;;  %v1410_v15 = vsel %vm1282_vm1, %v1084_v53, %v1346_v3 }
 0x151   : > { %v4160_v45 = vor.u32 %v4651_v31, %v4157_v39  ;;  %v4681_v39 = vld [vmem:[#allocation8 + $0x194] sm:$0xf] }
 0x152   : > { %v1181_v61 = vpop.f32.mrf.mxu2  ;;  %1985 = vmatmul.bf16.gmra.mxu2 %v5752_v54  ;;  %v1230_v0 = vpop.f32.mrf.mxu3  ;;  %2034 = vmatmul.bf16.gmra.mxu3 %v5754_v59 }
 0x153   : > { %v1085_v1 = vpop.f32.mrf.mxu0  ;;  %v1134_v5 = vpop.f32.mrf.mxu1  ;;  %v1182_v8 = vadd.f32 %v1181_v61, %v5674_v29  ;;  %v1231_v14 = vadd.f32 %v1230_v0, %v5676_v33  ;;  %2114 = vmatpush.bf16.msra.mxu1 %v4160_v45 }
 0x154   : > { %v1086_v4 = vadd.f32 %v1085_v1, %v5670_v23  ;;  %v1135_v6 = vadd.f32 %v1134_v5, %v5668_v22 }
 0x155   : > { %v1348_v40 = vmul.f32 0.4, %v1182_v8  ;;  %vm1284_vm4 = vcmp.ge.f32.partialorder %v1182_v8, 0.0  ;;  %v1349_v46 = vmul.f32 0.4, %v1231_v14  ;;  %vm1285_vm5 = vcmp.ge.f32.partialorder %v1231_v14, 0.0 }
 0x156   : > { %vm1286_vm2 = vcmp.ge.f32.partialorder %v1086_v4, 0.0  ;;  %v1350_v7 = vmul.f32 0.4, %v1086_v4  ;;  %vm1287_vm3 = vcmp.ge.f32.partialorder %v1135_v6, 0.0  ;;  %v1351_v10 = vmul.f32 0.4, %v1135_v6 }
 0x157   : > { %v1412_v53 = vsel %vm1284_vm4, %v1182_v8, %v1348_v40  ;;  %v1413_v62 = vsel %vm1285_vm5, %v1231_v14, %v1349_v46  ;;  %v4277_v40 = vld [vmem:[#allocation8 + $0x198] sm:$0xf0] }
 0x158   : > { %v1414_v16 = vsel %vm1286_vm2, %v1086_v4, %v1350_v7  ;;  %v1415_v24 = vsel %vm1287_vm3, %v1135_v6, %v1351_v10  ;;  %v4280_v45 = vor.u32 %v4681_v39, %v4277_v40  ;;  %v4149_v46 = vld [vmem:[#allocation8 + $0x98] sm:$0xf0] }
 0x159   : > { %v5762_v21 = vpack.c.bf16 %v1414_v16, %v1410_v15  ;;  %v5764_v35 = vpack.c.bf16 %v1415_v24, %v1411_v11 }
 0x15a   : > { %v1183_v34 = vpop.f32.mrf.mxu2  ;;  %v1232_v42 = vpop.f32.mrf.mxu3  ;;  %2213 = vmatpush.bf16.msra.mxu3 %v4280_v45 }
 0x15b   : > { %v1184_v41 = vadd.f32 %v1183_v34, %v5674_v29  ;;  %v1088_v43 = vpop.f32.mrf.mxu0  ;;  %1892 = vmatmul.bf16.gmra.mxu0 %v5762_v21  ;;  %v1233_v47 = vadd.f32 %v1232_v42, %v5676_v33  ;;  %v1137_v49 = vpop.f32.mrf.mxu1  ;;  %1941 = vmatmul.bf16.gmra.mxu1 %v5764_v35  ;;  %v4216_v34 = vor.u32 %v4665_v17, %v4213_v25  ;;  %v4205_v25 = vld [vmem:[#allocation8 + $0x108] sm:$0xf0] }
 0x15c   : > { %v1138_v52 = vadd.f32 %v1137_v49, %v5668_v22  ;;  %v1089_v58 = vadd.f32 %v1088_v43, %v5670_v23 }
 0x15d   : > { %vm1288_vm6 = vcmp.ge.f32.partialorder %v1184_v41, 0.0  ;;  %v1352_v50 = vmul.f32 0.4, %v1184_v41  ;;  %vm1289_vm7 = vcmp.ge.f32.partialorder %v1233_v47, 0.0  ;;  %v1353_v51 = vmul.f32 0.4, %v1233_v47  ;;  %2164 = vmatpush.bf16.msra.mxu2 %v4216_v34 }
 0x15e   : > { %v1355_v4 = vmul.f32 0.4, %v1138_v52  ;;  %v1354_v7 = vmul.f32 0.4, %v1089_v58  ;;  %vm1291_vm8 = vcmp.ge.f32.partialorder %v1138_v52, 0.0  ;;  %vm1290_vm9 = vcmp.ge.f32.partialorder %v1089_v58, 0.0 }
 0x15f   : > { %v1416_v55 = vsel %vm1288_vm6, %v1184_v41, %v1352_v50  ;;  %v1417_v0 = vsel %vm1289_vm7, %v1233_v47, %v1353_v51  ;;  %v4649_v41 = vld [vmem:[#allocation8 + $0x94] sm:$0xf]  ;;  %v4679_v34 = vld [vmem:[#allocation8 + $0x184] sm:$0xf] }
 0x160   : > { %v5772_v61 = vpack.c.bf16 %v1416_v55, %v1412_v53  ;;  %v5774_v1 = vpack.c.bf16 %v1417_v0, %v1413_v62  ;;  %v1419_v16 = vsel %vm1291_vm8, %v1138_v52, %v1355_v4  ;;  %v1418_v19 = vsel %vm1290_vm9, %v1089_v58, %v1354_v7 }
 0x161   : > { %v4152_v52 = vor.u32 %v4649_v41, %v4149_v46  ;;  %v4647_v41 = vld [vmem:[#allocation8 + $0x84] sm:$0xf] }
 0x162   : > { %v1186_v3 = vpop.f32.mrf.mxu2  ;;  %1990 = vmatmul.bf16.gmra.mxu2 %v5772_v61  ;;  %v1235_v5 = vpop.f32.mrf.mxu3  ;;  %2039 = vmatmul.bf16.gmra.mxu3 %v5774_v1 }
 0x163   : > { %v1090_v6 = vpop.f32.mrf.mxu0  ;;  %v1139_v10 = vpop.f32.mrf.mxu1  ;;  %v1187_v14 = vadd.f32 %v1186_v3, %v5674_v29  ;;  %v1236_v18 = vadd.f32 %v1235_v5, %v5676_v33  ;;  %2115 = vmatpush.bf16.msra.mxu1 %v4152_v52 }
 0x164   : > { %v1091_v8 = vadd.f32 %v1090_v6, %v5670_v23  ;;  %v1140_v11 = vadd.f32 %v1139_v10, %v5668_v22 }
 0x165   : > { %v1356_v47 = vmul.f32 0.4, %v1187_v14  ;;  %vm1292_vm12 = vcmp.ge.f32.partialorder %v1187_v14, 0.0  ;;  %v1357_v53 = vmul.f32 0.4, %v1236_v18  ;;  %vm1293_vm13 = vcmp.ge.f32.partialorder %v1236_v18, 0.0 }
 0x166   : > { %vm1294_vm10 = vcmp.ge.f32.partialorder %v1091_v8, 0.0  ;;  %v1358_v13 = vmul.f32 0.4, %v1091_v8  ;;  %vm1295_vm11 = vcmp.ge.f32.partialorder %v1140_v11, 0.0  ;;  %v1359_v15 = vmul.f32 0.4, %v1140_v11 }
 0x167   : > { %v1420_v5 = vsel %vm1292_vm12, %v1187_v14, %v1356_v47  ;;  %v4631_v14 = vld [vmem:[#allocation8 + $0x4] sm:$0xf] }
 0x168   : > { %v1422_v24 = vsel %vm1294_vm10, %v1091_v8, %v1358_v13  ;;  %v1423_v31 = vsel %vm1295_vm11, %v1140_v11, %v1359_v15  ;;  %v1421_v8 = vsel %vm1293_vm13, %v1236_v18, %v1357_v53 }
 0x169   : > { %v5782_v30 = vpack.c.bf16 %v1422_v24, %v1418_v19  ;;  %v5784_v43 = vpack.c.bf16 %v1423_v31, %v1419_v16  ;;  %v4663_v24 = vld [vmem:[#allocation8 + $0x104] sm:$0xf]  ;;  %v4077_v31 = vld [vmem:[#allocation8 + $0x8] sm:$0xf0] }
 0x16a   : > { %v1188_v42 = vpop.f32.mrf.mxu2  ;;  %v1237_v50 = vpop.f32.mrf.mxu3  ;;  %v4208_v18 = vor.u32 %v4663_v24, %v4205_v25  ;;  %v4080_v40 = vor.u32 %v4631_v14, %v4077_v31 }
 0x16b   : > { %v1189_v49 = vadd.f32 %v1188_v42, %v5674_v29  ;;  %v1093_v51 = vpop.f32.mrf.mxu0  ;;  %1897 = vmatmul.bf16.gmra.mxu0 %v5782_v30  ;;  %v1238_v55 = vadd.f32 %v1237_v50, %v5676_v33  ;;  %v1142_v58 = vpop.f32.mrf.mxu1  ;;  %1946 = vmatmul.bf16.gmra.mxu1 %v5784_v43  ;;  %v4141_v50 = vld [vmem:[#allocation8 + $0x88] sm:$0xf0] }
 0x16c   : > { %v1094_v3 = vadd.f32 %v1093_v51, %v5670_v23  ;;  %v1143_v4 = vadd.f32 %v1142_v58, %v5668_v22  ;;  %2165 = vmatpush.bf16.msra.mxu2 %v4208_v18  ;;  %2067 = vmatpush.bf16.msra.mxu0 %v4080_v40 }
 0x16d   : > { %vm1296_vm14 = vcmp.ge.f32.partialorder %v1189_v49, 0.0  ;;  %v1360_v62 = vmul.f32 0.4, %v1189_v49  ;;  %vm1297_vm15 = vcmp.ge.f32.partialorder %v1238_v55, 0.0  ;;  %v1361_v0 = vmul.f32 0.4, %v1238_v55 }
 0x16e   : > { %v1362_v13 = vmul.f32 0.4, %v1094_v3  ;;  %vm1299_vm0 = vcmp.ge.f32.partialorder %v1143_v4, 0.0  ;;  %v1363_v15 = vmul.f32 0.4, %v1143_v4  ;;  %vm1298_vm1 = vcmp.ge.f32.partialorder %v1094_v3, 0.0 }
 0x16f   : > { %v1424_v6 = vsel %vm1296_vm14, %v1189_v49, %v1360_v62  ;;  %v1425_v10 = vsel %vm1297_vm15, %v1238_v55, %v1361_v0  ;;  %v4272_v49 = vor.u32 %v4679_v34, %v4269_v38  ;;  %v4144_v55 = vor.u32 %v4647_v41, %v4141_v50 }
 0x170   : > { %v5792_v7 = vpack.c.bf16 %v1424_v6, %v1420_v5  ;;  %v5794_v11 = vpack.c.bf16 %v1425_v10, %v1421_v8  ;;  %v1427_v45 = vsel %vm1299_vm0, %v1143_v4, %v1363_v15  ;;  %v1426_v52 = vsel %vm1298_vm1, %v1094_v3, %v1362_v13 }
 0x171   : > { %2214 = vmatpush.bf16.msra.mxu3 %v4272_v49  ;;  %2116 = vmatpush.bf16.msra.mxu1 %v4144_v55 }
 0x172   : > { %v1191_v16 = vpop.f32.mrf.mxu2  ;;  %1995 = vmatmul.bf16.gmra.mxu2 %v5792_v7  ;;  %v1240_v17 = vpop.f32.mrf.mxu3  ;;  %2044 = vmatmul.bf16.gmra.mxu3 %v5794_v11 }
 0x173   : > { %v1095_v19 = vpop.f32.mrf.mxu0  ;;  %v1144_v28 = vpop.f32.mrf.mxu1  ;;  %v1192_v46 = vadd.f32 %v1191_v16, %v5674_v29  ;;  %v1241_v51 = vadd.f32 %v1240_v17, %v5676_v33 }
 0x174   : > { %v1096_v27 = vadd.f32 %v1095_v19, %v5670_v23  ;;  %v1145_v39 = vadd.f32 %v1144_v28, %v5668_v22 }
 0x175   : > { %v1364_v4 = vmul.f32 0.4, %v1192_v46  ;;  %vm1300_vm4 = vcmp.ge.f32.partialorder %v1192_v46, 0.0  ;;  %v1365_v15 = vmul.f32 0.4, %v1241_v51  ;;  %vm1301_vm5 = vcmp.ge.f32.partialorder %v1241_v51, 0.0 }
 0x176   : > { %vm1302_vm2 = vcmp.ge.f32.partialorder %v1096_v27, 0.0  ;;  %v1366_v42 = vmul.f32 0.4, %v1096_v27  ;;  %vm1303_vm3 = vcmp.ge.f32.partialorder %v1145_v39, 0.0  ;;  %v1367_v47 = vmul.f32 0.4, %v1145_v39 }
 0x177   : > { %v1428_v24 = vsel %vm1300_vm4, %v1192_v46, %v1364_v4  ;;  %v1429_v28 = vsel %vm1301_vm5, %v1241_v51, %v1365_v15 }
 0x178   : > { %v1430_v53 = vsel %vm1302_vm2, %v1096_v27, %v1366_v42  ;;  %v1431_v62 = vsel %vm1303_vm3, %v1145_v39, %v1367_v47 }
 0x179   : > { %v5803_v58 = vpack.c.bf16 %v1430_v53, %v1426_v52  ;;  %v5805_v5 = vpack.c.bf16 %v1431_v62, %v1427_v45 }
 0x17a   : > { %v1193_v0 = vpop.f32.mrf.mxu2  ;;  %v1242_v8 = vpop.f32.mrf.mxu3 }
 0x17b   : > { %v1194_v6 = vadd.f32 %v1193_v0, %v5674_v29  ;;  %v1098_v10 = vpop.f32.mrf.mxu0  ;;  %1902 = vmatmul.bf16.gmra.mxu0 %v5803_v58  ;;  %v1243_v3 = vadd.f32 %v1242_v8, %v5676_v33  ;;  %v1147_v13 = vpop.f32.mrf.mxu1  ;;  %1951 = vmatmul.bf16.gmra.mxu1 %v5805_v5 }
 0x17c   : > { %v1148_v19 = vadd.f32 %v1147_v13, %v5668_v22  ;;  %v1099_v14 = vadd.f32 %v1098_v10, %v5670_v23 }
 0x17d   : > { %vm1304_vm6 = vcmp.ge.f32.partialorder %v1194_v6, 0.0  ;;  %v1368_v16 = vmul.f32 0.4, %v1194_v6  ;;  %vm1305_vm7 = vcmp.ge.f32.partialorder %v1243_v3, 0.0  ;;  %v1369_v17 = vmul.f32 0.4, %v1243_v3 }
 0x17e   : > { %v1371_v38 = vmul.f32 0.4, %v1148_v19  ;;  %v1370_v41 = vmul.f32 0.4, %v1099_v14  ;;  %vm1307_vm8 = vcmp.ge.f32.partialorder %v1148_v19, 0.0  ;;  %vm1306_vm9 = vcmp.ge.f32.partialorder %v1099_v14, 0.0 }
 0x17f   : > { %v1432_v25 = vsel %vm1304_vm6, %v1194_v6, %v1368_v16  ;;  %v1433_v18 = vsel %vm1305_vm7, %v1243_v3, %v1369_v17 }
 0x180   : > { %v5813_v27 = vpack.c.bf16 %v1432_v25, %v1428_v24  ;;  %v5815_v31 = vpack.c.bf16 %v1433_v18, %v1429_v28  ;;  %v1435_v51 = vsel %vm1307_vm8, %v1148_v19, %v1371_v38  ;;  %v1434_v53 = vsel %vm1306_vm9, %v1099_v14, %v1370_v41  ;;  %v4702_v38 = vld [vmem:[#allocation10 + $0x38] sm:$0xff] }
 0x181   : > { %2500 = vmatpush.bf16.msrb.mxu0 %v4702_v38 }
 0x182   : > { %v1196_v34 = vpop.f32.mrf.mxu2  ;;  %2000 = vmatmul.bf16.gmra.mxu2 %v5813_v27  ;;  %v1245_v39 = vpop.f32.mrf.mxu3  ;;  %2049 = vmatmul.bf16.gmra.mxu3 %v5815_v31 }
 0x183   : > { %v1100_v40 = vpop.f32.mrf.mxu0  ;;  %v1149_v45 = vpop.f32.mrf.mxu1  ;;  %v1197_v49 = vadd.f32 %v1196_v34, %v5674_v29  ;;  %v1246_v52 = vadd.f32 %v1245_v39, %v5676_v33  ;;  %v4710_v39 = vld [vmem:[#allocation10 + $0x78] sm:$0xff] }
 0x184   : > { %v1101_v42 = vadd.f32 %v1100_v40, %v5670_v23  ;;  %v1150_v46 = vadd.f32 %v1149_v45, %v5668_v22  ;;  %2549 = vmatpush.bf16.msrb.mxu1 %v4710_v39  ;;  %v4700_v39 = vld [vmem:[#allocation10 + $0x28] sm:$0xff] }
 0x185   : > { %v1372_v6 = vmul.f32 0.4, %v1197_v49  ;;  %vm1308_vm12 = vcmp.ge.f32.partialorder %v1197_v49, 0.0  ;;  %v1373_v10 = vmul.f32 0.4, %v1246_v52  ;;  %vm1309_vm13 = vcmp.ge.f32.partialorder %v1246_v52, 0.0 }
 0x186   : > { %vm1310_vm10 = vcmp.ge.f32.partialorder %v1101_v42, 0.0  ;;  %v1374_v47 = vmul.f32 0.4, %v1101_v42  ;;  %vm1311_vm11 = vcmp.ge.f32.partialorder %v1150_v46, 0.0  ;;  %v1375_v50 = vmul.f32 0.4, %v1150_v46 }
 0x187   : > { %v1436_v16 = vsel %vm1308_vm12, %v1197_v49, %v1372_v6  ;;  %v1437_v24 = vsel %vm1309_vm13, %v1246_v52, %v1373_v10 }
 0x188   : > { %v1438_v55 = vsel %vm1310_vm10, %v1101_v42, %v1374_v47  ;;  %v1439_v0 = vsel %vm1311_vm11, %v1150_v46, %v1375_v50 }
 0x189   : > { %v5823_v62 = vpack.c.bf16 %v1438_v55, %v1434_v53  ;;  %v5825_v23 = vpack.c.bf16 %v1439_v0, %v1435_v51  ;;  %v4709_v55 = vld [vmem:[#allocation10 + $0x70] sm:$0xff] }
 0x18a   : > { %v1198_v4 = vpop.f32.mrf.mxu2  ;;  %v1247_v8 = vpop.f32.mrf.mxu3  ;;  %2550 = vmatpush.bf16.msrb.mxu1 %v4709_v55 }
 0x18b   : > { %v1199_v22 = vadd.f32 %v1198_v4, %v5674_v29  ;;  %1907 = vmatmul.bf16.gmra.mxu0 %v5823_v62  ;;  %v1248_v15 = vadd.f32 %v1247_v8, %v5676_v33  ;;  %1956 = vmatmul.bf16.gmra.mxu1 %v5825_v23  ;;  %v5839_v33 = vld [vmem:[%s6188_s4] sm:$0x3] }
 0x18c   : > { %v5843_v14 = vperm.slane %v5839_v33, 0 }
 0x18d   : > { %vm1312_vm14 = vcmp.ge.f32.partialorder %v1199_v22, 0.0  ;;  %v1376_v3 = vmul.f32 0.4, %v1199_v22  ;;  %vm1313_vm15 = vcmp.ge.f32.partialorder %v1248_v15, 0.0  ;;  %v1377_v13 = vmul.f32 0.4, %v1248_v15 }
 0x18f   : > { %v1440_v17 = vsel %vm1312_vm14, %v1199_v22, %v1376_v3  ;;  %v1441_v29 = vsel %vm1313_vm15, %v1248_v15, %v1377_v13 }
 0x190   : > { %v5831_v19 = vpack.c.bf16 %v1440_v17, %v1436_v16  ;;  %v5833_v25 = vpack.c.bf16 %v1441_v29, %v1437_v24 }
 0x192   : > { %2005 = vmatmul.bf16.gmra.mxu2 %v5831_v19  ;;  %2054 = vmatmul.bf16.gmra.mxu3 %v5833_v25 }
 0x198   : > { %v1873_v28 = vpop.f32.mrf.mxu0  ;;  %v1922_v34 = vpop.f32.mrf.mxu1 }
 0x199   : > { %v1874_v18 = vadd.f32 %v1873_v28, %v5843_v14 }
 0x19b   : > { %v1923_v40 = vadd.f32 %v1922_v34, %v1874_v18  ;;  %2068 = vmatmul.bf16.vlgmr.msra.gmra.mxu0 %v5682_v48  ;;  %2117 = vmatmul.bf16.vlgmr.msra.gmra.mxu1 %v5684_v56  ;;  %v4701_v56 = vld [vmem:[#allocation10 + $0x30] sm:$0xff] }
 0x19c   : > { %2501 = vmatpush.bf16.msrb.mxu0 %v4701_v56 }
 0x1a0   : > { %v1875_v41 = vpop.f32.mrf.mxu0  ;;  %v1924_v45 = vpop.f32.mrf.mxu1  ;;  %2502 = vmatpush.bf16.msrb.mxu0 %v4700_v39 }
 0x1a1   : > { %v1876_v42 = vadd.f32 %v1875_v41, %v5843_v14 }
 0x1a2   : > { %2166 = vmatmul.bf16.vlgmr.msra.gmra.mxu2 %v5692_v9  ;;  %2215 = vmatmul.bf16.vlgmr.msra.gmra.mxu3 %v5694_v12 }
 0x1a3   : > { %v1925_v46 = vadd.f32 %v1924_v45, %v1876_v42 }
 0x1a5   : > { %v1971_v47 = vpop.f32.mrf.mxu2  ;;  %v2020_v50 = vpop.f32.mrf.mxu3 }
 0x1a6   : > { %v1972_v49 = vadd.f32 %v1971_v47, %v1923_v40 }
 0x1a8   : > { %v2021_v51 = vadd.f32 %v2020_v50, %v1972_v49  ;;  %v1878_v52 = vpop.f32.mrf.mxu0  ;;  %v1927_v53 = vpop.f32.mrf.mxu1 }
 0x1a9   : > { %v1879_v48 = vadd.f32 %v1878_v52, %v5843_v14 }
 0x1aa   : > { %v2288_v6 = vmul.f32 0.4, %v2021_v51  ;;  %vm2256_vm0 = vcmp.ge.f32.partialorder %v2021_v51, 0.0 }
 0x1ab   : > { %v1928_v0 = vadd.f32 %v1927_v53, %v1879_v48  ;;  %2073 = vmatmul.bf16.gmra.mxu0 %v5702_v36  ;;  %2122 = vmatmul.bf16.gmra.mxu1 %v5704_v44 }
 0x1ac   : > { %v5857_v36 = vsel %vm2256_vm0, %v2021_v51, %v2288_v6  ;;  %v4699_v6 = vld [vmem:[#allocation10 + $0x20] sm:$0xff] }
 0x1ad   : > { %v1973_v9 = vpop.f32.mrf.mxu2  ;;  %v2022_v12 = vpop.f32.mrf.mxu3  ;;  %2503 = vmatpush.bf16.msrb.mxu0 %v4699_v6 }
 0x1ae   : > { %v1974_v4 = vadd.f32 %v1973_v9, %v1925_v46 }
 0x1b0   : > { %v2023_v22 = vadd.f32 %v2022_v12, %v1974_v4  ;;  %v1880_v8 = vpop.f32.mrf.mxu0  ;;  %v1929_v15 = vpop.f32.mrf.mxu1 }
 0x1b1   : > { %v1881_v10 = vadd.f32 %v1880_v8, %v5843_v14 }
 0x1b2   : > { %vm2258_vm1 = vcmp.ge.f32.partialorder %v2023_v22, 0.0  ;;  %v2290_v3 = vmul.f32 0.4, %v2023_v22  ;;  %2171 = vmatmul.bf16.gmra.mxu2 %v5712_v63  ;;  %2220 = vmatmul.bf16.gmra.mxu3 %v5714_v2  ;;  %v4708_v63 = vld [vmem:[#allocation10 + $0x68] sm:$0xff] }
 0x1b3   : > { %v1930_v13 = vadd.f32 %v1929_v15, %v1881_v10  ;;  %2551 = vmatpush.bf16.msrb.mxu1 %v4708_v63 }
 0x1b4   : > { %v5859_v44 = vsel %vm2258_vm1, %v2023_v22, %v2290_v3 }
 0x1b5   : > { %v2352_v16 = vpack.c.bf16 %v5859_v44, %v5857_v36  ;;  %v1976_v17 = vpop.f32.mrf.mxu2  ;;  %v2025_v29 = vpop.f32.mrf.mxu3 }
 0x1b6   : > { %v1977_v24 = vadd.f32 %v1976_v17, %v1928_v0 }
 0x1b8   : > { %v2026_v28 = vadd.f32 %v2025_v29, %v1977_v24  ;;  %v1883_v18 = vpop.f32.mrf.mxu0  ;;  %v1932_v38 = vpop.f32.mrf.mxu1 }
 0x1b9   : > { %v1884_v34 = vadd.f32 %v1883_v18, %v5843_v14 }
 0x1ba   : > { %v2292_v45 = vmul.f32 0.4, %v2026_v28  ;;  %vm2260_vm2 = vcmp.ge.f32.partialorder %v2026_v28, 0.0 }
 0x1bb   : > { %v1933_v40 = vadd.f32 %v1932_v38, %v1884_v34  ;;  %2078 = vmatmul.bf16.gmra.mxu0 %v5722_v26  ;;  %2127 = vmatmul.bf16.gmra.mxu1 %v5724_v37 }
 0x1bc   : > { %v5869_v26 = vsel %vm2260_vm2, %v2026_v28, %v2292_v45 }
 0x1bd   : > { %v1978_v2 = vpop.f32.mrf.mxu2  ;;  %v2027_v42 = vpop.f32.mrf.mxu3 }
 0x1be   : > { %v1979_v41 = vadd.f32 %v1978_v2, %v1930_v13 }
 0x1c0   : > { %v2028_v46 = vadd.f32 %v2027_v42, %v1979_v41  ;;  %v1885_v47 = vpop.f32.mrf.mxu0  ;;  %v1934_v50 = vpop.f32.mrf.mxu1  ;;  %v4698_v42 = vld [vmem:[#allocation10 + $0x18] sm:$0xff] }
 0x1c1   : > { %v1886_v49 = vadd.f32 %v1885_v47, %v5843_v14  ;;  %2504 = vmatpush.bf16.msrb.mxu0 %v4698_v42 }
 0x1c2   : > { %vm2262_vm3 = vcmp.ge.f32.partialorder %v2028_v46, 0.0  ;;  %v2294_v51 = vmul.f32 0.4, %v2028_v46  ;;  %2176 = vmatmul.bf16.gmra.mxu2 %v5732_v57  ;;  %2225 = vmatmul.bf16.gmra.mxu3 %v5734_v60  ;;  %v4707_v57 = vld [vmem:[#allocation10 + $0x60] sm:$0xff] }
 0x1c3   : > { %v1935_v52 = vadd.f32 %v1934_v50, %v1886_v49  ;;  %2552 = vmatpush.bf16.msrb.mxu1 %v4707_v57 }
 0x1c4   : > { %v5871_v37 = vsel %vm2262_vm3, %v2028_v46, %v2294_v51 }
 0x1c5   : > { %v1981_v48 = vpop.f32.mrf.mxu2  ;;  %v2354_v53 = vpack.c.bf16 %v5871_v37, %v5869_v26  ;;  %v2030_v55 = vpop.f32.mrf.mxu3 }
 0x1c6   : > { %v1982_v56 = vadd.f32 %v1981_v48, %v1933_v40 }
 0x1c8   : > { %v2031_v0 = vadd.f32 %v2030_v55, %v1982_v56  ;;  %v1888_v9 = vpop.f32.mrf.mxu0  ;;  %v1937_v12 = vpop.f32.mrf.mxu1 }
 0x1c9   : > { %v1889_v4 = vadd.f32 %v1888_v9, %v5843_v14 }
 0x1ca   : > { %v2296_v15 = vmul.f32 0.4, %v2031_v0  ;;  %vm2264_vm4 = vcmp.ge.f32.partialorder %v2031_v0, 0.0 }
 0x1cb   : > { %v1938_v22 = vadd.f32 %v1937_v12, %v1889_v4  ;;  %2083 = vmatmul.bf16.gmra.mxu0 %v5742_v20  ;;  %2132 = vmatmul.bf16.gmra.mxu1 %v5744_v32 }
 0x1cc   : > { %v5881_v20 = vsel %vm2264_vm4, %v2031_v0, %v2296_v15 }
 0x1cd   : > { %v1983_v60 = vpop.f32.mrf.mxu2  ;;  %v2032_v10 = vpop.f32.mrf.mxu3 }
 0x1ce   : > { %v1984_v8 = vadd.f32 %v1983_v60, %v1935_v52  ;;  %v4705_v60 = vld [vmem:[#allocation10 + $0x50] sm:$0xff] }
 0x1d0   : > { %v2033_v3 = vadd.f32 %v2032_v10, %v1984_v8  ;;  %v1890_v13 = vpop.f32.mrf.mxu0  ;;  %v1939_v24 = vpop.f32.mrf.mxu1 }
 0x1d1   : > { %v1891_v17 = vadd.f32 %v1890_v13, %v5843_v14 }
 0x1d2   : > { %vm2266_vm5 = vcmp.ge.f32.partialorder %v2033_v3, 0.0  ;;  %v2298_v29 = vmul.f32 0.4, %v2033_v3  ;;  %2181 = vmatmul.bf16.gmra.mxu2 %v5752_v54  ;;  %2230 = vmatmul.bf16.gmra.mxu3 %v5754_v59  ;;  %v4706_v54 = vld [vmem:[#allocation10 + $0x58] sm:$0xff] }
 0x1d3   : > { %v1940_v28 = vadd.f32 %v1939_v24, %v1891_v17  ;;  %2553 = vmatpush.bf16.msrb.mxu1 %v4706_v54  ;;  %v4695_v54 = vld [vmem:[#allocation10] sm:$0xff] }
 0x1d4   : > { %v5883_v32 = vsel %vm2266_vm5, %v2033_v3, %v2298_v29 }
 0x1d5   : > { %v1986_v18 = vpop.f32.mrf.mxu2  ;;  %v2356_v34 = vpack.c.bf16 %v5883_v32, %v5881_v20  ;;  %v2035_v39 = vpop.f32.mrf.mxu3 }
 0x1d6   : > { %v1987_v38 = vadd.f32 %v1986_v18, %v1938_v22 }
 0x1d7   : > { %2554 = vmatpush.bf16.msrb.mxu1 %v4705_v60 }
 0x1d8   : > { %v2036_v63 = vadd.f32 %v2035_v39, %v1987_v38  ;;  %v1893_v40 = vpop.f32.mrf.mxu0  ;;  %v1942_v41 = vpop.f32.mrf.mxu1 }
 0x1d9   : > { %v1894_v2 = vadd.f32 %v1893_v40, %v5843_v14 }
 0x1da   : > { %v2300_v49 = vmul.f32 0.4, %v2036_v63  ;;  %vm2268_vm6 = vcmp.ge.f32.partialorder %v2036_v63, 0.0 }
 0x1db   : > { %v1943_v45 = vadd.f32 %v1942_v41, %v1894_v2  ;;  %2088 = vmatmul.bf16.gmra.mxu0 %v5762_v21  ;;  %2137 = vmatmul.bf16.gmra.mxu1 %v5764_v35 }
 0x1dc   : > { %v5892_v56 = vsel %vm2268_vm6, %v2036_v63, %v2300_v49 }
 0x1dd   : > { %v1988_v59 = vpop.f32.mrf.mxu2  ;;  %v2037_v47 = vpop.f32.mrf.mxu3 }
 0x1de   : > { %v1989_v46 = vadd.f32 %v1988_v59, %v1940_v28 }
 0x1e0   : > { %v2038_v50 = vadd.f32 %v2037_v47, %v1989_v46  ;;  %v1895_v51 = vpop.f32.mrf.mxu0  ;;  %v1944_v52 = vpop.f32.mrf.mxu1 }
 0x1e1   : > { %v1896_v4 = vadd.f32 %v1895_v51, %v5843_v14 }
 0x1e2   : > { %vm2270_vm7 = vcmp.ge.f32.partialorder %v2038_v50, 0.0  ;;  %v2302_v48 = vmul.f32 0.4, %v2038_v50  ;;  %2186 = vmatmul.bf16.gmra.mxu2 %v5772_v61  ;;  %2235 = vmatmul.bf16.gmra.mxu3 %v5774_v1  ;;  %v4697_v61 = vld [vmem:[#allocation10 + $0x10] sm:$0xff] }
 0x1e3   : > { %v1945_v8 = vadd.f32 %v1944_v52, %v1896_v4  ;;  %2505 = vmatpush.bf16.msrb.mxu0 %v4697_v61 }
 0x1e4   : > { %v5894_v21 = vsel %vm2270_vm7, %v2038_v50, %v2302_v48 }
 0x1e5   : > { %v1991_v35 = vpop.f32.mrf.mxu2  ;;  %v2358_v55 = vpack.c.bf16 %v5894_v21, %v5892_v56  ;;  %v2040_v9 = vpop.f32.mrf.mxu3 }
 0x1e6   : > { %v1992_v0 = vadd.f32 %v1991_v35, %v1943_v45  ;;  %v4704_v45 = vld [vmem:[#allocation10 + $0x48] sm:$0xff] }
 0x1e7   : > { %2555 = vmatpush.bf16.msrb.mxu1 %v4704_v45 }
 0x1e8   : > { %v2041_v12 = vadd.f32 %v2040_v9, %v1992_v0  ;;  %v1898_v6 = vpop.f32.mrf.mxu0  ;;  %v1947_v22 = vpop.f32.mrf.mxu1 }
 0x1e9   : > { %v1899_v57 = vadd.f32 %v1898_v6, %v5843_v14 }
 0x1ea   : > { %v2304_v13 = vmul.f32 0.4, %v2041_v12  ;;  %vm2272_vm8 = vcmp.ge.f32.partialorder %v2041_v12, 0.0 }
 0x1eb   : > { %v1948_v1 = vadd.f32 %v1947_v22, %v1899_v57  ;;  %2093 = vmatmul.bf16.gmra.mxu0 %v5782_v30  ;;  %2142 = vmatmul.bf16.gmra.mxu1 %v5784_v43  ;;  %v4696_v30 = vld [vmem:[#allocation10 + $0x8] sm:$0xff] }
 0x1ec   : > { %v5904_v18 = vsel %vm2272_vm8, %v2041_v12, %v2304_v13  ;;  %2506 = vmatpush.bf16.msrb.mxu0 %v4696_v30 }
 0x1ed   : > { %v1993_v10 = vpop.f32.mrf.mxu2  ;;  %v2042_v3 = vpop.f32.mrf.mxu3 }
 0x1ee   : > { %v1994_v15 = vadd.f32 %v1993_v10, %v1945_v8  ;;  %v4703_v8 = vld [vmem:[#allocation10 + $0x40] sm:$0xff] }
 0x1ef   : > { %2556 = vmatpush.bf16.msrb.mxu1 %v4703_v8 }
 0x1f0   : > { %v2043_v17 = vadd.f32 %v2042_v3, %v1994_v15  ;;  %v1900_v24 = vpop.f32.mrf.mxu0  ;;  %v1949_v29 = vpop.f32.mrf.mxu1  ;;  %2507 = vmatpush.bf16.msrb.mxu0 %v4695_v54 }
 0x1f1   : > { %v1901_v2 = vadd.f32 %v1900_v24, %v5843_v14 }
 0x1f2   : > { %vm2274_vm9 = vcmp.ge.f32.partialorder %v2043_v17, 0.0  ;;  %v2306_v28 = vmul.f32 0.4, %v2043_v17  ;;  %2191 = vmatmul.bf16.gmra.mxu2 %v5792_v7  ;;  %2240 = vmatmul.bf16.gmra.mxu3 %v5794_v11 }
 0x1f3   : > { %v1950_v46 = vadd.f32 %v1949_v29, %v1901_v2 }
 0x1f4   : > { %v5906_v43 = vsel %vm2274_vm9, %v2043_v17, %v2306_v28 }
 0x1f5   : > { %v1996_v38 = vpop.f32.mrf.mxu2  ;;  %v2360_v39 = vpack.c.bf16 %v5906_v43, %v5904_v18  ;;  %v2045_v40 = vpop.f32.mrf.mxu3 }
 0x1f6   : > { %v1997_v63 = vadd.f32 %v1996_v38, %v1948_v1 }
 0x1f8   : > { %v2046_v41 = vadd.f32 %v2045_v40, %v1997_v63  ;;  %v1903_v42 = vpop.f32.mrf.mxu0  ;;  %v1952_v11 = vpop.f32.mrf.mxu1 }
 0x1f9   : > { %v1904_v7 = vadd.f32 %v1903_v42, %v5843_v14 }
 0x1fa   : > { %v2308_v51 = vmul.f32 0.4, %v2046_v41  ;;  %vm2276_vm10 = vcmp.ge.f32.partialorder %v2046_v41, 0.0 }
 0x1fb   : > { %v1953_v59 = vadd.f32 %v1952_v11, %v1904_v7  ;;  %2098 = vmatmul.bf16.gmra.mxu0 %v5803_v58  ;;  %2147 = vmatmul.bf16.gmra.mxu1 %v5805_v5  ;;  %v5939_v7 = vperm.slane %v5839_v33, 1 }
 0x1fc   : > { %v5916_v9 = vsel %vm2276_vm10, %v2046_v41, %v2308_v51  ;;  %v4718_v51 = vld [vmem:[#allocation11 + $0x38] sm:$0xff] }
 0x1fd   : > { %v1998_v47 = vpop.f32.mrf.mxu2  ;;  %v2047_v50 = vpop.f32.mrf.mxu3  ;;  %2722 = vmatpush.bf16.msrb.mxu2 %v4718_v51 }
 0x1fe   : > { %v1999_v49 = vadd.f32 %v1998_v47, %v1950_v46 }
 0x200   : > { %v2048_v52 = vadd.f32 %v2047_v50, %v1999_v49  ;;  %v1905_v48 = vpop.f32.mrf.mxu0  ;;  %v1954_v35 = vpop.f32.mrf.mxu1 }
 0x201   : > { %v1906_v57 = vadd.f32 %v1905_v48, %v5843_v14 }
 0x202   : > { %vm2278_vm11 = vcmp.ge.f32.partialorder %v2048_v52, 0.0  ;;  %v2310_v0 = vmul.f32 0.4, %v2048_v52  ;;  %2196 = vmatmul.bf16.gmra.mxu2 %v5813_v27  ;;  %2245 = vmatmul.bf16.gmra.mxu3 %v5815_v31 }
 0x203   : > { %v1955_v31 = vadd.f32 %v1954_v35, %v1906_v57 }
 0x204   : > { %v5918_v58 = vsel %vm2278_vm11, %v2048_v52, %v2310_v0 }
 0x205   : > { %v2001_v5 = vpop.f32.mrf.mxu2  ;;  %v2362_v4 = vpack.c.bf16 %v5918_v58, %v5916_v9  ;;  %v2050_v6 = vpop.f32.mrf.mxu3 }
 0x206   : > { %v2002_v12 = vadd.f32 %v2001_v5, %v1953_v59 }
 0x208   : > { %v2051_v22 = vadd.f32 %v2050_v6, %v2002_v12  ;;  %v1908_v61 = vpop.f32.mrf.mxu0  ;;  %v1957_v1 = vpop.f32.mrf.mxu1 }
 0x209   : > { %v1909_v60 = vadd.f32 %v1908_v61, %v5843_v14 }
 0x20a   : > { %v2312_v13 = vmul.f32 0.4, %v2051_v22  ;;  %vm2280_vm12 = vcmp.ge.f32.partialorder %v2051_v22, 0.0 }
 0x20b   : > { %v1958_v27 = vadd.f32 %v1957_v1, %v1909_v60  ;;  %2103 = vmatmul.bf16.gmra.mxu0 %v5823_v62  ;;  %2152 = vmatmul.bf16.gmra.mxu1 %v5825_v23 }
 0x20c   : > { %v5928_v62 = vsel %vm2280_vm12, %v2051_v22, %v2312_v13 }
 0x20d   : > { %v2003_v10 = vpop.f32.mrf.mxu2  ;;  %v2052_v3 = vpop.f32.mrf.mxu3 }
 0x20e   : > { %v2004_v15 = vadd.f32 %v2003_v10, %v1955_v31 }
 0x210   : > { %v2053_v17 = vadd.f32 %v2052_v3, %v2004_v15  ;;  %v1910_v24 = vpop.f32.mrf.mxu0  ;;  %v1959_v29 = vpop.f32.mrf.mxu1  ;;  %v4717_v3 = vld [vmem:[#allocation11 + $0x30] sm:$0xff] }
 0x211   : > { %v1911_v2 = vadd.f32 %v1910_v24, %v5843_v14  ;;  %2723 = vmatpush.bf16.msrb.mxu2 %v4717_v3 }
 0x212   : > { %vm2282_vm13 = vcmp.ge.f32.partialorder %v2053_v17, 0.0  ;;  %v2314_v28 = vmul.f32 0.4, %v2053_v17  ;;  %2201 = vmatmul.bf16.gmra.mxu2 %v5831_v19  ;;  %2250 = vmatmul.bf16.gmra.mxu3 %v5833_v25 }
 0x213   : > { %v1960_v19 = vadd.f32 %v1959_v29, %v1911_v2 }
 0x214   : > { %v5930_v30 = vsel %vm2282_vm13, %v2053_v17, %v2314_v28 }
 0x215   : > { %v2006_v23 = vpop.f32.mrf.mxu2  ;;  %v2364_v38 = vpack.c.bf16 %v5930_v30, %v5928_v62  ;;  %v2055_v40 = vpop.f32.mrf.mxu3 }
 0x216   : > { %v2007_v63 = vadd.f32 %v2006_v23, %v1958_v27 }
 0x218   : > { %v2056_v41 = vadd.f32 %v2055_v40, %v2007_v63  ;;  %v2069_v42 = vpop.f32.mrf.mxu0  ;;  %v2118_v54 = vpop.f32.mrf.mxu1 }
 0x219   : > { %v2070_v14 = vadd.f32 %v2069_v42, %v5939_v7 }
 0x21a   : > { %v2316_v59 = vmul.f32 0.4, %v2056_v41  ;;  %vm2284_vm14 = vcmp.ge.f32.partialorder %v2056_v41, 0.0 }
 0x21b   : > { %2508 = vmatmul.bf16.vlgmr.msrb.gmra.mxu0 %v2352_v16  ;;  %v2119_v16 = vadd.f32 %v2118_v54, %v2070_v14 }
 0x21c   : > { %v5942_v52 = vsel %vm2284_vm14, %v2056_v41, %v2316_v59 }
 0x21d   : > { %v2008_v25 = vpop.f32.mrf.mxu2  ;;  %v2057_v45 = vpop.f32.mrf.mxu3 }
 0x21e   : > { %v2009_v11 = vadd.f32 %v2008_v25, %v1960_v19 }
 0x220   : > { %v2058_v46 = vadd.f32 %v2057_v45, %v2009_v11  ;;  %v2071_v47 = vpop.f32.mrf.mxu0  ;;  %v2120_v49 = vpop.f32.mrf.mxu1 }
 0x221   : > { %v2072_v35 = vadd.f32 %v2071_v47, %v5939_v7  ;;  %v4716_v47 = vld [vmem:[#allocation11 + $0x28] sm:$0xff] }
 0x222   : > { %vm2286_vm15 = vcmp.ge.f32.partialorder %v2058_v46, 0.0  ;;  %v2318_v50 = vmul.f32 0.4, %v2058_v46  ;;  %2724 = vmatpush.bf16.msrb.mxu2 %v4716_v47 }
 0x223   : > { %v2121_v6 = vadd.f32 %v2120_v49, %v2072_v35 }
 0x224   : > { %v5944_v36 = vsel %vm2286_vm15, %v2058_v46, %v2318_v50 }
 0x225   : > { %v2167_v44 = vpop.f32.mrf.mxu2  ;;  %v2366_v33 = vpack.c.bf16 %v5944_v36, %v5942_v52  ;;  %v2216_v48 = vpop.f32.mrf.mxu3 }
 0x226   : > { %v2168_v0 = vadd.f32 %v2167_v44, %v2119_v16 }
 0x228   : > { %v2074_v5 = vpop.f32.mrf.mxu0  ;;  %v2123_v12 = vpop.f32.mrf.mxu1  ;;  %v2217_v57 = vadd.f32 %v2216_v48, %v2168_v0 }
 0x229   : > { %v2075_v10 = vadd.f32 %v2074_v5, %v5939_v7 }
 0x22a   : > { %v2289_v1 = vmul.f32 0.4, %v2217_v57  ;;  %vm2257_vm0 = vcmp.ge.f32.partialorder %v2217_v57, 0.0 }
 0x22b   : > { %2513 = vmatmul.bf16.gmra.mxu0 %v2354_v53  ;;  %v2124_v37 = vadd.f32 %v2123_v12, %v2075_v10 }
 0x22c   : > { %v2321_v13 = vsel %vm2257_vm0, %v2217_v57, %v2289_v1 }
 0x22d   : > { %v2169_v22 = vpop.f32.mrf.mxu2  ;;  %v2218_v60 = vpop.f32.mrf.mxu3 }
 0x22e   : > { %v2170_v61 = vadd.f32 %v2169_v22, %v2121_v6 }
 0x230   : > { %v2219_v27 = vadd.f32 %v2218_v60, %v2170_v61  ;;  %v2076_v31 = vpop.f32.mrf.mxu0  ;;  %v2125_v8 = vpop.f32.mrf.mxu1 }
 0x231   : > { %v2077_v29 = vadd.f32 %v2076_v31, %v5939_v7  ;;  %v4715_v31 = vld [vmem:[#allocation11 + $0x20] sm:$0xff] }
 0x232   : > { %vm2259_vm1 = vcmp.ge.f32.partialorder %v2219_v27, 0.0  ;;  %v2291_v15 = vmul.f32 0.4, %v2219_v27  ;;  %2725 = vmatpush.bf16.msrb.mxu2 %v4715_v31 }
 0x233   : > { %v2126_v40 = vadd.f32 %v2125_v8, %v2077_v29 }
 0x234   : > { %v2323_v17 = vsel %vm2259_vm1, %v2219_v27, %v2291_v15 }
 0x235   : > { %v2353_v24 = vpack.c.bf16 %v2323_v17, %v2321_v13  ;;  %v2172_v26 = vpop.f32.mrf.mxu2  ;;  %v2221_v53 = vpop.f32.mrf.mxu3 }
 0x236   : > { %v2173_v28 = vadd.f32 %v2172_v26, %v2124_v37 }
 0x237   : > { %2557 = vmatmul.bf16.vlgmr.msrb.gmra.mxu1 %v2353_v24 }
 0x238   : > { %v2079_v23 = vpop.f32.mrf.mxu0  ;;  %v2128_v63 = vpop.f32.mrf.mxu1  ;;  %v2222_v2 = vadd.f32 %v2221_v53, %v2173_v28 }
 0x239   : > { %v2080_v59 = vadd.f32 %v2079_v23, %v5939_v7 }
 0x23a   : > { %v2293_v19 = vmul.f32 0.4, %v2222_v2  ;;  %vm2261_vm2 = vcmp.ge.f32.partialorder %v2222_v2, 0.0 }
 0x23b   : > { %2518 = vmatmul.bf16.gmra.mxu0 %v2356_v34  ;;  %v2129_v32 = vadd.f32 %v2128_v63, %v2080_v59 }
 0x23c   : > { %v2325_v49 = vsel %vm2261_vm2, %v2222_v2, %v2293_v19 }
 0x23d   : > { %v2174_v41 = vpop.f32.mrf.mxu2  ;;  %v2223_v54 = vpop.f32.mrf.mxu3 }
 0x23e   : > { %v2175_v42 = vadd.f32 %v2174_v41, %v2126_v40 }
 0x240   : > { %v2224_v25 = vadd.f32 %v2223_v54, %v2175_v42  ;;  %v2081_v11 = vpop.f32.mrf.mxu0  ;;  %v2130_v45 = vpop.f32.mrf.mxu1  ;;  %v4714_v54 = vld [vmem:[#allocation11 + $0x18] sm:$0xff] }
 0x241   : > { %v2082_v51 = vadd.f32 %v2081_v11, %v5939_v7  ;;  %2726 = vmatpush.bf16.msrb.mxu2 %v4714_v54 }
 0x242   : > { %vm2263_vm3 = vcmp.ge.f32.partialorder %v2224_v25, 0.0  ;;  %v2295_v46 = vmul.f32 0.4, %v2224_v25 }
 0x243   : > { %v2131_v35 = vadd.f32 %v2130_v45, %v2082_v51 }
 0x244   : > { %v2327_v14 = vsel %vm2263_vm3, %v2224_v25, %v2295_v46 }
 0x245   : > { %v2177_v50 = vpop.f32.mrf.mxu2  ;;  %v2355_v20 = vpack.c.bf16 %v2327_v14, %v2325_v49  ;;  %v2226_v34 = vpop.f32.mrf.mxu3 }
 0x246   : > { %v2178_v44 = vadd.f32 %v2177_v50, %v2129_v32 }
 0x247   : > { %2562 = vmatmul.bf16.gmra.mxu1 %v2355_v20 }
 0x248   : > { %v2084_v16 = vpop.f32.mrf.mxu0  ;;  %v2133_v48 = vpop.f32.mrf.mxu1  ;;  %v2227_v0 = vadd.f32 %v2226_v34, %v2178_v44 }
 0x249   : > { %v2085_v1 = vadd.f32 %v2084_v16, %v5939_v7 }
 0x24a   : > { %v2297_v57 = vmul.f32 0.4, %v2227_v0  ;;  %vm2265_vm4 = vcmp.ge.f32.partialorder %v2227_v0, 0.0 }
 0x24b   : > { %2523 = vmatmul.bf16.gmra.mxu0 %v2358_v55  ;;  %v2134_v21 = vadd.f32 %v2133_v48, %v2085_v1 }
 0x24c   : > { %v2329_v8 = vsel %vm2265_vm4, %v2227_v0, %v2297_v57  ;;  %v4713_v0 = vld [vmem:[#allocation11 + $0x10] sm:$0xff] }
 0x24d   : > { %v2179_v5 = vpop.f32.mrf.mxu2  ;;  %v2228_v6 = vpop.f32.mrf.mxu3  ;;  %2727 = vmatpush.bf16.msrb.mxu2 %v4713_v0 }
 0x24e   : > { %v2180_v12 = vadd.f32 %v2179_v5, %v2131_v35 }
 0x250   : > { %v2229_v22 = vadd.f32 %v2228_v6, %v2180_v12  ;;  %v2086_v61 = vpop.f32.mrf.mxu0  ;;  %v2135_v60 = vpop.f32.mrf.mxu1 }
 0x251   : > { %v2087_v3 = vadd.f32 %v2086_v61, %v5939_v7 }
 0x252   : > { %vm2267_vm5 = vcmp.ge.f32.partialorder %v2229_v22, 0.0  ;;  %v2299_v27 = vmul.f32 0.4, %v2229_v22 }
 0x253   : > { %v2136_v26 = vadd.f32 %v2135_v60, %v2087_v3 }
 0x254   : > { %v2331_v10 = vsel %vm2267_vm5, %v2229_v22, %v2299_v27 }
 0x255   : > { %v2182_v15 = vpop.f32.mrf.mxu2  ;;  %v2357_v56 = vpack.c.bf16 %v2331_v10, %v2329_v8  ;;  %v2231_v55 = vpop.f32.mrf.mxu3 }
 0x256   : > { %v2183_v13 = vadd.f32 %v2182_v15, %v2134_v21 }
 0x257   : > { %2567 = vmatmul.bf16.gmra.mxu1 %v2357_v56 }
 0x258   : > { %v2089_v17 = vpop.f32.mrf.mxu0  ;;  %v2138_v24 = vpop.f32.mrf.mxu1  ;;  %v2232_v37 = vadd.f32 %v2231_v55, %v2183_v13  ;;  %v4712_v13 = vld [vmem:[#allocation11 + $0x8] sm:$0xff] }
 0x259   : > { %v2090_v41 = vadd.f32 %v2089_v17, %v5939_v7  ;;  %2728 = vmatpush.bf16.msrb.mxu2 %v4712_v13  ;;  %v4725_v13 = vld [vmem:[#allocation13 + $0x30] sm:$0xff] }
 0x25a   : > { %v2301_v23 = vmul.f32 0.4, %v2232_v37  ;;  %vm2269_vm6 = vcmp.ge.f32.partialorder %v2232_v37, 0.0 }
 0x25b   : > { %2528 = vmatmul.bf16.gmra.mxu0 %v2360_v39  ;;  %v2139_v43 = vadd.f32 %v2138_v24, %v2090_v41 }
 0x25c   : > { %v2333_v19 = vsel %vm2269_vm6, %v2232_v37, %v2301_v23 }
 0x25d   : > { %v2184_v53 = vpop.f32.mrf.mxu2  ;;  %v2233_v28 = vpop.f32.mrf.mxu3 }
 0x25e   : > { %v2185_v29 = vadd.f32 %v2184_v53, %v2136_v26 }
 0x260   : > { %v2234_v63 = vadd.f32 %v2233_v28, %v2185_v29  ;;  %v2091_v40 = vpop.f32.mrf.mxu0  ;;  %v2140_v2 = vpop.f32.mrf.mxu1 }
 0x261   : > { %v2092_v45 = vadd.f32 %v2091_v40, %v5939_v7 }
 0x262   : > { %vm2271_vm7 = vcmp.ge.f32.partialorder %v2234_v63, 0.0  ;;  %v2303_v42 = vmul.f32 0.4, %v2234_v63 }
 0x263   : > { %v2141_v49 = vadd.f32 %v2140_v2, %v2092_v45 }
 0x264   : > { %v2335_v25 = vsel %vm2271_vm7, %v2234_v63, %v2303_v42 }
 0x265   : > { %v2187_v11 = vpop.f32.mrf.mxu2  ;;  %v2359_v18 = vpack.c.bf16 %v2335_v25, %v2333_v19  ;;  %v2236_v39 = vpop.f32.mrf.mxu3 }
 0x266   : > { %v2188_v59 = vadd.f32 %v2187_v11, %v2139_v43 }
 0x267   : > { %2572 = vmatmul.bf16.gmra.mxu1 %v2359_v18 }
 0x268   : > { %v2094_v46 = vpop.f32.mrf.mxu0  ;;  %v2143_v47 = vpop.f32.mrf.mxu1  ;;  %v2237_v14 = vadd.f32 %v2236_v39, %v2188_v59 }
 0x269   : > { %v2095_v16 = vadd.f32 %v2094_v46, %v5939_v7 }
 0x26a   : > { %v2305_v34 = vmul.f32 0.4, %v2237_v14  ;;  %vm2273_vm8 = vcmp.ge.f32.partialorder %v2237_v14, 0.0 }
 0x26b   : > { %2533 = vmatmul.bf16.gmra.mxu0 %v2362_v4  ;;  %v2144_v58 = vadd.f32 %v2143_v47, %v2095_v16 }
 0x26c   : > { %v2337_v5 = vsel %vm2273_vm8, %v2237_v14, %v2305_v34 }
 0x26d   : > { %v2189_v50 = vpop.f32.mrf.mxu2  ;;  %v2238_v32 = vpop.f32.mrf.mxu3 }
 0x26e   : > { %v2190_v20 = vadd.f32 %v2189_v50, %v2141_v49  ;;  %v4711_v49 = vld [vmem:[#allocation11] sm:$0xff] }
 0x26f   : > { %2729 = vmatpush.bf16.msrb.mxu2 %v4711_v49 }
 0x270   : > { %v2239_v51 = vadd.f32 %v2238_v32, %v2190_v20  ;;  %v2096_v44 = vpop.f32.mrf.mxu0  ;;  %v2145_v35 = vpop.f32.mrf.mxu1 }
 0x271   : > { %v2097_v57 = vadd.f32 %v2096_v44, %v5939_v7 }
 0x272   : > { %vm2275_vm9 = vcmp.ge.f32.partialorder %v2239_v51, 0.0  ;;  %v2307_v48 = vmul.f32 0.4, %v2239_v51 }
 0x273   : > { %v2146_v60 = vadd.f32 %v2145_v35, %v2097_v57  ;;  %v4726_v57 = vld [vmem:[#allocation13 + $0x38] sm:$0xff] }
 0x274   : > { %v2339_v12 = vsel %vm2275_vm9, %v2239_v51, %v2307_v48  ;;  %2895 = vmatpush.bf16.msrb.mxu3 %v4726_v57 }
 0x275   : > { %v2192_v6 = vpop.f32.mrf.mxu2  ;;  %v2361_v9 = vpack.c.bf16 %v2339_v12, %v2337_v5  ;;  %v2241_v4 = vpop.f32.mrf.mxu3 }
 0x276   : > { %v2193_v22 = vadd.f32 %v2192_v6, %v2144_v58 }
 0x277   : > { %2577 = vmatmul.bf16.gmra.mxu1 %v2361_v9  ;;  %v5987_v9 = vld [vmem:[%s6239_s27] ss:$0 sm:$0xff]  ;;  %s6244_s27 = sld [smem:[#allocation40_spill]] }
 0x278   : > { %v2099_v61 = vpop.f32.mrf.mxu0  ;;  %v2242_v1 = vadd.f32 %v2241_v4, %v2193_v22  ;;  %v2148_v27 = vpop.f32.mrf.mxu1  ;;  %2896 = vmatpush.bf16.msrb.mxu3 %v4725_v13 }
 0x279   : > { %v2100_v55 = vadd.f32 %v2099_v61, %v5939_v7 }
 0x27a   : > { %v2309_v15 = vmul.f32 0.4, %v2242_v1  ;;  %vm2277_vm10 = vcmp.ge.f32.partialorder %v2242_v1, 0.0 }
 0x27b   : > { %2538 = vmatmul.bf16.gmra.mxu0 %v2364_v38  ;;  %v2149_v38 = vadd.f32 %v2148_v27, %v2100_v55 }
 0x27c   : > { %v2341_v17 = vsel %vm2277_vm10, %v2242_v1, %v2309_v15 }
 0x27d   : > { %v2194_v31 = vpop.f32.mrf.mxu2  ;;  %v2243_v10 = vpop.f32.mrf.mxu3 }
 0x27e   : > { %v2195_v8 = vadd.f32 %v2194_v31, %v2146_v60 }
 0x280   : > { %v2244_v56 = vadd.f32 %v2243_v10, %v2195_v8  ;;  %v2101_v21 = vpop.f32.mrf.mxu0  ;;  %v2150_v37 = vpop.f32.mrf.mxu1 }
 0x281   : > { %v2102_v53 = vadd.f32 %v2101_v21, %v5939_v7 }
 0x282   : > { %vm2279_vm11 = vcmp.ge.f32.partialorder %v2244_v56, 0.0  ;;  %v2311_v3 = vmul.f32 0.4, %v2244_v56 }
 0x283   : > { %v2151_v23 = vadd.f32 %v2150_v37, %v2102_v53 }
 0x284   : > { %v2343_v24 = vsel %vm2279_vm11, %v2244_v56, %v2311_v3 }
 0x285   : > { %v2197_v62 = vpop.f32.mrf.mxu2  ;;  %v2363_v30 = vpack.c.bf16 %v2343_v24, %v2341_v17  ;;  %v2246_v26 = vpop.f32.mrf.mxu3 }
 0x286   : > { %v2198_v29 = vadd.f32 %v2197_v62, %v2149_v38 }
 0x287   : > { %2582 = vmatmul.bf16.gmra.mxu1 %v2363_v30 }
 0x288   : > { %v2104_v28 = vpop.f32.mrf.mxu0  ;;  %v2247_v63 = vadd.f32 %v2246_v26, %v2198_v29  ;;  %v2153_v25 = vpop.f32.mrf.mxu1 }
 0x289   : > { %v2105_v11 = vadd.f32 %v2104_v28, %v5939_v7 }
 0x28a   : > { %v2313_v42 = vmul.f32 0.4, %v2247_v63  ;;  %vm2281_vm12 = vcmp.ge.f32.partialorder %v2247_v63, 0.0 }
 0x28b   : > { %2543 = vmatmul.bf16.gmra.mxu0 %v2366_v33  ;;  %v2154_v52 = vadd.f32 %v2153_v25, %v2105_v11 }
 0x28c   : > { %v2345_v43 = vsel %vm2281_vm12, %v2247_v63, %v2313_v42 }
 0x28d   : > { %v2199_v40 = vpop.f32.mrf.mxu2  ;;  %v2248_v41 = vpop.f32.mrf.mxu3 }
 0x28e   : > { %v2200_v2 = vadd.f32 %v2199_v40, %v2151_v23  ;;  %v4724_v40 = vld [vmem:[#allocation13 + $0x28] sm:$0xff] }
 0x28f   : > { %2897 = vmatpush.bf16.msrb.mxu3 %v4724_v40 }
 0x290   : > { %v2249_v54 = vadd.f32 %v2248_v41, %v2200_v2  ;;  %v2106_v19 = vpop.f32.mrf.mxu0  ;;  %v2155_v14 = vpop.f32.mrf.mxu1 }
 0x291   : > { %v2107_v33 = vadd.f32 %v2106_v19, %v5939_v7 }
 0x292   : > { %vm2283_vm13 = vcmp.ge.f32.partialorder %v2249_v54, 0.0  ;;  %v2315_v18 = vmul.f32 0.4, %v2249_v54 }
 0x293   : > { %v2156_v50 = vadd.f32 %v2155_v14, %v2107_v33 }
 0x294   : > { %v2347_v39 = vsel %vm2283_vm13, %v2249_v54, %v2315_v18 }
 0x295   : > { %v2202_v45 = vpop.f32.mrf.mxu2  ;;  %v2365_v59 = vpack.c.bf16 %v2347_v39, %v2345_v43  ;;  %v2251_v36 = vpop.f32.mrf.mxu3 }
 0x296   : > { %v2203_v46 = vadd.f32 %v2202_v45, %v2154_v52 }
 0x297   : > { %2587 = vmatmul.bf16.gmra.mxu1 %v2365_v59 }
 0x298   : > { %v2509_v47 = vpop.f32.mrf.mxu0  ;;  %v2252_v20 = vadd.f32 %v2251_v36, %v2203_v46  ;;  %v4723_v36 = vld [vmem:[#allocation13 + $0x20] sm:$0xff] }
 0x299   : > { %v2510_v4 = vadd.f32 %v5987_v9, %v2509_v47  ;;  %2898 = vmatpush.bf16.msrb.mxu3 %v4723_v36 }
 0x29a   : > { %v2317_v44 = vmul.f32 0.4, %v2252_v20  ;;  %vm2285_vm14 = vcmp.ge.f32.partialorder %v2252_v20, 0.0 }
 0x29c   : > { %v2349_v0 = vsel %vm2285_vm14, %v2252_v20, %v2317_v44 }
 0x29d   : > { %v2204_v32 = vpop.f32.mrf.mxu2  ;;  %v2253_v51 = vpop.f32.mrf.mxu3 }
 0x29e   : > { %v2205_v34 = vadd.f32 %v2204_v32, %v2156_v50 }
 0x2a0   : > { %v2254_v16 = vadd.f32 %v2253_v51, %v2205_v34  ;;  %v2511_v48 = vpop.f32.mrf.mxu0 }
 0x2a1   : > { %v2512_v60 = vadd.f32 %v5987_v9, %v2511_v48 }
 0x2a2   : > { %vm2287_vm15 = vcmp.ge.f32.partialorder %v2254_v16, 0.0  ;;  %v2319_v35 = vmul.f32 0.4, %v2254_v16 }
 0x2a4   : > { %v2351_v5 = vsel %vm2287_vm15, %v2254_v16, %v2319_v35  ;;  %v4722_v35 = vld [vmem:[#allocation13 + $0x18] sm:$0xff] }
 0x2a5   : > { %v2367_v12 = vpack.c.bf16 %v2351_v5, %v2349_v0  ;;  %2899 = vmatpush.bf16.msrb.mxu3 %v4722_v35 }
 0x2a7   : > { %2592 = vmatmul.bf16.gmra.mxu1 %v2367_v12 }
 0x2a8   : > { %v2514_v7 = vpop.f32.mrf.mxu0 }
 0x2a9   : > { %v2515_v3 = vadd.f32 %v5987_v9, %v2514_v7 }
 0x2b0   : > { %v2516_v6 = vpop.f32.mrf.mxu0 }
 0x2b1   : > { %v2517_v24 = vadd.f32 %v5987_v9, %v2516_v6 }
 0x2b4   : > { %v2558_v58 = vpop.f32.mrf.mxu1 }
 0x2b5   : > { %v2559_v22 = vadd.f32 %v2558_v58, %v2510_v4 }
 0x2b7   : > { %v2614_v27 = vmul.f32 0.4, %v2559_v22  ;;  %vm2598_vm0 = vcmp.ge.f32.partialorder %v2559_v22, 0.0 }
 0x2b8   : > { %v2519_v61 = vpop.f32.mrf.mxu0 }
 0x2b9   : > { %v2630_v10 = vsel %vm2598_vm0, %v2559_v22, %v2614_v27  ;;  %v2520_v63 = vadd.f32 %v5987_v9, %v2519_v61  ;;  %v4721_v27 = vld [vmem:[#allocation13 + $0x10] sm:$0xff] }
 0x2ba   : > { %2900 = vmatpush.bf16.msrb.mxu3 %v4721_v27 }
 0x2bc   : > { %v2560_v1 = vpop.f32.mrf.mxu1 }
 0x2bd   : > { %v2561_v31 = vadd.f32 %v2560_v1, %v2512_v60 }
 0x2bf   : > { %vm2599_vm1 = vcmp.ge.f32.partialorder %v2561_v31, 0.0  ;;  %v2615_v8 = vmul.f32 0.4, %v2561_v31 }
 0x2c0   : > { %v2521_v21 = vpop.f32.mrf.mxu0 }
 0x2c1   : > { %v2631_v15 = vsel %vm2599_vm1, %v2561_v31, %v2615_v8  ;;  %v2522_v42 = vadd.f32 %v5987_v9, %v2521_v21 }
 0x2c2   : > { %v2646_v56 = vpack.c.bf16 %v2631_v15, %v2630_v10 }
 0x2c4   : > { %v2563_v55 = vpop.f32.mrf.mxu1  ;;  %2730 = vmatmul.bf16.vlgmr.msrb.gmra.mxu2 %v2646_v56 }
 0x2c5   : > { %v2564_v17 = vadd.f32 %v2563_v55, %v2515_v3 }
 0x2c7   : > { %v2616_v30 = vmul.f32 0.4, %v2564_v17  ;;  %vm2600_vm2 = vcmp.ge.f32.partialorder %v2564_v17, 0.0 }
 0x2c8   : > { %v2524_v26 = vpop.f32.mrf.mxu0 }
 0x2c9   : > { %v2632_v53 = vsel %vm2600_vm2, %v2564_v17, %v2616_v30  ;;  %v2525_v52 = vadd.f32 %v5987_v9, %v2524_v26  ;;  %v4720_v30 = vld [vmem:[#allocation13 + $0x8] sm:$0xff] }
 0x2ca   : > { %2901 = vmatpush.bf16.msrb.mxu3 %v4720_v30 }
 0x2cc   : > { %v2565_v62 = vpop.f32.mrf.mxu1 }
 0x2cd   : > { %v2566_v38 = vadd.f32 %v2565_v62, %v2517_v24 }
 0x2cf   : > { %vm2601_vm3 = vcmp.ge.f32.partialorder %v2566_v38, 0.0  ;;  %v2617_v37 = vmul.f32 0.4, %v2566_v38 }
 0x2d0   : > { %v2526_v2 = vpop.f32.mrf.mxu0 }
 0x2d1   : > { %v2633_v29 = vsel %vm2601_vm3, %v2566_v38, %v2617_v37  ;;  %v2527_v46 = vadd.f32 %v5987_v9, %v2526_v2 }
 0x2d2   : > { %v2647_v28 = vpack.c.bf16 %v2633_v29, %v2632_v53 }
 0x2d4   : > { %v2568_v23 = vpop.f32.mrf.mxu1  ;;  %2735 = vmatmul.bf16.gmra.mxu2 %v2647_v28 }
 0x2d5   : > { %v2569_v41 = vadd.f32 %v2568_v23, %v2520_v63 }
 0x2d7   : > { %v2618_v19 = vmul.f32 0.4, %v2569_v41  ;;  %vm2602_vm4 = vcmp.ge.f32.partialorder %v2569_v41, 0.0 }
 0x2d8   : > { %v2529_v39 = vpop.f32.mrf.mxu0 }
 0x2d9   : > { %v2634_v18 = vsel %vm2602_vm4, %v2569_v41, %v2618_v19  ;;  %v2530_v48 = vadd.f32 %v5987_v9, %v2529_v39 }
 0x2dc   : > { %v2570_v54 = vpop.f32.mrf.mxu1 }
 0x2dd   : > { %v2571_v25 = vadd.f32 %v2570_v54, %v2522_v42 }
 0x2df   : > { %vm2603_vm5 = vcmp.ge.f32.partialorder %v2571_v25, 0.0  ;;  %v2619_v11 = vmul.f32 0.4, %v2571_v25 }
 0x2e0   : > { %v2531_v47 = vpop.f32.mrf.mxu0 }
 0x2e1   : > { %v2635_v43 = vsel %vm2603_vm5, %v2571_v25, %v2619_v11  ;;  %v2532_v5 = vadd.f32 %v5987_v9, %v2531_v47  ;;  %v6008_v47 = vld [vmem:[%s6240_s16] ss:$0 sm:$0xff]  ;;  %s6245_s16 = sld [smem:[#allocation41_spill]] }
 0x2e2   : > { %v2648_v45 = vpack.c.bf16 %v2635_v43, %v2634_v18  ;;  %v4719_v43 = vld [vmem:[#allocation13] sm:$0xff] }
 0x2e3   : > { %2902 = vmatpush.bf16.msrb.mxu3 %v4719_v43 }
 0x2e4   : > { %v2573_v59 = vpop.f32.mrf.mxu1  ;;  %2740 = vmatmul.bf16.gmra.mxu2 %v2648_v45 }
 0x2e5   : > { %v2574_v33 = vadd.f32 %v2573_v59, %v2525_v52 }
 0x2e7   : > { %v2620_v14 = vmul.f32 0.4, %v2574_v33  ;;  %vm2604_vm6 = vcmp.ge.f32.partialorder %v2574_v33, 0.0 }
 0x2e8   : > { %v2534_v16 = vpop.f32.mrf.mxu0 }
 0x2e9   : > { %v2636_v32 = vsel %vm2604_vm6, %v2574_v33, %v2620_v14  ;;  %v2535_v1 = vadd.f32 %v5987_v9, %v2534_v16 }
 0x2ec   : > { %v2575_v49 = vpop.f32.mrf.mxu1 }
 0x2ed   : > { %v2576_v50 = vadd.f32 %v2575_v49, %v2527_v46  ;;  %v4734_v49 = vld [vmem:[#allocation14 + $0x38] sm:$0xff] }
 0x2ee   : > { %3068 = vmatpush.bf16.msra.mxu0 %v4734_v49 }
 0x2ef   : > { %vm2605_vm7 = vcmp.ge.f32.partialorder %v2576_v50, 0.0  ;;  %v2621_v20 = vmul.f32 0.4, %v2576_v50 }
 0x2f0   : > { %v2536_v4 = vpop.f32.mrf.mxu0 }
 0x2f1   : > { %v2637_v34 = vsel %vm2605_vm7, %v2576_v50, %v2621_v20  ;;  %v2537_v10 = vadd.f32 %v5987_v9, %v2536_v4 }
 0x2f2   : > { %v2649_v51 = vpack.c.bf16 %v2637_v34, %v2636_v32 }
 0x2f4   : > { %v2578_v44 = vpop.f32.mrf.mxu1  ;;  %2745 = vmatmul.bf16.gmra.mxu2 %v2649_v51 }
 0x2f5   : > { %v2579_v0 = vadd.f32 %v2578_v44, %v2530_v48  ;;  %v4733_v48 = vld [vmem:[#allocation14 + $0x30] sm:$0xff] }
 0x2f6   : > { %3069 = vmatpush.bf16.msra.mxu0 %v4733_v48 }
 0x2f7   : > { %v2622_v7 = vmul.f32 0.4, %v2579_v0  ;;  %vm2606_vm8 = vcmp.ge.f32.partialorder %v2579_v0, 0.0 }
 0x2f8   : > { %v2539_v8 = vpop.f32.mrf.mxu0 }
 0x2f9   : > { %v2638_v57 = vsel %vm2606_vm8, %v2579_v0, %v2622_v7  ;;  %v2540_v38 = vadd.f32 %v5987_v9, %v2539_v8 }
 0x2fc   : > { %v2580_v12 = vpop.f32.mrf.mxu1 }
 0x2fd   : > { %v2581_v6 = vadd.f32 %v2580_v12, %v2532_v5 }
 0x2ff   : > { %vm2607_vm9 = vcmp.ge.f32.partialorder %v2581_v6, 0.0  ;;  %v2623_v58 = vmul.f32 0.4, %v2581_v6 }
 0x300   : > { %v2541_v24 = vpop.f32.mrf.mxu0 }
 0x301   : > { %v2639_v22 = vsel %vm2607_vm9, %v2581_v6, %v2623_v58  ;;  %v2542_v37 = vadd.f32 %v5987_v9, %v2541_v24 }
 0x302   : > { %v2650_v61 = vpack.c.bf16 %v2639_v22, %v2638_v57  ;;  %v4732_v22 = vld [vmem:[#allocation14 + $0x28] sm:$0xff] }
 0x303   : > { %3070 = vmatpush.bf16.msra.mxu0 %v4732_v22 }
 0x304   : > { %v2583_v60 = vpop.f32.mrf.mxu1  ;;  %2750 = vmatmul.bf16.gmra.mxu2 %v2650_v61 }
 0x305   : > { %v2584_v31 = vadd.f32 %v2583_v60, %v2535_v1 }
 0x307   : > { %v2624_v56 = vmul.f32 0.4, %v2584_v31  ;;  %vm2608_vm10 = vcmp.ge.f32.partialorder %v2584_v31, 0.0 }
 0x308   : > { %v2544_v23 = vpop.f32.mrf.mxu0 }
 0x309   : > { %v2640_v3 = vsel %vm2608_vm10, %v2584_v31, %v2624_v56  ;;  %v2545_v54 = vadd.f32 %v5987_v9, %v2544_v23 }
 0x30c   : > { %v2585_v15 = vpop.f32.mrf.mxu1 }
 0x30d   : > { %v2586_v21 = vadd.f32 %v2585_v15, %v2537_v10 }
 0x30f   : > { %vm2609_vm11 = vcmp.ge.f32.partialorder %v2586_v21, 0.0  ;;  %v2625_v55 = vmul.f32 0.4, %v2586_v21 }
 0x310   : > { %v2546_v19 = vpop.f32.mrf.mxu0 }
 0x311   : > { %v2641_v13 = vsel %vm2609_vm11, %v2586_v21, %v2625_v55  ;;  %v2547_v11 = vadd.f32 %v5987_v9, %v2546_v19  ;;  %v4731_v21 = vld [vmem:[#allocation14 + $0x20] sm:$0xff] }
 0x312   : > { %v2651_v17 = vpack.c.bf16 %v2641_v13, %v2640_v3  ;;  %3071 = vmatpush.bf16.msra.mxu0 %v4731_v21 }
 0x314   : > { %v2588_v62 = vpop.f32.mrf.mxu1  ;;  %2755 = vmatmul.bf16.gmra.mxu2 %v2651_v17 }
 0x315   : > { %v2589_v26 = vadd.f32 %v2588_v62, %v2540_v38 }
 0x317   : > { %v2626_v29 = vmul.f32 0.4, %v2589_v26  ;;  %vm2610_vm12 = vcmp.ge.f32.partialorder %v2589_v26, 0.0 }
 0x319   : > { %v2642_v40 = vsel %vm2610_vm12, %v2589_v26, %v2626_v29 }
 0x31c   : > { %v2590_v53 = vpop.f32.mrf.mxu1 }
 0x31d   : > { %v2591_v28 = vadd.f32 %v2590_v53, %v2542_v37  ;;  %v4730_v37 = vld [vmem:[#allocation14 + $0x18] sm:$0xff] }
 0x31e   : > { %3072 = vmatpush.bf16.msra.mxu0 %v4730_v37 }
 0x31f   : > { %vm2611_vm13 = vcmp.ge.f32.partialorder %v2591_v28, 0.0  ;;  %v2627_v63 = vmul.f32 0.4, %v2591_v28 }
 0x321   : > { %v2643_v2 = vsel %vm2611_vm13, %v2591_v28, %v2627_v63 }
 0x322   : > { %v2652_v41 = vpack.c.bf16 %v2643_v2, %v2642_v40 }
 0x324   : > { %v2593_v42 = vpop.f32.mrf.mxu1  ;;  %2760 = vmatmul.bf16.gmra.mxu2 %v2652_v41 }
 0x325   : > { %v2594_v25 = vadd.f32 %v2593_v42, %v2545_v54  ;;  %v4729_v54 = vld [vmem:[#allocation14 + $0x10] sm:$0xff] }
 0x326   : > { %3073 = vmatpush.bf16.msra.mxu0 %v4729_v54 }
 0x327   : > { %v2628_v39 = vmul.f32 0.4, %v2594_v25  ;;  %vm2612_vm14 = vcmp.ge.f32.partialorder %v2594_v25, 0.0 }
 0x329   : > { %v2644_v52 = vsel %vm2612_vm14, %v2594_v25, %v2628_v39 }
 0x32c   : > { %v2595_v18 = vpop.f32.mrf.mxu1 }
 0x32d   : > { %v2596_v45 = vadd.f32 %v2595_v18, %v2547_v11 }
 0x32f   : > { %vm2613_vm15 = vcmp.ge.f32.partialorder %v2596_v45, 0.0  ;;  %v2629_v59 = vmul.f32 0.4, %v2596_v45 }
 0x331   : > { %v2645_v36 = vsel %vm2613_vm15, %v2596_v45, %v2629_v59 }
 0x332   : > { %v2653_v33 = vpack.c.bf16 %v2645_v36, %v2644_v52  ;;  %v4728_v36 = vld [vmem:[#allocation14 + $0x8] sm:$0xff] }
 0x333   : > { %3074 = vmatpush.bf16.msra.mxu0 %v4728_v36 }
 0x334   : > { %2765 = vmatmul.bf16.gmra.mxu2 %v2653_v33 }
 0x347   : > { %v2731_v46 = vpop.f32.mrf.mxu2 }
 0x348   : > { %v2732_v9 = vadd.f32 %v6008_v47, %v2731_v46 }
 0x34a   : > { %v2787_v50 = vmul.f32 0.4, %v2732_v9  ;;  %vm2771_vm0 = vcmp.ge.f32.partialorder %v2732_v9, 0.0 }
 0x34c   : > { %v2803_v34 = vsel %vm2771_vm0, %v2732_v9, %v2787_v50 }
 0x34f   : > { %v2733_v14 = vpop.f32.mrf.mxu2 }
 0x350   : > { %v2734_v20 = vadd.f32 %v6008_v47, %v2733_v14 }
 0x352   : > { %vm2772_vm1 = vcmp.ge.f32.partialorder %v2734_v20, 0.0  ;;  %v2788_v32 = vmul.f32 0.4, %v2734_v20 }
 0x354   : > { %v2804_v51 = vsel %vm2772_vm1, %v2734_v20, %v2788_v32 }
 0x355   : > { %v2819_v44 = vpack.c.bf16 %v2804_v51, %v2803_v34 }
 0x357   : > { %v2736_v16 = vpop.f32.mrf.mxu2  ;;  %2903 = vmatmul.bf16.vlgmr.msrb.gmra.mxu3 %v2819_v44 }
 0x358   : > { %v2737_v35 = vadd.f32 %v6008_v47, %v2736_v16  ;;  %v4727_v16 = vld [vmem:[#allocation14] sm:$0xff] }
 0x359   : > { %3075 = vmatpush.bf16.msra.mxu0 %v4727_v16 }
 0x35a   : > { %v2789_v5 = vmul.f32 0.4, %v2737_v35  ;;  %vm2773_vm2 = vcmp.ge.f32.partialorder %v2737_v35, 0.0 }
 0x35c   : > { %v2805_v6 = vsel %vm2773_vm2, %v2737_v35, %v2789_v5 }
 0x35f   : > { %v2738_v0 = vpop.f32.mrf.mxu2 }
 0x360   : > { %v2739_v12 = vadd.f32 %v6008_v47, %v2738_v0 }
 0x362   : > { %vm2774_vm3 = vcmp.ge.f32.partialorder %v2739_v12, 0.0  ;;  %v2790_v7 = vmul.f32 0.4, %v2739_v12 }
 0x364   : > { %v2806_v58 = vsel %vm2774_vm3, %v2739_v12, %v2790_v7 }
 0x365   : > { %v2820_v4 = vpack.c.bf16 %v2806_v58, %v2805_v6  ;;  %v4742_v6 = vld [vmem:[#allocation16 + $0x38] sm:$0xff] }
 0x366   : > { %3241 = vmatpush.bf16.msra.mxu1 %v4742_v6 }
 0x367   : > { %v2741_v57 = vpop.f32.mrf.mxu2  ;;  %2908 = vmatmul.bf16.gmra.mxu3 %v2820_v4  ;;  %v6029_v4 = vld [vmem:[%s6241_s29] ss:$0 sm:$0xff]  ;;  %s4759_s29 = sshll.u32 %s5482_s24, 7  ;;  %s3701_s24 = scalar_lea.sflag [#allocation4], %s5630_s10 }
 0x368   : > { %v2742_v61 = vadd.f32 %v6008_v47, %v2741_v57 }
 0x36a   : > { %v2791_v1 = vmul.f32 0.4, %v2742_v61  ;;  %vm2775_vm4 = vcmp.ge.f32.partialorder %v2742_v61, 0.0 }
 0x36c   : > { %v2807_v8 = vsel %vm2775_vm4, %v2742_v61, %v2791_v1  ;;  %v4741_v1 = vld [vmem:[#allocation16 + $0x30] sm:$0xff] }
 0x36d   : > { %3242 = vmatpush.bf16.msra.mxu1 %v4741_v1 }
 0x36f   : > { %v2743_v60 = vpop.f32.mrf.mxu2 }
 0x370   : > { %v2744_v27 = vadd.f32 %v6008_v47, %v2743_v60 }
 0x372   : > { %vm2776_vm5 = vcmp.ge.f32.partialorder %v2744_v27, 0.0  ;;  %v2792_v31 = vmul.f32 0.4, %v2744_v27 }
 0x374   : > { %v2808_v10 = vsel %vm2776_vm5, %v2744_v27, %v2792_v31 }
 0x375   : > { %v2821_v15 = vpack.c.bf16 %v2808_v10, %v2807_v8 }
 0x377   : > { %v2746_v56 = vpop.f32.mrf.mxu2  ;;  %2913 = vmatmul.bf16.gmra.mxu3 %v2821_v15 }
 0x378   : > { %v2747_v55 = vadd.f32 %v6008_v47, %v2746_v56 }
 0x37a   : > { %v2793_v13 = vmul.f32 0.4, %v2747_v55  ;;  %vm2777_vm6 = vcmp.ge.f32.partialorder %v2747_v55, 0.0 }
 0x37c   : > { %v2809_v62 = vsel %vm2777_vm6, %v2747_v55, %v2793_v13  ;;  %v4740_v13 = vld [vmem:[#allocation16 + $0x28] sm:$0xff] }
 0x37d   : > { %3243 = vmatpush.bf16.msra.mxu1 %v4740_v13  ;;  %v4750_v13 = vld [vmem:[#allocation17 + $0x38] sm:$0xff] }
 0x37e   : > { %3414 = vmatpush.bf16.msra.mxu2 %v4750_v13 }
 0x37f   : > { %v2748_v3 = vpop.f32.mrf.mxu2 }
 0x380   : > { %v2749_v17 = vadd.f32 %v6008_v47, %v2748_v3 }
 0x382   : > { %vm2778_vm7 = vcmp.ge.f32.partialorder %v2749_v17, 0.0  ;;  %v2794_v24 = vmul.f32 0.4, %v2749_v17 }
 0x384   : > { %v2810_v30 = vsel %vm2778_vm7, %v2749_v17, %v2794_v24 }
 0x385   : > { %v2822_v38 = vpack.c.bf16 %v2810_v30, %v2809_v62 }
 0x387   : > { %v2751_v26 = vpop.f32.mrf.mxu2  ;;  %2918 = vmatmul.bf16.gmra.mxu3 %v2822_v38 }
 0x388   : > { %v2752_v53 = vadd.f32 %v6008_v47, %v2751_v26 }
 0x38a   : > { %v2795_v28 = vmul.f32 0.4, %v2752_v53  ;;  %vm2779_vm8 = vcmp.ge.f32.partialorder %v2752_v53, 0.0 }
 0x38c   : > { %v2811_v40 = vsel %vm2779_vm8, %v2752_v53, %v2795_v28  ;;  %v4739_v28 = vld [vmem:[#allocation16 + $0x20] sm:$0xff] }
 0x38d   : > { %3244 = vmatpush.bf16.msra.mxu1 %v4739_v28 }
 0x38f   : > { %v2753_v29 = vpop.f32.mrf.mxu2 }
 0x390   : > { %v2754_v23 = vadd.f32 %v6008_v47, %v2753_v29 }
 0x392   : > { %vm2780_vm9 = vcmp.ge.f32.partialorder %v2754_v23, 0.0  ;;  %v2796_v63 = vmul.f32 0.4, %v2754_v23 }
 0x394   : > { %v2812_v2 = vsel %vm2780_vm9, %v2754_v23, %v2796_v63 }
 0x395   : > { %v2823_v41 = vpack.c.bf16 %v2812_v2, %v2811_v40 }
 0x397   : > { %v2756_v42 = vpop.f32.mrf.mxu2  ;;  %2923 = vmatmul.bf16.gmra.mxu3 %v2823_v41 }
 0x398   : > { %v2757_v19 = vadd.f32 %v6008_v47, %v2756_v42 }
 0x39a   : > { %v2797_v11 = vmul.f32 0.4, %v2757_v19  ;;  %vm2781_vm10 = vcmp.ge.f32.partialorder %v2757_v19, 0.0 }
 0x39c   : > { %v2813_v39 = vsel %vm2781_vm10, %v2757_v19, %v2797_v11  ;;  %v4738_v11 = vld [vmem:[#allocation16 + $0x18] sm:$0xff] }
 0x39d   : > { %3245 = vmatpush.bf16.msra.mxu1 %v4738_v11 }
 0x39f   : > { %v2758_v25 = vpop.f32.mrf.mxu2 }
 0x3a0   : > { %v2759_v18 = vadd.f32 %v6008_v47, %v2758_v25 }
 0x3a2   : > { %vm2782_vm11 = vcmp.ge.f32.partialorder %v2759_v18, 0.0  ;;  %v2798_v43 = vmul.f32 0.4, %v2759_v18 }
 0x3a4   : > { %v2814_v45 = vsel %vm2782_vm11, %v2759_v18, %v2798_v43 }
 0x3a5   : > { %v2824_v59 = vpack.c.bf16 %v2814_v45, %v2813_v39 }
 0x3a7   : > { %v2761_v52 = vpop.f32.mrf.mxu2  ;;  %2928 = vmatmul.bf16.gmra.mxu3 %v2824_v59 }
 0x3a8   : > { %v2762_v33 = vadd.f32 %v6008_v47, %v2761_v52 }
 0x3aa   : > { %v2799_v49 = vmul.f32 0.4, %v2762_v33  ;;  %vm2783_vm12 = vcmp.ge.f32.partialorder %v2762_v33, 0.0 }
 0x3ac   : > { %v2815_v50 = vsel %vm2783_vm12, %v2762_v33, %v2799_v49  ;;  %v4737_v49 = vld [vmem:[#allocation16 + $0x10] sm:$0xff] }
 0x3ad   : > { %3246 = vmatpush.bf16.msra.mxu1 %v4737_v49 }
 0x3af   : > { %v2763_v46 = vpop.f32.mrf.mxu2 }
 0x3b0   : > { %v2764_v9 = vadd.f32 %v6008_v47, %v2763_v46 }
 0x3b2   : > { %vm2784_vm13 = vcmp.ge.f32.partialorder %v2764_v9, 0.0  ;;  %v2800_v14 = vmul.f32 0.4, %v2764_v9 }
 0x3b4   : > { %v2816_v20 = vsel %vm2784_vm13, %v2764_v9, %v2800_v14 }
 0x3b5   : > { %v2825_v32 = vpack.c.bf16 %v2816_v20, %v2815_v50 }
 0x3b7   : > { %v2766_v34 = vpop.f32.mrf.mxu2  ;;  %2933 = vmatmul.bf16.gmra.mxu3 %v2825_v32 }
 0x3b8   : > { %v2767_v51 = vadd.f32 %v6008_v47, %v2766_v34 }
 0x3ba   : > { %v2801_v48 = vmul.f32 0.4, %v2767_v51  ;;  %vm2785_vm14 = vcmp.ge.f32.partialorder %v2767_v51, 0.0 }
 0x3bc   : > { %v2817_v5 = vsel %vm2785_vm14, %v2767_v51, %v2801_v48  ;;  %v4736_v48 = vld [vmem:[#allocation16 + $0x8] sm:$0xff] }
 0x3bd   : > { %3247 = vmatpush.bf16.msra.mxu1 %v4736_v48 }
 0x3bf   : > { %v2768_v44 = vpop.f32.mrf.mxu2 }
 0x3c0   : > { %v2769_v35 = vadd.f32 %v6008_v47, %v2768_v44 }
 0x3c2   : > { %vm2786_vm15 = vcmp.ge.f32.partialorder %v2769_v35, 0.0  ;;  %v2802_v0 = vmul.f32 0.4, %v2769_v35 }
 0x3c4   : > { %v2818_v12 = vsel %vm2786_vm15, %v2769_v35, %v2802_v0 }
 0x3c5   : > { %v2826_v7 = vpack.c.bf16 %v2818_v12, %v2817_v5 }
 0x3c7   : > { %2938 = vmatmul.bf16.gmra.mxu3 %v2826_v7 }
 0x3da   : > { %v2904_v58 = vpop.f32.mrf.mxu3 }
 0x3db   : > { %v2905_v57 = vadd.f32 %v6029_v4, %v2904_v58 }
 0x3dd   : > { %v2960_v47 = vmul.f32 0.4, %v2905_v57  ;;  %vm2944_vm0 = vcmp.ge.f32.partialorder %v2905_v57, 0.0 }
 0x3df   : > { %v2976_v27 = vsel %vm2944_vm0, %v2905_v57, %v2960_v47 }
 0x3e2   : > { %v2906_v22 = vpop.f32.mrf.mxu3 }
 0x3e3   : > { %v2907_v61 = vadd.f32 %v6029_v4, %v2906_v22 }
 0x3e5   : > { %vm2945_vm1 = vcmp.ge.f32.partialorder %v2907_v61, 0.0  ;;  %v2961_v60 = vmul.f32 0.4, %v2907_v61 }
 0x3e7   : > { %v2977_v31 = vsel %vm2945_vm1, %v2907_v61, %v2961_v60 }
 0x3e8   : > { %v2992_v8 = vpack.c.bf16 %v2977_v31, %v2976_v27  ;;  %v4735_v27 = vld [vmem:[#allocation16] sm:$0xff] }
 0x3e9   : > { %3248 = vmatpush.bf16.msra.mxu1 %v4735_v27 }
 0x3ea   : > { %v2909_v10 = vpop.f32.mrf.mxu3  ;;  %3076 = vmatmul.bf16.vlgmr.msra.gmra.mxu0 %v2992_v8 }
 0x3eb   : > { %v2910_v15 = vadd.f32 %v6029_v4, %v2909_v10 }
 0x3ed   : > { %v2962_v21 = vmul.f32 0.4, %v2910_v15  ;;  %vm2946_vm2 = vcmp.ge.f32.partialorder %v2910_v15, 0.0 }
 0x3ef   : > { %v2978_v17 = vsel %vm2946_vm2, %v2910_v15, %v2962_v21 }
 0x3f2   : > { %v2911_v56 = vpop.f32.mrf.mxu3 }
 0x3f3   : > { %v2912_v55 = vadd.f32 %v6029_v4, %v2911_v56 }
 0x3f5   : > { %vm2947_vm3 = vcmp.ge.f32.partialorder %v2912_v55, 0.0  ;;  %v2963_v3 = vmul.f32 0.4, %v2912_v55 }
 0x3f7   : > { %v2979_v24 = vsel %vm2947_vm3, %v2912_v55, %v2963_v3 }
 0x3f8   : > { %v2993_v62 = vpack.c.bf16 %v2979_v24, %v2978_v17  ;;  %v6050_v24 = vld [vmem:[%s6242_s9] ss:$0 sm:$0xff]  ;;  %s6246_s9 = sld [smem:[#allocation42_spill]] }
 0x3fa   : > { %v2914_v30 = vpop.f32.mrf.mxu3  ;;  %3081 = vmatmul.bf16.gmra.mxu0 %v2993_v62 }
 0x3fb   : > { %v2915_v38 = vadd.f32 %v6029_v4, %v2914_v30 }
 0x3fd   : > { %v2964_v37 = vmul.f32 0.4, %v2915_v38  ;;  %vm2948_vm4 = vcmp.ge.f32.partialorder %v2915_v38, 0.0 }
 0x3fe   : > { %s3712_s19 = scalar_lea.hbm %s6246_s9, %s4759_s29  ;;  %s5272_s6 = scalar_lea.hbm %s6246_s9, 256 }
 0x3ff   : > { %v2980_v23 = vsel %vm2948_vm4, %v2915_v38, %v2964_v37  ;;  %v4749_v37 = vld [vmem:[#allocation17 + $0x30] sm:$0xff] }
 0x400   : > { %3415 = vmatpush.bf16.msra.mxu2 %v4749_v37 }
 0x402   : > { %v2916_v26 = vpop.f32.mrf.mxu3 }
 0x403   : > { %v2917_v53 = vadd.f32 %v6029_v4, %v2916_v26 }
 0x405   : > { %vm2949_vm5 = vcmp.ge.f32.partialorder %v2917_v53, 0.0  ;;  %v2965_v29 = vmul.f32 0.4, %v2917_v53 }
 0x407   : > { %v2981_v63 = vsel %vm2949_vm5, %v2917_v53, %v2965_v29 }
 0x408   : > { %v2994_v40 = vpack.c.bf16 %v2981_v63, %v2980_v23 }
 0x40a   : > { %v2919_v2 = vpop.f32.mrf.mxu3  ;;  %3086 = vmatmul.bf16.gmra.mxu0 %v2994_v40 }
 0x40b   : > { %v2920_v41 = vadd.f32 %v6029_v4, %v2919_v2 }
 0x40d   : > { %v2966_v54 = vmul.f32 0.4, %v2920_v41  ;;  %vm2950_vm6 = vcmp.ge.f32.partialorder %v2920_v41, 0.0 }
 0x40f   : > { %v2982_v18 = vsel %vm2950_vm6, %v2920_v41, %v2966_v54  ;;  %v4748_v54 = vld [vmem:[#allocation17 + $0x28] sm:$0xff] }
 0x410   : > { %3416 = vmatpush.bf16.msra.mxu2 %v4748_v54 }
 0x412   : > { %v2921_v42 = vpop.f32.mrf.mxu3 }
 0x413   : > { %v2922_v19 = vadd.f32 %v6029_v4, %v2921_v42 }
 0x415   : > { %vm2951_vm7 = vcmp.ge.f32.partialorder %v2922_v19, 0.0  ;;  %v2967_v25 = vmul.f32 0.4, %v2922_v19 }
 0x417   : > { %v2983_v43 = vsel %vm2951_vm7, %v2922_v19, %v2967_v25 }
 0x418   : > { %v2995_v39 = vpack.c.bf16 %v2983_v43, %v2982_v18 }
 0x41a   : > { %v2924_v45 = vpop.f32.mrf.mxu3  ;;  %3091 = vmatmul.bf16.gmra.mxu0 %v2995_v39 }
 0x41b   : > { %v2925_v59 = vadd.f32 %v6029_v4, %v2924_v45 }
 0x41d   : > { %v2968_v36 = vmul.f32 0.4, %v2925_v59  ;;  %vm2952_vm8 = vcmp.ge.f32.partialorder %v2925_v59, 0.0 }
 0x41f   : > { %v2984_v9 = vsel %vm2952_vm8, %v2925_v59, %v2968_v36  ;;  %v4747_v36 = vld [vmem:[#allocation17 + $0x20] sm:$0xff] }
 0x420   : > { %3417 = vmatpush.bf16.msra.mxu2 %v4747_v36 }
 0x422   : > { %v2926_v52 = vpop.f32.mrf.mxu3 }
 0x423   : > { %v2927_v33 = vadd.f32 %v6029_v4, %v2926_v52 }
 0x425   : > { %vm2953_vm9 = vcmp.ge.f32.partialorder %v2927_v33, 0.0  ;;  %v2969_v46 = vmul.f32 0.4, %v2927_v33 }
 0x427   : > { %v2985_v14 = vsel %vm2953_vm9, %v2927_v33, %v2969_v46 }
 0x428   : > { %v2996_v50 = vpack.c.bf16 %v2985_v14, %v2984_v9 }
 0x42a   : > { %v2929_v20 = vpop.f32.mrf.mxu3  ;;  %3096 = vmatmul.bf16.gmra.mxu0 %v2996_v50 }
 0x42b   : > { %v2930_v32 = vadd.f32 %v6029_v4, %v2929_v20 }
 0x42d   : > { %v2970_v51 = vmul.f32 0.4, %v2930_v32  ;;  %vm2954_vm10 = vcmp.ge.f32.partialorder %v2930_v32, 0.0 }
 0x42f   : > { %v2986_v35 = vsel %vm2954_vm10, %v2930_v32, %v2970_v51  ;;  %v4746_v51 = vld [vmem:[#allocation17 + $0x18] sm:$0xff] }
 0x430   : > { %3418 = vmatpush.bf16.msra.mxu2 %v4746_v51 }
 0x432   : > { %v2931_v34 = vpop.f32.mrf.mxu3 }
 0x433   : > { %v2932_v44 = vadd.f32 %v6029_v4, %v2931_v34 }
 0x435   : > { %vm2955_vm11 = vcmp.ge.f32.partialorder %v2932_v44, 0.0  ;;  %v2971_v16 = vmul.f32 0.4, %v2932_v44 }
 0x437   : > { %v2987_v0 = vsel %vm2955_vm11, %v2932_v44, %v2971_v16 }
 0x438   : > { %v2997_v5 = vpack.c.bf16 %v2987_v0, %v2986_v35 }
 0x43a   : > { %v2934_v12 = vpop.f32.mrf.mxu3  ;;  %3101 = vmatmul.bf16.gmra.mxu0 %v2997_v5 }
 0x43b   : > { %v2935_v7 = vadd.f32 %v6029_v4, %v2934_v12 }
 0x43d   : > { %v2972_v58 = vmul.f32 0.4, %v2935_v7  ;;  %vm2956_vm12 = vcmp.ge.f32.partialorder %v2935_v7, 0.0 }
 0x43f   : > { %v2988_v47 = vsel %vm2956_vm12, %v2935_v7, %v2972_v58  ;;  %v4745_v58 = vld [vmem:[#allocation17 + $0x10] sm:$0xff] }
 0x440   : > { %3419 = vmatpush.bf16.msra.mxu2 %v4745_v58 }
 0x442   : > { %v2936_v6 = vpop.f32.mrf.mxu3 }
 0x443   : > { %v2937_v57 = vadd.f32 %v6029_v4, %v2936_v6 }
 0x445   : > { %vm2957_vm13 = vcmp.ge.f32.partialorder %v2937_v57, 0.0  ;;  %v2973_v22 = vmul.f32 0.4, %v2937_v57 }
 0x447   : > { %v2989_v61 = vsel %vm2957_vm13, %v2937_v57, %v2973_v22 }
 0x448   : > { %v2998_v60 = vpack.c.bf16 %v2989_v61, %v2988_v47 }
 0x44a   : > { %v2939_v1 = vpop.f32.mrf.mxu3  ;;  %3106 = vmatmul.bf16.gmra.mxu0 %v2998_v60 }
 0x44b   : > { %v2940_v31 = vadd.f32 %v6029_v4, %v2939_v1 }
 0x44d   : > { %v2974_v10 = vmul.f32 0.4, %v2940_v31  ;;  %vm2958_vm14 = vcmp.ge.f32.partialorder %v2940_v31, 0.0 }
 0x44f   : > { %v2990_v21 = vsel %vm2958_vm14, %v2940_v31, %v2974_v10  ;;  %v4744_v10 = vld [vmem:[#allocation17 + $0x8] sm:$0xff] }
 0x450   : > { %3420 = vmatpush.bf16.msra.mxu2 %v4744_v10 }
 0x452   : > { %v2941_v8 = vpop.f32.mrf.mxu3 }
 0x453   : > { %v2942_v15 = vadd.f32 %v6029_v4, %v2941_v8 }
 0x455   : > { %vm2959_vm15 = vcmp.ge.f32.partialorder %v2942_v15, 0.0  ;;  %v2975_v56 = vmul.f32 0.4, %v2942_v15 }
 0x457   : > { %v2991_v55 = vsel %vm2959_vm15, %v2942_v15, %v2975_v56 }
 0x458   : > { %v2999_v3 = vpack.c.bf16 %v2991_v55, %v2990_v21 }
 0x45a   : > { %3111 = vmatmul.bf16.gmra.mxu0 %v2999_v3 }
 0x467   : > { %v3077_v17 = vpop.f32.mrf.mxu0 }
 0x468   : > { %v3078_v62 = vadd.f32 %v6050_v24, %v3077_v17 }
 0x46a   : > { %v3133_v38 = vmul.f32 0.4, %v3078_v62  ;;  %vm3117_vm0 = vcmp.ge.f32.partialorder %v3078_v62, 0.0 }
 0x46c   : > { %v3149_v53 = vsel %vm3117_vm0, %v3078_v62, %v3133_v38 }
 0x46f   : > { %v3079_v30 = vpop.f32.mrf.mxu0 }
 0x470   : > { %v3080_v4 = vadd.f32 %v6050_v24, %v3079_v30 }
 0x472   : > { %vm3118_vm1 = vcmp.ge.f32.partialorder %v3080_v4, 0.0  ;;  %v3134_v26 = vmul.f32 0.4, %v3080_v4 }
 0x474   : > { %v3150_v29 = vsel %vm3118_vm1, %v3080_v4, %v3134_v26 }
 0x475   : > { %v3165_v28 = vpack.c.bf16 %v3150_v29, %v3149_v53  ;;  %v4743_v53 = vld [vmem:[#allocation17] sm:$0xff] }
 0x476   : > { %3421 = vmatpush.bf16.msra.mxu2 %v4743_v53 }
 0x477   : > { %v3082_v23 = vpop.f32.mrf.mxu0  ;;  %3249 = vmatmul.bf16.vlgmr.msra.gmra.mxu1 %v3165_v28 }
 0x478   : > { %v3083_v63 = vadd.f32 %v6050_v24, %v3082_v23 }
 0x47a   : > { %v3135_v2 = vmul.f32 0.4, %v3083_v63  ;;  %vm3119_vm2 = vcmp.ge.f32.partialorder %v3083_v63, 0.0 }
 0x47c   : > { %v3151_v19 = vsel %vm3119_vm2, %v3083_v63, %v3135_v2 }
 0x47f   : > { %v3084_v40 = vpop.f32.mrf.mxu0 }
 0x480   : > { %v3085_v41 = vadd.f32 %v6050_v24, %v3084_v40 }
 0x482   : > { %vm3120_vm3 = vcmp.ge.f32.partialorder %v3085_v41, 0.0  ;;  %v3136_v42 = vmul.f32 0.4, %v3085_v41 }
 0x484   : > { %v3152_v25 = vsel %vm3120_vm3, %v3085_v41, %v3136_v42 }
 0x485   : > { %v3166_v11 = vpack.c.bf16 %v3152_v25, %v3151_v19  ;;  %v6071_v19 = vld [vmem:[%s6243_s25] ss:$0 sm:$0xff]  ;;  %s3715_s25 = sshll.u32 %s3712_s19, 4  ;;  %s3716_s25 = int_to_ptr.hbm [resolvable:$true] %s3715_s25 }
 0x486   : > { %v4758_v25 = vld [vmem:[#allocation19 + $0x38] sm:$0xff]  ;;  %s5266_s18 = sshra.s32 %s3716_s25, 4  ;;  %s5267_s18 = int_to_ptr.hbm [resolvable:$true] %s5266_s18 }
 0x487   : > { %v3087_v18 = vpop.f32.mrf.mxu0  ;;  %3254 = vmatmul.bf16.gmra.mxu1 %v3166_v11  ;;  %3587 = vmatpush.bf16.msra.mxu3 %v4758_v25  ;;  %s5268_s23 = scalar_lea.hbm %s5267_s18, 128  ;;  %p5273_p12 = scmp.lt.s32.totalorder %s5267_s18, %s6246_s9 }
 0x488   : > { %v3088_v43 = vadd.f32 %v6050_v24, %v3087_v18  ;;  %p5269_p1 = scmp.ne.s32.totalorder %s5267_s18, %s5268_s23  ;;  %p5274_p7 = scmp.lt.s32.totalorder %s5272_s6, %s5268_s23 }
 0x48a   : > { %v3137_v45 = vmul.f32 0.4, %v3088_v43  ;;  %vm3121_vm4 = vcmp.ge.f32.partialorder %v3088_v43, 0.0  ;;  %p5270_p3 = pnand %p5269_p1, %p5596_p4  ;;  %p5275_p8 = por %p5274_p7, %p5273_p12 }
 0x48c   : > { %v3153_v33 = vsel %vm3121_vm4, %v3088_v43, %v3137_v45  ;;  %p5271_p5 = pneg %p5270_p3 }
 0x48e   : > { %p5276_p9 = pnand %p5275_p8, %p5271_p5 }
 0x48f   : > { %v3089_v39 = vpop.f32.mrf.mxu0 }
 0x490   : > { %v3090_v59 = vadd.f32 %v6050_v24, %v3089_v39 }
 0x492   : > { %vm3122_vm5 = vcmp.ge.f32.partialorder %v3090_v59, 0.0  ;;  %v3138_v52 = vmul.f32 0.4, %v3090_v59 }
 0x494   : > { %v3154_v46 = vsel %vm3122_vm5, %v3090_v59, %v3138_v52 }
 0x495   : > { %v3167_v49 = vpack.c.bf16 %v3154_v46, %v3153_v33  ;;  %v4757_v33 = vld [vmem:[#allocation19 + $0x30] sm:$0xff] }
 0x496   : > { %3588 = vmatpush.bf16.msra.mxu3 %v4757_v33 }
 0x497   : > { %v3092_v9 = vpop.f32.mrf.mxu0  ;;  %3259 = vmatmul.bf16.gmra.mxu1 %v3167_v49 }
 0x498   : > { %v3093_v14 = vadd.f32 %v6050_v24, %v3092_v9 }
 0x49a   : > { %v3139_v20 = vmul.f32 0.4, %v3093_v14  ;;  %vm3123_vm6 = vcmp.ge.f32.partialorder %v3093_v14, 0.0 }
 0x49c   : > { %v3155_v44 = vsel %vm3123_vm6, %v3093_v14, %v3139_v20 }
 0x49f   : > { %v3094_v50 = vpop.f32.mrf.mxu0 }
 0x4a0   : > { %v3095_v32 = vadd.f32 %v6050_v24, %v3094_v50 }
 0x4a2   : > { %vm3124_vm7 = vcmp.ge.f32.partialorder %v3095_v32, 0.0  ;;  %v3140_v34 = vmul.f32 0.4, %v3095_v32 }
 0x4a4   : > { %v3156_v16 = vsel %vm3124_vm7, %v3095_v32, %v3140_v34 }
 0x4a5   : > { %v3168_v48 = vpack.c.bf16 %v3156_v16, %v3155_v44  ;;  %v4756_v44 = vld [vmem:[#allocation19 + $0x28] sm:$0xff] }
 0x4a6   : > { %3589 = vmatpush.bf16.msra.mxu3 %v4756_v44 }
 0x4a7   : > { %v3097_v35 = vpop.f32.mrf.mxu0  ;;  %3264 = vmatmul.bf16.gmra.mxu1 %v3168_v48 }
 0x4a8   : > { %v3098_v0 = vadd.f32 %v6050_v24, %v3097_v35 }
 0x4aa   : > { %v3141_v12 = vmul.f32 0.4, %v3098_v0  ;;  %vm3125_vm8 = vcmp.ge.f32.partialorder %v3098_v0, 0.0 }
 0x4ac   : > { %v3157_v57 = vsel %vm3125_vm8, %v3098_v0, %v3141_v12 }
 0x4af   : > { %v3099_v5 = vpop.f32.mrf.mxu0 }
 0x4b0   : > { %v3100_v7 = vadd.f32 %v6050_v24, %v3099_v5 }
 0x4b2   : > { %vm3126_vm9 = vcmp.ge.f32.partialorder %v3100_v7, 0.0  ;;  %v3142_v6 = vmul.f32 0.4, %v3100_v7 }
 0x4b4   : > { %v3158_v22 = vsel %vm3126_vm9, %v3100_v7, %v3142_v6 }
 0x4b5   : > { %v3169_v47 = vpack.c.bf16 %v3158_v22, %v3157_v57  ;;  %v4755_v57 = vld [vmem:[#allocation19 + $0x20] sm:$0xff] }
 0x4b6   : > { %3590 = vmatpush.bf16.msra.mxu3 %v4755_v57 }
 0x4b7   : > { %v3102_v61 = vpop.f32.mrf.mxu0  ;;  %3269 = vmatmul.bf16.gmra.mxu1 %v3169_v47 }
 0x4b8   : > { %v3103_v60 = vadd.f32 %v6050_v24, %v3102_v61 }
 0x4ba   : > { %v3143_v27 = vmul.f32 0.4, %v3103_v60  ;;  %vm3127_vm10 = vcmp.ge.f32.partialorder %v3103_v60, 0.0 }
 0x4bc   : > { %v3159_v15 = vsel %vm3127_vm10, %v3103_v60, %v3143_v27 }
 0x4bf   : > { %v3104_v1 = vpop.f32.mrf.mxu0 }
 0x4c0   : > { %v3105_v31 = vadd.f32 %v6050_v24, %v3104_v1 }
 0x4c2   : > { %vm3128_vm11 = vcmp.ge.f32.partialorder %v3105_v31, 0.0  ;;  %v3144_v8 = vmul.f32 0.4, %v3105_v31 }
 0x4c4   : > { %v3160_v56 = vsel %vm3128_vm11, %v3105_v31, %v3144_v8 }
 0x4c5   : > { %v3170_v21 = vpack.c.bf16 %v3160_v56, %v3159_v15  ;;  %v4754_v15 = vld [vmem:[#allocation19 + $0x18] sm:$0xff] }
 0x4c6   : > { %3591 = vmatpush.bf16.msra.mxu3 %v4754_v15 }
 0x4c7   : > { %v3107_v55 = vpop.f32.mrf.mxu0  ;;  %3274 = vmatmul.bf16.gmra.mxu1 %v3170_v21 }
 0x4c8   : > { %v3108_v3 = vadd.f32 %v6050_v24, %v3107_v55 }
 0x4ca   : > { %v3145_v17 = vmul.f32 0.4, %v3108_v3  ;;  %vm3129_vm12 = vcmp.ge.f32.partialorder %v3108_v3, 0.0 }
 0x4cc   : > { %v3161_v38 = vsel %vm3129_vm12, %v3108_v3, %v3145_v17 }
 0x4cf   : > { %v3109_v13 = vpop.f32.mrf.mxu0 }
 0x4d0   : > { %v3110_v62 = vadd.f32 %v6050_v24, %v3109_v13 }
 0x4d2   : > { %vm3130_vm13 = vcmp.ge.f32.partialorder %v3110_v62, 0.0  ;;  %v3146_v30 = vmul.f32 0.4, %v3110_v62 }
 0x4d4   : > { %v3162_v4 = vsel %vm3130_vm13, %v3110_v62, %v3146_v30 }
 0x4d5   : > { %v3171_v26 = vpack.c.bf16 %v3162_v4, %v3161_v38  ;;  %v4753_v4 = vld [vmem:[#allocation19 + $0x10] sm:$0xff] }
 0x4d6   : > { %3592 = vmatpush.bf16.msra.mxu3 %v4753_v4 }
 0x4d7   : > { %v3112_v37 = vpop.f32.mrf.mxu0  ;;  %3279 = vmatmul.bf16.gmra.mxu1 %v3171_v26 }
 0x4d8   : > { %v3113_v29 = vadd.f32 %v6050_v24, %v3112_v37 }
 0x4da   : > { %v3147_v23 = vmul.f32 0.4, %v3113_v29  ;;  %vm3131_vm14 = vcmp.ge.f32.partialorder %v3113_v29, 0.0 }
 0x4dc   : > { %v3163_v2 = vsel %vm3131_vm14, %v3113_v29, %v3147_v23 }
 0x4df   : > { %v3114_v28 = vpop.f32.mrf.mxu0 }
 0x4e0   : > { %v3115_v63 = vadd.f32 %v6050_v24, %v3114_v28 }
 0x4e2   : > { %vm3132_vm15 = vcmp.ge.f32.partialorder %v3115_v63, 0.0  ;;  %v3148_v40 = vmul.f32 0.4, %v3115_v63 }
 0x4e4   : > { %v3164_v41 = vsel %vm3132_vm15, %v3115_v63, %v3148_v40 }
 0x4e5   : > { %v3172_v42 = vpack.c.bf16 %v3164_v41, %v3163_v2  ;;  %v4752_v41 = vld [vmem:[#allocation19 + $0x8] sm:$0xff] }
 0x4e6   : > { %3593 = vmatpush.bf16.msra.mxu3 %v4752_v41 }
 0x4e7   : > { %3284 = vmatmul.bf16.gmra.mxu1 %v3172_v42 }
 0x4f4   : > { %v3250_v54 = vpop.f32.mrf.mxu1 }
 0x4f5   : > { %v3251_v11 = vadd.f32 %v6071_v19, %v3250_v54 }
 0x4f7   : > { %v3306_v43 = vmul.f32 0.4, %v3251_v11  ;;  %vm3290_vm0 = vcmp.ge.f32.partialorder %v3251_v11, 0.0 }
 0x4f9   : > { %v3322_v45 = vsel %vm3290_vm0, %v3251_v11, %v3306_v43 }
 0x4fc   : > { %v3252_v18 = vpop.f32.mrf.mxu1 }
 0x4fd   : > { %v3253_v24 = vadd.f32 %v6071_v19, %v3252_v18 }
 0x4ff   : > { %vm3291_vm1 = vcmp.ge.f32.partialorder %v3253_v24, 0.0  ;;  %v3307_v39 = vmul.f32 0.4, %v3253_v24 }
 0x501   : > { %v3323_v59 = vsel %vm3291_vm1, %v3253_v24, %v3307_v39 }
 0x502   : > { %v3338_v52 = vpack.c.bf16 %v3323_v59, %v3322_v45 }
 0x504   : > { %v3255_v36 = vpop.f32.mrf.mxu1  ;;  %3422 = vmatmul.bf16.vlgmr.msra.gmra.mxu2 %v3338_v52 }
 0x505   : > { %v3256_v46 = vadd.f32 %v6071_v19, %v3255_v36  ;;  %v4751_v36 = vld [vmem:[#allocation19] sm:$0xff] }
 0x506   : > { %3594 = vmatpush.bf16.msra.mxu3 %v4751_v36 }
 0x507   : > { %v3308_v9 = vmul.f32 0.4, %v3256_v46  ;;  %vm3292_vm2 = vcmp.ge.f32.partialorder %v3256_v46, 0.0 }
 0x509   : > { %v3324_v20 = vsel %vm3292_vm2, %v3256_v46, %v3308_v9 }
 0x50c   : > { %v3257_v49 = vpop.f32.mrf.mxu1 }
 0x50d   : > { %v3258_v14 = vadd.f32 %v6071_v19, %v3257_v49 }
 0x50f   : > { %vm3293_vm3 = vcmp.ge.f32.partialorder %v3258_v14, 0.0  ;;  %v3309_v50 = vmul.f32 0.4, %v3258_v14 }
 0x511   : > { %v3325_v32 = vsel %vm3293_vm3, %v3258_v14, %v3309_v50 }
 0x512   : > { %v3339_v34 = vpack.c.bf16 %v3325_v32, %v3324_v20  ;;  %v6092_v32 = vld [vmem:[%s6244_s27] ss:$0 sm:$0xff] }
 0x514   : > { %v3260_v51 = vpop.f32.mrf.mxu1  ;;  %3427 = vmatmul.bf16.gmra.mxu2 %v3339_v34 }
 0x515   : > { %v3261_v16 = vadd.f32 %v6071_v19, %v3260_v51 }
 0x517   : > { %v3310_v35 = vmul.f32 0.4, %v3261_v16  ;;  %vm3294_vm4 = vcmp.ge.f32.partialorder %v3261_v16, 0.0 }
 0x519   : > { %v3326_v12 = vsel %vm3294_vm4, %v3261_v16, %v3310_v35 }
 0x51c   : > { %v3262_v48 = vpop.f32.mrf.mxu1 }
 0x51d   : > { %v3263_v0 = vadd.f32 %v6071_v19, %v3262_v48 }
 0x51f   : > { %vm3295_vm5 = vcmp.ge.f32.partialorder %v3263_v0, 0.0  ;;  %v3311_v5 = vmul.f32 0.4, %v3263_v0 }
 0x521   : > { %v3327_v7 = vsel %vm3295_vm5, %v3263_v0, %v3311_v5 }
 0x522   : > { %v3340_v6 = vpack.c.bf16 %v3327_v7, %v3326_v12 }
 0x524   : > { %v3265_v58 = vpop.f32.mrf.mxu1  ;;  %3432 = vmatmul.bf16.gmra.mxu2 %v3340_v6 }
 0x525   : > { %v3266_v22 = vadd.f32 %v6071_v19, %v3265_v58 }
 0x527   : > { %v3312_v61 = vmul.f32 0.4, %v3266_v22  ;;  %vm3296_vm6 = vcmp.ge.f32.partialorder %v3266_v22, 0.0 }
 0x529   : > { %v3328_v27 = vsel %vm3296_vm6, %v3266_v22, %v3312_v61 }
 0x52c   : > { %v3267_v47 = vpop.f32.mrf.mxu1 }
 0x52d   : > { %v3268_v60 = vadd.f32 %v6071_v19, %v3267_v47 }
 0x52f   : > { %vm3297_vm7 = vcmp.ge.f32.partialorder %v3268_v60, 0.0  ;;  %v3313_v1 = vmul.f32 0.4, %v3268_v60 }
 0x531   : > { %v3329_v31 = vsel %vm3297_vm7, %v3268_v60, %v3313_v1 }
 0x532   : > { %v3341_v8 = vpack.c.bf16 %v3329_v31, %v3328_v27 }
 0x534   : > { %v3270_v10 = vpop.f32.mrf.mxu1  ;;  %3437 = vmatmul.bf16.gmra.mxu2 %v3341_v8 }
 0x535   : > { %v3271_v56 = vadd.f32 %v6071_v19, %v3270_v10 }
 0x537   : > { %v3314_v55 = vmul.f32 0.4, %v3271_v56  ;;  %vm3298_vm8 = vcmp.ge.f32.partialorder %v3271_v56, 0.0 }
 0x539   : > { %v3330_v17 = vsel %vm3298_vm8, %v3271_v56, %v3314_v55 }
 0x53c   : > { %v3272_v21 = vpop.f32.mrf.mxu1 }
 0x53d   : > { %v3273_v3 = vadd.f32 %v6071_v19, %v3272_v21 }
 0x53f   : > { %vm3299_vm9 = vcmp.ge.f32.partialorder %v3273_v3, 0.0  ;;  %v3315_v13 = vmul.f32 0.4, %v3273_v3 }
 0x541   : > { %v3331_v62 = vsel %vm3299_vm9, %v3273_v3, %v3315_v13 }
 0x542   : > { %v3342_v30 = vpack.c.bf16 %v3331_v62, %v3330_v17 }
 0x544   : > { %v3275_v38 = vpop.f32.mrf.mxu1  ;;  %3442 = vmatmul.bf16.gmra.mxu2 %v3342_v30 }
 0x545   : > { %v3276_v26 = vadd.f32 %v6071_v19, %v3275_v38 }
 0x547   : > { %v3316_v53 = vmul.f32 0.4, %v3276_v26  ;;  %vm3300_vm10 = vcmp.ge.f32.partialorder %v3276_v26, 0.0 }
 0x549   : > { %v3332_v23 = vsel %vm3300_vm10, %v3276_v26, %v3316_v53 }
 0x54c   : > { %v3277_v37 = vpop.f32.mrf.mxu1 }
 0x54d   : > { %v3278_v29 = vadd.f32 %v6071_v19, %v3277_v37 }
 0x54f   : > { %vm3301_vm11 = vcmp.ge.f32.partialorder %v3278_v29, 0.0  ;;  %v3317_v28 = vmul.f32 0.4, %v3278_v29 }
 0x551   : > { %v3333_v63 = vsel %vm3301_vm11, %v3278_v29, %v3317_v28 }
 0x552   : > { %v3343_v40 = vpack.c.bf16 %v3333_v63, %v3332_v23 }
 0x554   : > { %v3280_v2 = vpop.f32.mrf.mxu1  ;;  %3447 = vmatmul.bf16.gmra.mxu2 %v3343_v40 }
 0x555   : > { %v3281_v42 = vadd.f32 %v6071_v19, %v3280_v2 }
 0x557   : > { %v3318_v25 = vmul.f32 0.4, %v3281_v42  ;;  %vm3302_vm12 = vcmp.ge.f32.partialorder %v3281_v42, 0.0 }
 0x559   : > { %v3334_v43 = vsel %vm3302_vm12, %v3281_v42, %v3318_v25 }
 0x55c   : > { %v3282_v54 = vpop.f32.mrf.mxu1 }
 0x55d   : > { %v3283_v11 = vadd.f32 %v6071_v19, %v3282_v54 }
 0x55f   : > { %vm3303_vm13 = vcmp.ge.f32.partialorder %v3283_v11, 0.0  ;;  %v3319_v18 = vmul.f32 0.4, %v3283_v11 }
 0x561   : > { %v3335_v24 = vsel %vm3303_vm13, %v3283_v11, %v3319_v18 }
 0x562   : > { %v3344_v39 = vpack.c.bf16 %v3335_v24, %v3334_v43 }
 0x564   : > { %v3285_v45 = vpop.f32.mrf.mxu1  ;;  %3452 = vmatmul.bf16.gmra.mxu2 %v3344_v39 }
 0x565   : > { %v3286_v59 = vadd.f32 %v6071_v19, %v3285_v45 }
 0x567   : > { %v3320_v33 = vmul.f32 0.4, %v3286_v59  ;;  %vm3304_vm14 = vcmp.ge.f32.partialorder %v3286_v59, 0.0 }
 0x569   : > { %v3336_v9 = vsel %vm3304_vm14, %v3286_v59, %v3320_v33 }
 0x56c   : > { %v3287_v52 = vpop.f32.mrf.mxu1 }
 0x56d   : > { %v3288_v46 = vadd.f32 %v6071_v19, %v3287_v52 }
 0x56f   : > { %vm3305_vm15 = vcmp.ge.f32.partialorder %v3288_v46, 0.0  ;;  %v3321_v49 = vmul.f32 0.4, %v3288_v46 }
 0x571   : > { %v3337_v14 = vsel %vm3305_vm15, %v3288_v46, %v3321_v49 }
 0x572   : > { %v3345_v50 = vpack.c.bf16 %v3337_v14, %v3336_v9 }
 0x574   : > { %3457 = vmatmul.bf16.gmra.mxu2 %v3345_v50 }
 0x587   : > { %v3423_v20 = vpop.f32.mrf.mxu2 }
 0x588   : > { %v3424_v34 = vadd.f32 %v6092_v32, %v3423_v20 }
 0x58a   : > { %v3479_v44 = vmul.f32 0.4, %v3424_v34  ;;  %vm3463_vm0 = vcmp.ge.f32.partialorder %v3424_v34, 0.0 }
 0x58c   : > { %v3495_v48 = vsel %vm3463_vm0, %v3424_v34, %v3479_v44 }
 0x58f   : > { %v3425_v51 = vpop.f32.mrf.mxu2 }
 0x590   : > { %v3426_v19 = vadd.f32 %v6092_v32, %v3425_v51 }
 0x592   : > { %vm3464_vm1 = vcmp.ge.f32.partialorder %v3426_v19, 0.0  ;;  %v3480_v16 = vmul.f32 0.4, %v3426_v19 }
 0x594   : > { %v3496_v35 = vsel %vm3464_vm1, %v3426_v19, %v3480_v16 }
 0x595   : > { %v3511_v0 = vpack.c.bf16 %v3496_v35, %v3495_v48 }
 0x597   : > { %v3428_v5 = vpop.f32.mrf.mxu2  ;;  %3595 = vmatmul.bf16.vlgmr.msra.gmra.mxu3 %v3511_v0 }
 0x598   : > { %v3429_v12 = vadd.f32 %v6092_v32, %v3428_v5  ;;  %v6113_v5 = vld [vmem:[%s6245_s16] ss:$0 sm:$0xff] }
 0x59a   : > { %v3481_v6 = vmul.f32 0.4, %v3429_v12  ;;  %vm3465_vm2 = vcmp.ge.f32.partialorder %v3429_v12, 0.0 }
 0x59c   : > { %v3497_v22 = vsel %vm3465_vm2, %v3429_v12, %v3481_v6 }
 0x59f   : > { %v3430_v7 = vpop.f32.mrf.mxu2 }
 0x5a0   : > { %v3431_v58 = vadd.f32 %v6092_v32, %v3430_v7 }
 0x5a2   : > { %vm3466_vm3 = vcmp.ge.f32.partialorder %v3431_v58, 0.0  ;;  %v3482_v57 = vmul.f32 0.4, %v3431_v58 }
 0x5a4   : > { %v3498_v47 = vsel %vm3466_vm3, %v3431_v58, %v3482_v57 }
 0x5a5   : > { %v3512_v61 = vpack.c.bf16 %v3498_v47, %v3497_v22 }
 0x5a7   : > { %v3433_v60 = vpop.f32.mrf.mxu2  ;;  %3600 = vmatmul.bf16.gmra.mxu3 %v3512_v61 }
 0x5a8   : > { %v3434_v1 = vadd.f32 %v6092_v32, %v3433_v60 }
 0x5aa   : > { %v3483_v31 = vmul.f32 0.4, %v3434_v1  ;;  %vm3467_vm4 = vcmp.ge.f32.partialorder %v3434_v1, 0.0 }
 0x5ac   : > { %v3499_v15 = vsel %vm3467_vm4, %v3434_v1, %v3483_v31 }
 0x5af   : > { %v3435_v27 = vpop.f32.mrf.mxu2 }
 0x5b0   : > { %v3436_v8 = vadd.f32 %v6092_v32, %v3435_v27 }
 0x5b2   : > { %vm3468_vm5 = vcmp.ge.f32.partialorder %v3436_v8, 0.0  ;;  %v3484_v10 = vmul.f32 0.4, %v3436_v8 }
 0x5b4   : > { %v3500_v56 = vsel %vm3468_vm5, %v3436_v8, %v3484_v10 }
 0x5b5   : > { %v3513_v21 = vpack.c.bf16 %v3500_v56, %v3499_v15 }
 0x5b7   : > { %v3438_v55 = vpop.f32.mrf.mxu2  ;;  %3605 = vmatmul.bf16.gmra.mxu3 %v3513_v21 }
 0x5b8   : > { %v3439_v3 = vadd.f32 %v6092_v32, %v3438_v55 }
 0x5ba   : > { %v3485_v17 = vmul.f32 0.4, %v3439_v3  ;;  %vm3469_vm6 = vcmp.ge.f32.partialorder %v3439_v3, 0.0 }
 0x5bc   : > { %v3501_v38 = vsel %vm3469_vm6, %v3439_v3, %v3485_v17 }
 0x5bf   : > { %v3440_v13 = vpop.f32.mrf.mxu2 }
 0x5c0   : > { %v3441_v62 = vadd.f32 %v6092_v32, %v3440_v13 }
 0x5c2   : > { %vm3470_vm7 = vcmp.ge.f32.partialorder %v3441_v62, 0.0  ;;  %v3486_v30 = vmul.f32 0.4, %v3441_v62 }
 0x5c4   : > { %v3502_v4 = vsel %vm3470_vm7, %v3441_v62, %v3486_v30 }
 0x5c5   : > { %v3514_v26 = vpack.c.bf16 %v3502_v4, %v3501_v38 }
 0x5c7   : > { %v3443_v37 = vpop.f32.mrf.mxu2  ;;  %3610 = vmatmul.bf16.gmra.mxu3 %v3514_v26 }
 0x5c8   : > { %v3444_v53 = vadd.f32 %v6092_v32, %v3443_v37 }
 0x5ca   : > { %v3487_v28 = vmul.f32 0.4, %v3444_v53  ;;  %vm3471_vm8 = vcmp.ge.f32.partialorder %v3444_v53, 0.0 }
 0x5cc   : > { %v3503_v40 = vsel %vm3471_vm8, %v3444_v53, %v3487_v28 }
 0x5cf   : > { %v3445_v29 = vpop.f32.mrf.mxu2 }
 0x5d0   : > { %v3446_v23 = vadd.f32 %v6092_v32, %v3445_v29 }
 0x5d2   : > { %vm3472_vm9 = vcmp.ge.f32.partialorder %v3446_v23, 0.0  ;;  %v3488_v63 = vmul.f32 0.4, %v3446_v23 }
 0x5d4   : > { %v3504_v2 = vsel %vm3472_vm9, %v3446_v23, %v3488_v63 }
 0x5d5   : > { %v3515_v41 = vpack.c.bf16 %v3504_v2, %v3503_v40 }
 0x5d7   : > { %v3448_v42 = vpop.f32.mrf.mxu2  ;;  %3615 = vmatmul.bf16.gmra.mxu3 %v3515_v41 }
 0x5d8   : > { %v3449_v54 = vadd.f32 %v6092_v32, %v3448_v42 }
 0x5da   : > { %v3489_v11 = vmul.f32 0.4, %v3449_v54  ;;  %vm3473_vm10 = vcmp.ge.f32.partialorder %v3449_v54, 0.0 }
 0x5dc   : > { %v3505_v24 = vsel %vm3473_vm10, %v3449_v54, %v3489_v11 }
 0x5df   : > { %v3450_v25 = vpop.f32.mrf.mxu2 }
 0x5e0   : > { %v3451_v18 = vadd.f32 %v6092_v32, %v3450_v25 }
 0x5e2   : > { %vm3474_vm11 = vcmp.ge.f32.partialorder %v3451_v18, 0.0  ;;  %v3490_v43 = vmul.f32 0.4, %v3451_v18 }
 0x5e4   : > { %v3506_v39 = vsel %vm3474_vm11, %v3451_v18, %v3490_v43 }
 0x5e5   : > { %v3516_v45 = vpack.c.bf16 %v3506_v39, %v3505_v24 }
 0x5e7   : > { %v3453_v59 = vpop.f32.mrf.mxu2  ;;  %3620 = vmatmul.bf16.gmra.mxu3 %v3516_v45 }
 0x5e8   : > { %v3454_v52 = vadd.f32 %v6092_v32, %v3453_v59 }
 0x5ea   : > { %v3491_v33 = vmul.f32 0.4, %v3454_v52  ;;  %vm3475_vm12 = vcmp.ge.f32.partialorder %v3454_v52, 0.0 }
 0x5ec   : > { %v3507_v9 = vsel %vm3475_vm12, %v3454_v52, %v3491_v33 }
 0x5ef   : > { %v3455_v36 = vpop.f32.mrf.mxu2 }
 0x5f0   : > { %v3456_v46 = vadd.f32 %v6092_v32, %v3455_v36 }
 0x5f2   : > { %vm3476_vm13 = vcmp.ge.f32.partialorder %v3456_v46, 0.0  ;;  %v3492_v49 = vmul.f32 0.4, %v3456_v46 }
 0x5f4   : > { %v3508_v14 = vsel %vm3476_vm13, %v3456_v46, %v3492_v49 }
 0x5f5   : > { %v3517_v50 = vpack.c.bf16 %v3508_v14, %v3507_v9 }
 0x5f7   : > { %v3458_v20 = vpop.f32.mrf.mxu2  ;;  %3625 = vmatmul.bf16.gmra.mxu3 %v3517_v50 }
 0x5f8   : > { %v3459_v34 = vadd.f32 %v6092_v32, %v3458_v20 }
 0x5fa   : > { %v3493_v44 = vmul.f32 0.4, %v3459_v34  ;;  %vm3477_vm14 = vcmp.ge.f32.partialorder %v3459_v34, 0.0 }
 0x5fc   : > { %v3509_v48 = vsel %vm3477_vm14, %v3459_v34, %v3493_v44 }
 0x5ff   : > { %v3460_v51 = vpop.f32.mrf.mxu2 }
 0x600   : > { %v3461_v19 = vadd.f32 %v6092_v32, %v3460_v51 }
 0x602   : > { %vm3478_vm15 = vcmp.ge.f32.partialorder %v3461_v19, 0.0  ;;  %v3494_v16 = vmul.f32 0.4, %v3461_v19 }
 0x604   : > { %v3510_v35 = vsel %vm3478_vm15, %v3461_v19, %v3494_v16 }
 0x605   : > { %v3518_v0 = vpack.c.bf16 %v3510_v35, %v3509_v48 }
 0x607   : > { %3630 = vmatmul.bf16.gmra.mxu3 %v3518_v0 }
 0x61a   : > { %v3596_v12 = vpop.f32.mrf.mxu3 }
 0x61b   : > { %v3597_v7 = vadd.f32 %v6113_v5, %v3596_v12 }
 0x61d   : > { %vm3636_vm0 = vcmp.ge.f32.partialorder %v3597_v7, 0.0  ;;  %v3652_v6 = vmul.f32 0.4, %v3597_v7 }
 0x61f   : > { %v3668_v58 = vsel %vm3636_vm0, %v3597_v7, %v3652_v6 }
 0x620   : > { %3684 = vst [vmem:[%s6117_s22] sm:$0xff] %v3668_v58 }
 0x622   : > { %v3598_v32 = vpop.f32.mrf.mxu3 }
 0x623   : > { %v3599_v57 = vadd.f32 %v6113_v5, %v3598_v32 }
 0x625   : > { %vm3637_vm1 = vcmp.ge.f32.partialorder %v3599_v57, 0.0  ;;  %v3653_v22 = vmul.f32 0.4, %v3599_v57 }
 0x627   : > { %v3669_v47 = vsel %vm3637_vm1, %v3599_v57, %v3653_v22 }
 0x628   : > { %3685 = vst [vmem:[%s6117_s22 + $0x8] sm:$0xff] %v3669_v47 }
 0x62a   : > { %v3601_v61 = vpop.f32.mrf.mxu3 }
 0x62b   : > { %v3602_v60 = vadd.f32 %v6113_v5, %v3601_v61 }
 0x62d   : > { %vm3638_vm2 = vcmp.ge.f32.partialorder %v3602_v60, 0.0  ;;  %v3654_v1 = vmul.f32 0.4, %v3602_v60 }
 0x62f   : > { %v3670_v27 = vsel %vm3638_vm2, %v3602_v60, %v3654_v1 }
 0x630   : > { %3686 = vst [vmem:[%s6117_s22 + $0x10] sm:$0xff] %v3670_v27 }
 0x632   : > { %v3603_v31 = vpop.f32.mrf.mxu3 }
 0x633   : > { %v3604_v8 = vadd.f32 %v6113_v5, %v3603_v31 }
 0x635   : > { %vm3639_vm3 = vcmp.ge.f32.partialorder %v3604_v8, 0.0  ;;  %v3655_v10 = vmul.f32 0.4, %v3604_v8 }
 0x637   : > { %v3671_v15 = vsel %vm3639_vm3, %v3604_v8, %v3655_v10 }
 0x638   : > { %3687 = vst [vmem:[%s6117_s22 + $0x18] sm:$0xff] %v3671_v15 }
 0x63a   : > { %v3606_v56 = vpop.f32.mrf.mxu3 }
 0x63b   : > { %v3607_v21 = vadd.f32 %v6113_v5, %v3606_v56 }
 0x63d   : > { %vm3640_vm4 = vcmp.ge.f32.partialorder %v3607_v21, 0.0  ;;  %v3656_v55 = vmul.f32 0.4, %v3607_v21 }
 0x63f   : > { %v3672_v3 = vsel %vm3640_vm4, %v3607_v21, %v3656_v55 }
 0x640   : > { %3688 = vst [vmem:[%s6117_s22 + $0x20] sm:$0xff] %v3672_v3 }
 0x642   : > { %v3608_v13 = vpop.f32.mrf.mxu3 }
 0x643   : > { %v3609_v17 = vadd.f32 %v6113_v5, %v3608_v13 }
 0x645   : > { %vm3641_vm5 = vcmp.ge.f32.partialorder %v3609_v17, 0.0  ;;  %v3657_v62 = vmul.f32 0.4, %v3609_v17 }
 0x647   : > { %v3673_v30 = vsel %vm3641_vm5, %v3609_v17, %v3657_v62 }
 0x648   : > { %3689 = vst [vmem:[%s6117_s22 + $0x28] sm:$0xff] %v3673_v30 }
 0x64a   : > { %v3611_v38 = vpop.f32.mrf.mxu3 }
 0x64b   : > { %v3612_v4 = vadd.f32 %v6113_v5, %v3611_v38 }
 0x64d   : > { %vm3642_vm6 = vcmp.ge.f32.partialorder %v3612_v4, 0.0  ;;  %v3658_v26 = vmul.f32 0.4, %v3612_v4 }
 0x64f   : > { %v3674_v37 = vsel %vm3642_vm6, %v3612_v4, %v3658_v26 }
 0x650   : > { %3690 = vst [vmem:[%s6117_s22 + $0x30] sm:$0xff] %v3674_v37 }
 0x652   : > { %v3613_v53 = vpop.f32.mrf.mxu3 }
 0x653   : > { %v3614_v29 = vadd.f32 %v6113_v5, %v3613_v53 }
 0x655   : > { %vm3643_vm7 = vcmp.ge.f32.partialorder %v3614_v29, 0.0  ;;  %v3659_v28 = vmul.f32 0.4, %v3614_v29 }
 0x657   : > { %v3675_v23 = vsel %vm3643_vm7, %v3614_v29, %v3659_v28 }
 0x658   : > { %3691 = vst [vmem:[%s6117_s22 + $0x38] sm:$0xff] %v3675_v23 }
 0x65a   : > { %v3616_v63 = vpop.f32.mrf.mxu3 }
 0x65b   : > { %v3617_v40 = vadd.f32 %v6113_v5, %v3616_v63 }
 0x65d   : > { %vm3644_vm8 = vcmp.ge.f32.partialorder %v3617_v40, 0.0  ;;  %v3660_v2 = vmul.f32 0.4, %v3617_v40 }
 0x65f   : > { %v3676_v41 = vsel %vm3644_vm8, %v3617_v40, %v3660_v2 }
 0x660   : > { %3692 = vst [vmem:[%s6117_s22 + $0x40] sm:$0xff] %v3676_v41 }
 0x662   : > { %v3618_v42 = vpop.f32.mrf.mxu3 }
 0x663   : > { %v3619_v54 = vadd.f32 %v6113_v5, %v3618_v42 }
 0x665   : > { %vm3645_vm9 = vcmp.ge.f32.partialorder %v3619_v54, 0.0  ;;  %v3661_v25 = vmul.f32 0.4, %v3619_v54 }
 0x667   : > { %v3677_v11 = vsel %vm3645_vm9, %v3619_v54, %v3661_v25 }
 0x668   : > { %3693 = vst [vmem:[%s6117_s22 + $0x48] sm:$0xff] %v3677_v11 }
 0x66a   : > { %v3621_v18 = vpop.f32.mrf.mxu3 }
 0x66b   : > { %v3622_v43 = vadd.f32 %v6113_v5, %v3621_v18 }
 0x66d   : > { %vm3646_vm10 = vcmp.ge.f32.partialorder %v3622_v43, 0.0  ;;  %v3662_v24 = vmul.f32 0.4, %v3622_v43 }
 0x66f   : > { %v3678_v39 = vsel %vm3646_vm10, %v3622_v43, %v3662_v24 }
 0x670   : > { %3694 = vst [vmem:[%s6117_s22 + $0x50] sm:$0xff] %v3678_v39 }
 0x672   : > { %v3623_v45 = vpop.f32.mrf.mxu3 }
 0x673   : > { %v3624_v59 = vadd.f32 %v6113_v5, %v3623_v45 }
 0x675   : > { %vm3647_vm11 = vcmp.ge.f32.partialorder %v3624_v59, 0.0  ;;  %v3663_v52 = vmul.f32 0.4, %v3624_v59 }
 0x677   : > { %v3679_v36 = vsel %vm3647_vm11, %v3624_v59, %v3663_v52 }
 0x678   : > { %3695 = vst [vmem:[%s6117_s22 + $0x58] sm:$0xff] %v3679_v36 }
 0x67a   : > { %v3626_v33 = vpop.f32.mrf.mxu3 }
 0x67b   : > { %v3627_v46 = vadd.f32 %v6113_v5, %v3626_v33 }
 0x67d   : > { %vm3648_vm12 = vcmp.ge.f32.partialorder %v3627_v46, 0.0  ;;  %v3664_v49 = vmul.f32 0.4, %v3627_v46 }
 0x67f   : > { %v3680_v9 = vsel %vm3648_vm12, %v3627_v46, %v3664_v49 }
 0x680   : > { %3696 = vst [vmem:[%s6117_s22 + $0x60] sm:$0xff] %v3680_v9 }
 0x682   : > { %v3628_v14 = vpop.f32.mrf.mxu3 }
 0x683   : > { %v3629_v50 = vadd.f32 %v6113_v5, %v3628_v14 }
 0x685   : > { %vm3649_vm13 = vcmp.ge.f32.partialorder %v3629_v50, 0.0  ;;  %v3665_v20 = vmul.f32 0.4, %v3629_v50 }
 0x687   : > { %v3681_v34 = vsel %vm3649_vm13, %v3629_v50, %v3665_v20 }
 0x688   : > { %3697 = vst [vmem:[%s6117_s22 + $0x68] sm:$0xff] %v3681_v34 }
 0x68a   : > { %v3631_v51 = vpop.f32.mrf.mxu3 }
 0x68b   : > { %v3632_v44 = vadd.f32 %v6113_v5, %v3631_v51 }
 0x68d   : > { %vm3650_vm14 = vcmp.ge.f32.partialorder %v3632_v44, 0.0  ;;  %v3666_v19 = vmul.f32 0.4, %v3632_v44 }
 0x68f   : > { %v3682_v16 = vsel %vm3650_vm14, %v3632_v44, %v3666_v19 }
 0x690   : > { %3698 = vst [vmem:[%s6117_s22 + $0x70] sm:$0xff] %v3682_v16 }
 0x692   : > { %v3633_v48 = vpop.f32.mrf.mxu3 }
 0x693   : > { %v3634_v35 = vadd.f32 %v6113_v5, %v3633_v48 }
 0x695   : > { %vm3651_vm15 = vcmp.ge.f32.partialorder %v3634_v35, 0.0  ;;  %v3667_v0 = vmul.f32 0.4, %v3634_v35 }
 0x697   : > { %v3683_v12 = vsel %vm3651_vm15, %v3634_v35, %v3667_v0 }
 0x698   : > { %3699 = vst [vmem:[%s6117_s22 + $0x78] sm:$0xff] %v3683_v12 }
 0x699   : > { %5279 = shalt.err (!%p5276_p9)
}
 0x69a   : > { %s5356_s10 = smov 128   ;;  %s5357_s22 = smov 8  }
 0x69b   : > { %4802 = dma.vmem_to_hbm [thread:$0]  (%p5596_p4), %s3714_s5, 2048, %s3716_s25, %s3701_s24, %s5356_s10, %s5356_s10, %s5357_s22  }
 0x69c PF: > { %s3730_s29 = sand.u32 1, %s5326_s0   ;;  %p6247_p10 = scmp.ge.s32.totalorder %s5338_s21, 2 }
 0x69d   : > { %s3731_s12 = scalar_lea.sflag [#allocation4], %s3730_s29 }
 0x69e   : > { %p4840_p13 = pnand %p6247_p10, %p5600_p6 }
 0x6a0   : > { %p4841_p11 = pneg %p4840_p13 }
 0x6a2   : > { %5321 = dma.done.wait (%p4841_p11), %s3731_s12, 2048  }
 0x6a3   : > { %5323 = vsyncadd (%p4841_p11), %s3731_s12, 4294965248  ;;  %p37_p0 = scmp.ge.s32.totalorder %s5570_s3, 4   ;;  %s6248_s0 = smov %s5330_s30 }
 0x6a4   : > { %s6249_s30 = smov %s5334_s20  ;;  %s6250_s20 = smov %s5581_s28 }
 0x6a5   : > { %s6251_s21 = smov %s5570_s3  ;;  %39 = sbr.rel (!%p37_p0) target bundleno = 26 (0x1a), region = 181 }
 0x6aa   :  { %3737 = vsyncpa [#allocation3], 1 }
 0x6ab   :  { %3739 = vsyncpa [#allocation3 + $0x1], 1 }
 0x6ac   :  { %3740 = vsyncpa [#allocation6], 1 }
 0x6ad   :  { %3741 = vsyncpa [#allocation9], 1 }
 0x6ae   :  { %3742 = vsyncpa [#allocation12], 1 }
 0x6af   :  { %3743 = vsyncpa [#allocation15], 1 }
 0x6b0   :  { %3744 = vsyncpa [#allocation18], 1 }
 0x6b1   :  { %3745 = vsyncpa [#allocation4], 1 }
 0x6b2   :  { %3747 = vsyncpa [#allocation4 + $0x1], 1 }

</bundles_post_ra>
